<compile_context>
chip_gen: v6e
topology: v6e:2x2x1
jax: 0.10.0
libtpu: 0.0.40
codegen_flags: <defaults>
</compile_context>

<pallas_src>
import functools

import jax
import jax.numpy as jnp
from jax.experimental import pallas as pl
from jax.experimental.pallas import tpu as pltpu

# ---------------- small stand-in configuration ----------------
IMG = 16            # spatial size
PATCH = 8           # patch size -> 2x2 = 4 patches
CIN = 3             # input channels
EMBED = 32          # stand-in for in_planes=768
DEPTH = 2           # transformer blocks
HEADS = 4
HEAD_DIM = EMBED // HEADS
MLP = 2 * EMBED
NUM_CLASSES = 171   # hard-coded in the PyTorch module
CLS_PAD = 256       # lane-dense padding for classifier logits (sliced to 171 outside)
FEAT_PAD = 128      # lane-dense padding for the 3*EMBED=96 feature slab
N_PATCH = (IMG // PATCH) ** 2
SEQ = N_PATCH + 1
PATCH_DIM = CIN * PATCH * PATCH
NUM_VIEWS = 3
BN_EPS = 1e-5
LN_EPS = 1e-6
SCALE = 1.0 / float(HEAD_DIM) ** 0.5


def _ln(x, g, b, eps=LN_EPS):
    mu = jnp.mean(x, axis=-1, keepdims=True)
    var = jnp.mean((x - mu) ** 2, axis=-1, keepdims=True)
    return (x - mu) * jax.lax.rsqrt(var + eps) * g + b


# ------------------------- fused kernel -------------------------
# grid = (NUM_VIEWS * B,): one (view, sample) per step, weights resident in VMEM via
# constant-index BlockSpecs.  Per-sample cls features accumulate into a VMEM scratch;
# the last step runs the BatchNorm1d + classifier epilogue and writes both outputs.

def _fused_kernel(patches_ref, pos_ref, cls_tok_ref, patch_w_ref, patch_b_ref,
                  ln1_g, ln1_b, wq, wk, wv, wo, proj_b,
                  ln2_g, ln2_b, fc1_w, fc1_b, fc2_w, fc2_b,
                  lnf_g, lnf_b, bn_g, bn_b, cls_w,
                  cls_out_ref, feat_out_ref, gf_acc, *, batch):
    s = pl.program_id(0)                           # sample index: view * batch + b

    # patch embedding: Conv2d(kernel=stride=PATCH) == pre-extracted patches @ W
    tok = jnp.dot(patches_ref[0], patch_w_ref[...],
                  preferred_element_type=jnp.float32) + patch_b_ref[...]
    # tokens held in registers: [SEQ, EMBED] = [cls; patches] + pos
    h = jnp.concatenate([cls_tok_ref[...], tok], axis=0) + pos_ref[...]

    # TODO(synk): dropout / drop_path / attn dropout assumed rate 0 (cfg defaults).
    # TODO(synk): at real DEPTH=12 use lax.fori_loop / a depth grid axis, not Python unroll.
    for d in range(DEPTH):
        # --- attention (per-sample, per-head weights, scale folded into wq) ---
        y = _ln(h, ln1_g[d], ln1_b[d])
        attn = jnp.zeros((SEQ, EMBED), jnp.float32)
        for hh in range(HEADS):
            q = jnp.dot(y, wq[d, hh], preferred_element_type=jnp.float32)   # [SEQ, HD]
            k = jnp.dot(y, wk[d, hh], preferred_element_type=jnp.float32)
            v = jnp.dot(y, wv[d, hh], preferred_element_type=jnp.float32)
            sc = jax.lax.dot_general(q, k, (((1,), (1,)), ((), ())),
                                     preferred_element_type=jnp.float32)    # [SEQ, SEQ]
            sc = sc - jnp.max(sc, axis=-1, keepdims=True)
            p = jnp.exp(sc)
            p = p * pl.reciprocal(jnp.sum(p, axis=-1, keepdims=True), approx=True)
            o = jnp.dot(p, v, preferred_element_type=jnp.float32)           # [SEQ, HD]
            attn = attn + jnp.dot(o, wo[d, hh], preferred_element_type=jnp.float32)
        h = h + attn + proj_b[d]

        # --- MLP ---
        y = _ln(h, ln2_g[d], ln2_b[d])
        # TODO(synk): PyTorch nn.GELU defaults to exact erf; tanh approximation used here.
        y = jax.nn.gelu(jnp.dot(y, fc1_w[d], preferred_element_type=jnp.float32) + fc1_b[d],
                        approximate=True)
        h = h + jnp.dot(y, fc2_w[d], preferred_element_type=jnp.float32) + fc2_b[d]

    h = _ln(h, lnf_g[...], lnf_b[...])
    gf_acc[s] = h[0:1, :]                          # this sample's cls feature [1, EMBED]

    # --- fused head epilogue on the last grid step ---
    @pl.when(s == NUM_VIEWS * batch - 1)
    def _():
        # global_feat = cat(gf1, gf2, gf3, dim=1) per original-batch sample
        rows = []
        for b in range(batch):
            rows.append(jnp.concatenate(
                [gf_acc[v * batch + b] for v in range(NUM_VIEWS)], axis=1))  # [1, 3E]
        gfeat = jnp.concatenate(rows, axis=0)                                # [B, 3E]
        feat_out_ref[...] = jnp.concatenate(
            [gfeat, jnp.zeros((batch, FEAT_PAD - NUM_VIEWS * EMBED), jnp.float32)], axis=1)
        # BatchNorm1d train-mode normalization (biased batch variance), gamma=1 beta=0 init.
        # TODO(synk): running_mean/running_var updates (training side effect) not emitted.
        mu = jnp.mean(gfeat, axis=0, keepdims=True)
        var = jnp.mean((gfeat - mu) ** 2, axis=0, keepdims=True)
        xhat = (gfeat - mu) * jax.lax.rsqrt(var + BN_EPS) * bn_g[...] + bn_b[...]
        # classifier: Linear(3D -> 171, bias=False); columns pre-padded to 256 lanes.
        cls_out_ref[...] = jnp.dot(xhat, cls_w[...], preferred_element_type=jnp.float32)


def _fused_forward(params, patches, B):
    bp = params["base"]
    VB = NUM_VIEWS * B
    full2 = lambda s: (0, 0)
    full3 = lambda s: (0, 0, 0)
    full4 = lambda s: (0, 0, 0, 0)
    kernel = functools.partial(_fused_kernel, batch=B)
    return pl.pallas_call(
        kernel,
        grid=(VB,),
        out_shape=(jax.ShapeDtypeStruct((B, CLS_PAD), jnp.float32),
                   jax.ShapeDtypeStruct((B, FEAT_PAD), jnp.float32)),
        in_specs=[
            pl.BlockSpec((1, N_PATCH, PATCH_DIM), lambda s: (s, 0, 0)),   # patches (per sample)
            pl.BlockSpec((SEQ, EMBED), full2),                            # pos_embed
            pl.BlockSpec((1, EMBED), full2),                              # cls token
            pl.BlockSpec((PATCH_DIM, EMBED), full2),                      # patch_w
            pl.BlockSpec((1, EMBED), full2),                              # patch_b
            pl.BlockSpec((DEPTH, 1, EMBED), full3),                       # ln1_g
            pl.BlockSpec((DEPTH, 1, EMBED), full3),                       # ln1_b
            pl.BlockSpec((DEPTH, HEADS, EMBED, HEAD_DIM), full4),         # wq (scale folded)
            pl.BlockSpec((DEPTH, HEADS, EMBED, HEAD_DIM), full4),         # wk
            pl.BlockSpec((DEPTH, HEADS, EMBED, HEAD_DIM), full4),         # wv
            pl.BlockSpec((DEPTH, HEADS, HEAD_DIM, EMBED), full4),         # wo
            pl.BlockSpec((DEPTH, 1, EMBED), full3),                       # proj_b
            pl.BlockSpec((DEPTH, 1, EMBED), full3),                       # ln2_g
            pl.BlockSpec((DEPTH, 1, EMBED), full3),                       # ln2_b
            pl.BlockSpec((DEPTH, EMBED, MLP), full3),                     # fc1_w
            pl.BlockSpec((DEPTH, 1, MLP), full3),                         # fc1_b
            pl.BlockSpec((DEPTH, MLP, EMBED), full3),                     # fc2_w
            pl.BlockSpec((DEPTH, 1, EMBED), full3),                       # fc2_b
            pl.BlockSpec((1, EMBED), full2),                              # lnf_g
            pl.BlockSpec((1, EMBED), full2),                              # lnf_b
            pl.BlockSpec((1, NUM_VIEWS * EMBED), full2),                  # bn_gamma
            pl.BlockSpec((1, NUM_VIEWS * EMBED), full2),                  # bn_beta
            pl.BlockSpec((NUM_VIEWS * EMBED, CLS_PAD), full2),            # cls_w (padded)
        ],
        out_specs=(pl.BlockSpec((B, CLS_PAD), full2),
                   pl.BlockSpec((B, FEAT_PAD), full2)),
        scratch_shapes=[pltpu.VMEM((VB, 1, EMBED), jnp.float32)],
        compiler_params=pltpu.CompilerParams(dimension_semantics=("arbitrary",)),
    )(patches, bp["pos_embed"], bp["cls_token"], bp["patch_w"], bp["patch_b"],
      bp["ln1_g"], bp["ln1_b"], bp["wq"], bp["wk"], bp["wv"], bp["wo"], bp["proj_b"],
      bp["ln2_g"], bp["ln2_b"], bp["fc1_w"], bp["fc1_b"], bp["fc2_w"], bp["fc2_b"],
      bp["lnf_g"], bp["lnf_b"], params["bn_gamma"], params["bn_beta"], params["cls_w_pad"])


# ------------------------- full module forward -------------------------

def build_transformer_forward(params, x1, x2, x3):
    B = x1.shape[0]

    # stack views and extract conv-patches (layout plumbing, depends on x -> stays per call)
    xs = jnp.stack([x1, x2, x3], axis=0)                                  # [3, B, C, H, W]
    patches = xs.reshape(NUM_VIEWS, B, CIN, IMG // PATCH, PATCH, IMG // PATCH, PATCH)
    patches = patches.transpose(0, 1, 3, 5, 2, 4, 6).reshape(NUM_VIEWS * B, N_PATCH, PATCH_DIM)

    cls_pad, feat_pad = _fused_forward(params, patches, B)

    cls_score = cls_pad[:, :NUM_CLASSES]
    global_feat = feat_pad[:, :NUM_VIEWS * EMBED]
    gf1 = feat_pad[:, 0:EMBED]
    gf2 = feat_pad[:, EMBED:2 * EMBED]
    gf3 = feat_pad[:, 2 * EMBED:3 * EMBED]
    return cls_score, (global_feat, gf1, gf2, gf3)


# ------------------------- deterministic parameter init -------------------------

def init_params(key):
    ks = jax.random.split(key, 10)

    def rnd(k, shape, scale=0.02):
        return scale * jax.random.normal(k, shape, dtype=jnp.float32)

    base = {
        "patch_w": rnd(ks[0], (PATCH_DIM, EMBED)),
        "patch_b": jnp.zeros((1, EMBED), jnp.float32),
        "cls_token": rnd(ks[1], (1, EMBED)),
        "pos_embed": rnd(ks[2], (SEQ, EMBED)),
        "ln1_g": jnp.ones((DEPTH, 1, EMBED), jnp.float32),
        "ln1_b": jnp.zeros((DEPTH, 1, EMBED), jnp.float32),
        # per-head projection weights; 1/sqrt(head_dim) folded into wq at init
        "wq": rnd(ks[3], (DEPTH, HEADS, EMBED, HEAD_DIM)) * SCALE,
        "wk": rnd(ks[4], (DEPTH, HEADS, EMBED, HEAD_DIM)),
        "wv": rnd(ks[5], (DEPTH, HEADS, EMBED, HEAD_DIM)),
        "wo": rnd(ks[6], (DEPTH, HEADS, HEAD_DIM, EMBED)),
        "proj_b": jnp.zeros((DEPTH, 1, EMBED), jnp.float32),
        "ln2_g": jnp.ones((DEPTH, 1, EMBED), jnp.float32),
        "ln2_b": jnp.zeros((DEPTH, 1, EMBED), jnp.float32),
        "fc1_w": rnd(ks[7], (DEPTH, EMBED, MLP)),
        "fc1_b": jnp.zeros((DEPTH, 1, MLP), jnp.float32),
        "fc2_w": rnd(ks[8], (DEPTH, MLP, EMBED)),
        "fc2_b": jnp.zeros((DEPTH, 1, EMBED), jnp.float32),
        "lnf_g": jnp.ones((1, EMBED), jnp.float32),
        "lnf_b": jnp.zeros((1, EMBED), jnp.float32),
    }
    # weights_init_classifier: Linear weight ~ N(0, 0.001), no bias; padded to 256 lanes
    # once here (hoisted out of the per-call path).
    cls_w = 0.001 * jax.random.normal(ks[9], (NUM_VIEWS * EMBED, NUM_CLASSES), dtype=jnp.float32)
    cls_w_pad = jnp.pad(cls_w, ((0, 0), (0, CLS_PAD - NUM_CLASSES)))
    return {
        "base": base,
        # weights_init_kaiming on BatchNorm1d: gamma = 1, beta = 0 (beta frozen)
        "bn_gamma": jnp.ones((1, NUM_VIEWS * EMBED), jnp.float32),
        "bn_beta": jnp.zeros((1, NUM_VIEWS * EMBED), jnp.float32),
        "cls_w_pad": cls_w_pad,
    }


if __name__ == "__main__":
    key = jax.random.PRNGKey(0)
    kp, k1, k2, k3 = jax.random.split(key, 4)
    params = init_params(kp)
    B = 2
    x1 = jax.random.normal(k1, (B, CIN, IMG, IMG), dtype=jnp.float32)
    x2 = jax.random.normal(k2, (B, CIN, IMG, IMG), dtype=jnp.float32)
    x3 = jax.random.normal(k3, (B, CIN, IMG, IMG), dtype=jnp.float32)

    fwd = jax.jit(build_transformer_forward)
    cls_score, feats = fwd(params, x1, x2, x3)
    jax.block_until_ready((cls_score, feats))

    assert cls_score.shape == (B, NUM_CLASSES)
    assert feats[0].shape == (B, NUM_VIEWS * EMBED)
    assert feats[1].shape == (B, EMBED)
    assert feats[2].shape == (B, EMBED)
    assert feats[3].shape == (B, EMBED)
    print("KERNEL_OK")
</pallas_src>

<mosaic_0001>
module attributes {stable_mosaic.version = 11 : i64} {
  func.func @_fused_kernel(%arg0: i32, %arg1: memref<1x4x192xf32, #tpu.memory_space<vmem>>, %arg2: memref<5x32xf32, #tpu.memory_space<vmem>>, %arg3: memref<1x32xf32, #tpu.memory_space<vmem>>, %arg4: memref<192x32xf32, #tpu.memory_space<vmem>>, %arg5: memref<1x32xf32, #tpu.memory_space<vmem>>, %arg6: memref<2x1x32xf32, #tpu.memory_space<vmem>>, %arg7: memref<2x1x32xf32, #tpu.memory_space<vmem>>, %arg8: memref<2x4x32x8xf32, #tpu.memory_space<vmem>>, %arg9: memref<2x4x32x8xf32, #tpu.memory_space<vmem>>, %arg10: memref<2x4x32x8xf32, #tpu.memory_space<vmem>>, %arg11: memref<2x4x8x32xf32, #tpu.memory_space<vmem>>, %arg12: memref<2x1x32xf32, #tpu.memory_space<vmem>>, %arg13: memref<2x1x32xf32, #tpu.memory_space<vmem>>, %arg14: memref<2x1x32xf32, #tpu.memory_space<vmem>>, %arg15: memref<2x32x64xf32, #tpu.memory_space<vmem>>, %arg16: memref<2x1x64xf32, #tpu.memory_space<vmem>>, %arg17: memref<2x64x32xf32, #tpu.memory_space<vmem>>, %arg18: memref<2x1x32xf32, #tpu.memory_space<vmem>>, %arg19: memref<1x32xf32, #tpu.memory_space<vmem>>, %arg20: memref<1x32xf32, #tpu.memory_space<vmem>>, %arg21: memref<1x96xf32, #tpu.memory_space<vmem>>, %arg22: memref<1x96xf32, #tpu.memory_space<vmem>>, %arg23: memref<96x256xf32, #tpu.memory_space<vmem>>, %arg24: memref<2x256xf32, #tpu.memory_space<vmem>>, %arg25: memref<2x128xf32, #tpu.memory_space<vmem>>, %arg26: memref<6x1x32xf32, #tpu.memory_space<vmem>>) attributes {dimension_semantics = [#tpu.dimension_semantics<arbitrary>], iteration_bounds = array<i64: 6>, scalar_prefetch = 0 : i64, scratch_operands = 1 : i64, tpu.core_type = #tpu.core_type<tc>, window_params = [{transform_indices = @transform_0, window_bounds = array<i64: 1, 4, 192>}, {pipeline_mode = #tpu.pipeline_mode<synchronous>, transform_indices = @transform_1, window_bounds = array<i64: 5, 32>}, {pipeline_mode = #tpu.pipeline_mode<synchronous>, transform_indices = @transform_2, window_bounds = array<i64: 1, 32>}, {pipeline_mode = #tpu.pipeline_mode<synchronous>, transform_indices = @transform_3, window_bounds = array<i64: 192, 32>}, {pipeline_mode = #tpu.pipeline_mode<synchronous>, transform_indices = @transform_4, window_bounds = array<i64: 1, 32>}, {pipeline_mode = #tpu.pipeline_mode<synchronous>, transform_indices = @transform_5, window_bounds = array<i64: 2, 1, 32>}, {pipeline_mode = #tpu.pipeline_mode<synchronous>, transform_indices = @transform_6, window_bounds = array<i64: 2, 1, 32>}, {pipeline_mode = #tpu.pipeline_mode<synchronous>, transform_indices = @transform_7, window_bounds = array<i64: 2, 4, 32, 8>}, {pipeline_mode = #tpu.pipeline_mode<synchronous>, transform_indices = @transform_8, window_bounds = array<i64: 2, 4, 32, 8>}, {pipeline_mode = #tpu.pipeline_mode<synchronous>, transform_indices = @transform_9, window_bounds = array<i64: 2, 4, 32, 8>}, {pipeline_mode = #tpu.pipeline_mode<synchronous>, transform_indices = @transform_10, window_bounds = array<i64: 2, 4, 8, 32>}, {pipeline_mode = #tpu.pipeline_mode<synchronous>, transform_indices = @transform_11, window_bounds = array<i64: 2, 1, 32>}, {pipeline_mode = #tpu.pipeline_mode<synchronous>, transform_indices = @transform_12, window_bounds = array<i64: 2, 1, 32>}, {pipeline_mode = #tpu.pipeline_mode<synchronous>, transform_indices = @transform_13, window_bounds = array<i64: 2, 1, 32>}, {pipeline_mode = #tpu.pipeline_mode<synchronous>, transform_indices = @transform_14, window_bounds = array<i64: 2, 32, 64>}, {pipeline_mode = #tpu.pipeline_mode<synchronous>, transform_indices = @transform_15, window_bounds = array<i64: 2, 1, 64>}, {pipeline_mode = #tpu.pipeline_mode<synchronous>, transform_indices = @transform_16, window_bounds = array<i64: 2, 64, 32>}, {pipeline_mode = #tpu.pipeline_mode<synchronous>, transform_indices = @transform_17, window_bounds = array<i64: 2, 1, 32>}, {pipeline_mode = #tpu.pipeline_mode<synchronous>, transform_indices = @transform_18, window_bounds = array<i64: 1, 32>}, {pipeline_mode = #tpu.pipeline_mode<synchronous>, transform_indices = @transform_19, window_bounds = array<i64: 1, 32>}, {pipeline_mode = #tpu.pipeline_mode<synchronous>, transform_indices = @transform_20, window_bounds = array<i64: 1, 96>}, {pipeline_mode = #tpu.pipeline_mode<synchronous>, transform_indices = @transform_21, window_bounds = array<i64: 1, 96>}, {pipeline_mode = #tpu.pipeline_mode<synchronous>, transform_indices = @transform_22, window_bounds = array<i64: 96, 256>}, {pipeline_mode = #tpu.pipeline_mode<synchronous>, transform_indices = @transform_23, window_bounds = array<i64: 2, 256>}, {pipeline_mode = #tpu.pipeline_mode<synchronous>, transform_indices = @transform_24, window_bounds = array<i64: 2, 128>}]} {
    %c0 = arith.constant 0 : index
    %c0_0 = arith.constant 0 : index
    %c0_1 = arith.constant 0 : index
    %0 = vector.load %arg1[%c0, %c0_0, %c0_1] : memref<1x4x192xf32, #tpu.memory_space<vmem>>, vector<1x4x192xf32>
    %1 = vector.shape_cast %0 : vector<1x4x192xf32> to vector<4x192xf32>
    %c0_2 = arith.constant 0 : index
    %c0_3 = arith.constant 0 : index
    %2 = vector.load %arg4[%c0_2, %c0_3] : memref<192x32xf32, #tpu.memory_space<vmem>>, vector<192x32xf32>
    %cst = arith.constant dense<0.000000e+00> : vector<4x32xf32>
    %3 = tpu.matmul %1, %2, %cst {dimension_numbers = #tpu.dot_dimension_numbers<[1], [0], [0], [1], [0, 0, 1, 1], [], []>} : vector<4x192xf32>, vector<192x32xf32>, vector<4x32xf32> -> vector<4x32xf32>
    %c0_4 = arith.constant 0 : index
    %c0_5 = arith.constant 0 : index
    %4 = vector.load %arg5[%c0_4, %c0_5] : memref<1x32xf32, #tpu.memory_space<vmem>>, vector<1x32xf32>
    %5 = vector.broadcast %4 : vector<1x32xf32> to vector<4x32xf32>
    %6 = arith.addf %3, %5 : vector<4x32xf32>
    %c0_6 = arith.constant 0 : index
    %c0_7 = arith.constant 0 : index
    %7 = vector.load %arg3[%c0_6, %c0_7] : memref<1x32xf32, #tpu.memory_space<vmem>>, vector<1x32xf32>
    %8 = tpu.concatenate %7, %6 in 0 : vector<1x32xf32>, vector<4x32xf32> -> vector<5x32xf32>
    %c0_8 = arith.constant 0 : index
    %c0_9 = arith.constant 0 : index
    %9 = vector.load %arg2[%c0_8, %c0_9] : memref<5x32xf32, #tpu.memory_space<vmem>>, vector<5x32xf32>
    %10 = arith.addf %8, %9 : vector<5x32xf32>
    %c0_10 = arith.constant 0 : index
    %c0_11 = arith.constant 0 : index
    %c0_12 = arith.constant 0 : index
    %11 = vector.load %arg6[%c0_10, %c0_11, %c0_12] : memref<2x1x32xf32, #tpu.memory_space<vmem>>, vector<1x1x32xf32>
    %12 = vector.shape_cast %11 : vector<1x1x32xf32> to vector<1x32xf32>
    %c0_13 = arith.constant 0 : index
    %c0_14 = arith.constant 0 : index
    %c0_15 = arith.constant 0 : index
    %13 = vector.load %arg7[%c0_13, %c0_14, %c0_15] : memref<2x1x32xf32, #tpu.memory_space<vmem>>, vector<1x1x32xf32>
    %14 = vector.shape_cast %13 : vector<1x1x32xf32> to vector<1x32xf32>
    %cst_16 = arith.constant dense<0.000000e+00> : vector<5xf32>
    %15 = vector.multi_reduction <add>, %10, %cst_16 [1] : vector<5x32xf32> to vector<5xf32>
    %16 = vector.shape_cast %15 : vector<5xf32> to vector<5x1xf32>
    %cst_17 = arith.constant 3.200000e+01 : f32
    %17 = vector.broadcast %cst_17 : f32 to vector<5x1xf32>
    %18 = arith.divf %16, %17 : vector<5x1xf32>
    %19 = vector.broadcast %18 : vector<5x1xf32> to vector<5x32xf32>
    %20 = arith.subf %10, %19 : vector<5x32xf32>
    %21 = arith.mulf %20, %20 : vector<5x32xf32>
    %cst_18 = arith.constant dense<0.000000e+00> : vector<5xf32>
    %22 = vector.multi_reduction <add>, %21, %cst_18 [1] : vector<5x32xf32> to vector<5xf32>
    %23 = vector.shape_cast %22 : vector<5xf32> to vector<5x1xf32>
    %cst_19 = arith.constant 3.200000e+01 : f32
    %24 = vector.broadcast %cst_19 : f32 to vector<5x1xf32>
    %25 = arith.divf %23, %24 : vector<5x1xf32>
    %26 = vector.broadcast %18 : vector<5x1xf32> to vector<5x32xf32>
    %27 = arith.subf %10, %26 : vector<5x32xf32>
    %cst_20 = arith.constant 9.99999997E-7 : f32
    %28 = vector.broadcast %cst_20 : f32 to vector<5x1xf32>
    %29 = arith.addf %25, %28 : vector<5x1xf32>
    %30 = math.rsqrt %29 : vector<5x1xf32>
    %31 = vector.broadcast %30 : vector<5x1xf32> to vector<5x32xf32>
    %32 = arith.mulf %27, %31 : vector<5x32xf32>
    %33 = vector.broadcast %12 : vector<1x32xf32> to vector<5x32xf32>
    %34 = arith.mulf %32, %33 : vector<5x32xf32>
    %35 = vector.broadcast %14 : vector<1x32xf32> to vector<5x32xf32>
    %36 = arith.addf %34, %35 : vector<5x32xf32>
    %cst_21 = arith.constant 0.000000e+00 : f32
    %37 = vector.broadcast %cst_21 : f32 to vector<5x32xf32>
    %c0_22 = arith.constant 0 : index
    %c0_23 = arith.constant 0 : index
    %c0_24 = arith.constant 0 : index
    %c0_25 = arith.constant 0 : index
    %38 = vector.load %arg8[%c0_22, %c0_23, %c0_24, %c0_25] : memref<2x4x32x8xf32, #tpu.memory_space<vmem>>, vector<1x1x32x8xf32>
    %39 = vector.shape_cast %38 : vector<1x1x32x8xf32> to vector<32x8xf32>
    %cst_26 = arith.constant dense<0.000000e+00> : vector<5x8xf32>
    %40 = tpu.matmul %36, %39, %cst_26 {dimension_numbers = #tpu.dot_dimension_numbers<[1], [0], [0], [1], [0, 0, 1, 1], [], []>} : vector<5x32xf32>, vector<32x8xf32>, vector<5x8xf32> -> vector<5x8xf32>
    %c0_27 = arith.constant 0 : index
    %c0_28 = arith.constant 0 : index
    %c0_29 = arith.constant 0 : index
    %c0_30 = arith.constant 0 : index
    %41 = vector.load %arg9[%c0_27, %c0_28, %c0_29, %c0_30] : memref<2x4x32x8xf32, #tpu.memory_space<vmem>>, vector<1x1x32x8xf32>
    %42 = vector.shape_cast %41 : vector<1x1x32x8xf32> to vector<32x8xf32>
    %cst_31 = arith.constant dense<0.000000e+00> : vector<5x8xf32>
    %43 = tpu.matmul %36, %42, %cst_31 {dimension_numbers = #tpu.dot_dimension_numbers<[1], [0], [0], [1], [0, 0, 1, 1], [], []>} : vector<5x32xf32>, vector<32x8xf32>, vector<5x8xf32> -> vector<5x8xf32>
    %c0_32 = arith.constant 0 : index
    %c0_33 = arith.constant 0 : index
    %c0_34 = arith.constant 0 : index
    %c0_35 = arith.constant 0 : index
    %44 = vector.load %arg10[%c0_32, %c0_33, %c0_34, %c0_35] : memref<2x4x32x8xf32, #tpu.memory_space<vmem>>, vector<1x1x32x8xf32>
    %45 = vector.shape_cast %44 : vector<1x1x32x8xf32> to vector<32x8xf32>
    %cst_36 = arith.constant dense<0.000000e+00> : vector<5x8xf32>
    %46 = tpu.matmul %36, %45, %cst_36 {dimension_numbers = #tpu.dot_dimension_numbers<[1], [0], [0], [1], [0, 0, 1, 1], [], []>} : vector<5x32xf32>, vector<32x8xf32>, vector<5x8xf32> -> vector<5x8xf32>
    %cst_37 = arith.constant dense<0.000000e+00> : vector<5x5xf32>
    %47 = tpu.matmul %40, %43, %cst_37 {dimension_numbers = #tpu.dot_dimension_numbers<[1], [1], [0], [0], [0, 0, 1, 0], [], []>} : vector<5x8xf32>, vector<5x8xf32>, vector<5x5xf32> -> vector<5x5xf32>
    %cst_38 = arith.constant dense<0xFF800000> : vector<5xf32>
    %48 = vector.multi_reduction <maximumf>, %47, %cst_38 [1] : vector<5x5xf32> to vector<5xf32>
    %49 = vector.shape_cast %48 : vector<5xf32> to vector<5x1xf32>
    %50 = vector.broadcast %49 : vector<5x1xf32> to vector<5x5xf32>
    %51 = arith.subf %47, %50 : vector<5x5xf32>
    %52 = math.exp %51 : vector<5x5xf32>
    %cst_39 = arith.constant dense<0.000000e+00> : vector<5xf32>
    %53 = vector.multi_reduction <add>, %52, %cst_39 [1] : vector<5x5xf32> to vector<5xf32>
    %54 = vector.shape_cast %53 : vector<5xf32> to vector<5x1xf32>
    %55 = tpu.reciprocal %54 {approx = true} : vector<5x1xf32> -> vector<5x1xf32>
    %56 = vector.broadcast %55 : vector<5x1xf32> to vector<5x5xf32>
    %57 = arith.mulf %52, %56 : vector<5x5xf32>
    %cst_40 = arith.constant dense<0.000000e+00> : vector<5x8xf32>
    %58 = tpu.matmul %57, %46, %cst_40 {dimension_numbers = #tpu.dot_dimension_numbers<[1], [0], [0], [1], [0, 0, 1, 1], [], []>} : vector<5x5xf32>, vector<5x8xf32>, vector<5x8xf32> -> vector<5x8xf32>
    %c0_41 = arith.constant 0 : index
    %c0_42 = arith.constant 0 : index
    %c0_43 = arith.constant 0 : index
    %c0_44 = arith.constant 0 : index
    %59 = vector.load %arg11[%c0_41, %c0_42, %c0_43, %c0_44] : memref<2x4x8x32xf32, #tpu.memory_space<vmem>>, vector<1x1x8x32xf32>
    %60 = vector.shape_cast %59 : vector<1x1x8x32xf32> to vector<8x32xf32>
    %cst_45 = arith.constant dense<0.000000e+00> : vector<5x32xf32>
    %61 = tpu.matmul %58, %60, %cst_45 {dimension_numbers = #tpu.dot_dimension_numbers<[1], [0], [0], [1], [0, 0, 1, 1], [], []>} : vector<5x8xf32>, vector<8x32xf32>, vector<5x32xf32> -> vector<5x32xf32>
    %62 = arith.addf %37, %61 : vector<5x32xf32>
    %c0_46 = arith.constant 0 : index
    %c1 = arith.constant 1 : index
    %c0_47 = arith.constant 0 : index
    %c0_48 = arith.constant 0 : index
    %63 = vector.load %arg8[%c0_46, %c1, %c0_47, %c0_48] : memref<2x4x32x8xf32, #tpu.memory_space<vmem>>, vector<1x1x32x8xf32>
    %64 = vector.shape_cast %63 : vector<1x1x32x8xf32> to vector<32x8xf32>
    %cst_49 = arith.constant dense<0.000000e+00> : vector<5x8xf32>
    %65 = tpu.matmul %36, %64, %cst_49 {dimension_numbers = #tpu.dot_dimension_numbers<[1], [0], [0], [1], [0, 0, 1, 1], [], []>} : vector<5x32xf32>, vector<32x8xf32>, vector<5x8xf32> -> vector<5x8xf32>
    %c0_50 = arith.constant 0 : index
    %c1_51 = arith.constant 1 : index
    %c0_52 = arith.constant 0 : index
    %c0_53 = arith.constant 0 : index
    %66 = vector.load %arg9[%c0_50, %c1_51, %c0_52, %c0_53] : memref<2x4x32x8xf32, #tpu.memory_space<vmem>>, vector<1x1x32x8xf32>
    %67 = vector.shape_cast %66 : vector<1x1x32x8xf32> to vector<32x8xf32>
    %cst_54 = arith.constant dense<0.000000e+00> : vector<5x8xf32>
    %68 = tpu.matmul %36, %67, %cst_54 {dimension_numbers = #tpu.dot_dimension_numbers<[1], [0], [0], [1], [0, 0, 1, 1], [], []>} : vector<5x32xf32>, vector<32x8xf32>, vector<5x8xf32> -> vector<5x8xf32>
    %c0_55 = arith.constant 0 : index
    %c1_56 = arith.constant 1 : index
    %c0_57 = arith.constant 0 : index
    %c0_58 = arith.constant 0 : index
    %69 = vector.load %arg10[%c0_55, %c1_56, %c0_57, %c0_58] : memref<2x4x32x8xf32, #tpu.memory_space<vmem>>, vector<1x1x32x8xf32>
    %70 = vector.shape_cast %69 : vector<1x1x32x8xf32> to vector<32x8xf32>
    %cst_59 = arith.constant dense<0.000000e+00> : vector<5x8xf32>
    %71 = tpu.matmul %36, %70, %cst_59 {dimension_numbers = #tpu.dot_dimension_numbers<[1], [0], [0], [1], [0, 0, 1, 1], [], []>} : vector<5x32xf32>, vector<32x8xf32>, vector<5x8xf32> -> vector<5x8xf32>
    %cst_60 = arith.constant dense<0.000000e+00> : vector<5x5xf32>
    %72 = tpu.matmul %65, %68, %cst_60 {dimension_numbers = #tpu.dot_dimension_numbers<[1], [1], [0], [0], [0, 0, 1, 0], [], []>} : vector<5x8xf32>, vector<5x8xf32>, vector<5x5xf32> -> vector<5x5xf32>
    %cst_61 = arith.constant dense<0xFF800000> : vector<5xf32>
    %73 = vector.multi_reduction <maximumf>, %72, %cst_61 [1] : vector<5x5xf32> to vector<5xf32>
    %74 = vector.shape_cast %73 : vector<5xf32> to vector<5x1xf32>
    %75 = vector.broadcast %74 : vector<5x1xf32> to vector<5x5xf32>
    %76 = arith.subf %72, %75 : vector<5x5xf32>
    %77 = math.exp %76 : vector<5x5xf32>
    %cst_62 = arith.constant dense<0.000000e+00> : vector<5xf32>
    %78 = vector.multi_reduction <add>, %77, %cst_62 [1] : vector<5x5xf32> to vector<5xf32>
    %79 = vector.shape_cast %78 : vector<5xf32> to vector<5x1xf32>
    %80 = tpu.reciprocal %79 {approx = true} : vector<5x1xf32> -> vector<5x1xf32>
    %81 = vector.broadcast %80 : vector<5x1xf32> to vector<5x5xf32>
    %82 = arith.mulf %77, %81 : vector<5x5xf32>
    %cst_63 = arith.constant dense<0.000000e+00> : vector<5x8xf32>
    %83 = tpu.matmul %82, %71, %cst_63 {dimension_numbers = #tpu.dot_dimension_numbers<[1], [0], [0], [1], [0, 0, 1, 1], [], []>} : vector<5x5xf32>, vector<5x8xf32>, vector<5x8xf32> -> vector<5x8xf32>
    %c0_64 = arith.constant 0 : index
    %c1_65 = arith.constant 1 : index
    %c0_66 = arith.constant 0 : index
    %c0_67 = arith.constant 0 : index
    %84 = vector.load %arg11[%c0_64, %c1_65, %c0_66, %c0_67] : memref<2x4x8x32xf32, #tpu.memory_space<vmem>>, vector<1x1x8x32xf32>
    %85 = vector.shape_cast %84 : vector<1x1x8x32xf32> to vector<8x32xf32>
    %cst_68 = arith.constant dense<0.000000e+00> : vector<5x32xf32>
    %86 = tpu.matmul %83, %85, %cst_68 {dimension_numbers = #tpu.dot_dimension_numbers<[1], [0], [0], [1], [0, 0, 1, 1], [], []>} : vector<5x8xf32>, vector<8x32xf32>, vector<5x32xf32> -> vector<5x32xf32>
    %87 = arith.addf %62, %86 : vector<5x32xf32>
    %c0_69 = arith.constant 0 : index
    %c2 = arith.constant 2 : index
    %c0_70 = arith.constant 0 : index
    %c0_71 = arith.constant 0 : index
    %88 = vector.load %arg8[%c0_69, %c2, %c0_70, %c0_71] : memref<2x4x32x8xf32, #tpu.memory_space<vmem>>, vector<1x1x32x8xf32>
    %89 = vector.shape_cast %88 : vector<1x1x32x8xf32> to vector<32x8xf32>
    %cst_72 = arith.constant dense<0.000000e+00> : vector<5x8xf32>
    %90 = tpu.matmul %36, %89, %cst_72 {dimension_numbers = #tpu.dot_dimension_numbers<[1], [0], [0], [1], [0, 0, 1, 1], [], []>} : vector<5x32xf32>, vector<32x8xf32>, vector<5x8xf32> -> vector<5x8xf32>
    %c0_73 = arith.constant 0 : index
    %c2_74 = arith.constant 2 : index
    %c0_75 = arith.constant 0 : index
    %c0_76 = arith.constant 0 : index
    %91 = vector.load %arg9[%c0_73, %c2_74, %c0_75, %c0_76] : memref<2x4x32x8xf32, #tpu.memory_space<vmem>>, vector<1x1x32x8xf32>
    %92 = vector.shape_cast %91 : vector<1x1x32x8xf32> to vector<32x8xf32>
    %cst_77 = arith.constant dense<0.000000e+00> : vector<5x8xf32>
    %93 = tpu.matmul %36, %92, %cst_77 {dimension_numbers = #tpu.dot_dimension_numbers<[1], [0], [0], [1], [0, 0, 1, 1], [], []>} : vector<5x32xf32>, vector<32x8xf32>, vector<5x8xf32> -> vector<5x8xf32>
    %c0_78 = arith.constant 0 : index
    %c2_79 = arith.constant 2 : index
    %c0_80 = arith.constant 0 : index
    %c0_81 = arith.constant 0 : index
    %94 = vector.load %arg10[%c0_78, %c2_79, %c0_80, %c0_81] : memref<2x4x32x8xf32, #tpu.memory_space<vmem>>, vector<1x1x32x8xf32>
    %95 = vector.shape_cast %94 : vector<1x1x32x8xf32> to vector<32x8xf32>
    %cst_82 = arith.constant dense<0.000000e+00> : vector<5x8xf32>
    %96 = tpu.matmul %36, %95, %cst_82 {dimension_numbers = #tpu.dot_dimension_numbers<[1], [0], [0], [1], [0, 0, 1, 1], [], []>} : vector<5x32xf32>, vector<32x8xf32>, vector<5x8xf32> -> vector<5x8xf32>
    %cst_83 = arith.constant dense<0.000000e+00> : vector<5x5xf32>
    %97 = tpu.matmul %90, %93, %cst_83 {dimension_numbers = #tpu.dot_dimension_numbers<[1], [1], [0], [0], [0, 0, 1, 0], [], []>} : vector<5x8xf32>, vector<5x8xf32>, vector<5x5xf32> -> vector<5x5xf32>
    %cst_84 = arith.constant dense<0xFF800000> : vector<5xf32>
    %98 = vector.multi_reduction <maximumf>, %97, %cst_84 [1] : vector<5x5xf32> to vector<5xf32>
    %99 = vector.shape_cast %98 : vector<5xf32> to vector<5x1xf32>
    %100 = vector.broadcast %99 : vector<5x1xf32> to vector<5x5xf32>
    %101 = arith.subf %97, %100 : vector<5x5xf32>
    %102 = math.exp %101 : vector<5x5xf32>
    %cst_85 = arith.constant dense<0.000000e+00> : vector<5xf32>
    %103 = vector.multi_reduction <add>, %102, %cst_85 [1] : vector<5x5xf32> to vector<5xf32>
    %104 = vector.shape_cast %103 : vector<5xf32> to vector<5x1xf32>
    %105 = tpu.reciprocal %104 {approx = true} : vector<5x1xf32> -> vector<5x1xf32>
    %106 = vector.broadcast %105 : vector<5x1xf32> to vector<5x5xf32>
    %107 = arith.mulf %102, %106 : vector<5x5xf32>
    %cst_86 = arith.constant dense<0.000000e+00> : vector<5x8xf32>
    %108 = tpu.matmul %107, %96, %cst_86 {dimension_numbers = #tpu.dot_dimension_numbers<[1], [0], [0], [1], [0, 0, 1, 1], [], []>} : vector<5x5xf32>, vector<5x8xf32>, vector<5x8xf32> -> vector<5x8xf32>
    %c0_87 = arith.constant 0 : index
    %c2_88 = arith.constant 2 : index
    %c0_89 = arith.constant 0 : index
    %c0_90 = arith.constant 0 : index
    %109 = vector.load %arg11[%c0_87, %c2_88, %c0_89, %c0_90] : memref<2x4x8x32xf32, #tpu.memory_space<vmem>>, vector<1x1x8x32xf32>
    %110 = vector.shape_cast %109 : vector<1x1x8x32xf32> to vector<8x32xf32>
    %cst_91 = arith.constant dense<0.000000e+00> : vector<5x32xf32>
    %111 = tpu.matmul %108, %110, %cst_91 {dimension_numbers = #tpu.dot_dimension_numbers<[1], [0], [0], [1], [0, 0, 1, 1], [], []>} : vector<5x8xf32>, vector<8x32xf32>, vector<5x32xf32> -> vector<5x32xf32>
    %112 = arith.addf %87, %111 : vector<5x32xf32>
    %c0_92 = arith.constant 0 : index
    %c3 = arith.constant 3 : index
    %c0_93 = arith.constant 0 : index
    %c0_94 = arith.constant 0 : index
    %113 = vector.load %arg8[%c0_92, %c3, %c0_93, %c0_94] : memref<2x4x32x8xf32, #tpu.memory_space<vmem>>, vector<1x1x32x8xf32>
    %114 = vector.shape_cast %113 : vector<1x1x32x8xf32> to vector<32x8xf32>
    %cst_95 = arith.constant dense<0.000000e+00> : vector<5x8xf32>
    %115 = tpu.matmul %36, %114, %cst_95 {dimension_numbers = #tpu.dot_dimension_numbers<[1], [0], [0], [1], [0, 0, 1, 1], [], []>} : vector<5x32xf32>, vector<32x8xf32>, vector<5x8xf32> -> vector<5x8xf32>
    %c0_96 = arith.constant 0 : index
    %c3_97 = arith.constant 3 : index
    %c0_98 = arith.constant 0 : index
    %c0_99 = arith.constant 0 : index
    %116 = vector.load %arg9[%c0_96, %c3_97, %c0_98, %c0_99] : memref<2x4x32x8xf32, #tpu.memory_space<vmem>>, vector<1x1x32x8xf32>
    %117 = vector.shape_cast %116 : vector<1x1x32x8xf32> to vector<32x8xf32>
    %cst_100 = arith.constant dense<0.000000e+00> : vector<5x8xf32>
    %118 = tpu.matmul %36, %117, %cst_100 {dimension_numbers = #tpu.dot_dimension_numbers<[1], [0], [0], [1], [0, 0, 1, 1], [], []>} : vector<5x32xf32>, vector<32x8xf32>, vector<5x8xf32> -> vector<5x8xf32>
    %c0_101 = arith.constant 0 : index
    %c3_102 = arith.constant 3 : index
    %c0_103 = arith.constant 0 : index
    %c0_104 = arith.constant 0 : index
    %119 = vector.load %arg10[%c0_101, %c3_102, %c0_103, %c0_104] : memref<2x4x32x8xf32, #tpu.memory_space<vmem>>, vector<1x1x32x8xf32>
    %120 = vector.shape_cast %119 : vector<1x1x32x8xf32> to vector<32x8xf32>
    %cst_105 = arith.constant dense<0.000000e+00> : vector<5x8xf32>
    %121 = tpu.matmul %36, %120, %cst_105 {dimension_numbers = #tpu.dot_dimension_numbers<[1], [0], [0], [1], [0, 0, 1, 1], [], []>} : vector<5x32xf32>, vector<32x8xf32>, vector<5x8xf32> -> vector<5x8xf32>
    %cst_106 = arith.constant dense<0.000000e+00> : vector<5x5xf32>
    %122 = tpu.matmul %115, %118, %cst_106 {dimension_numbers = #tpu.dot_dimension_numbers<[1], [1], [0], [0], [0, 0, 1, 0], [], []>} : vector<5x8xf32>, vector<5x8xf32>, vector<5x5xf32> -> vector<5x5xf32>
    %cst_107 = arith.constant dense<0xFF800000> : vector<5xf32>
    %123 = vector.multi_reduction <maximumf>, %122, %cst_107 [1] : vector<5x5xf32> to vector<5xf32>
    %124 = vector.shape_cast %123 : vector<5xf32> to vector<5x1xf32>
    %125 = vector.broadcast %124 : vector<5x1xf32> to vector<5x5xf32>
    %126 = arith.subf %122, %125 : vector<5x5xf32>
    %127 = math.exp %126 : vector<5x5xf32>
    %cst_108 = arith.constant dense<0.000000e+00> : vector<5xf32>
    %128 = vector.multi_reduction <add>, %127, %cst_108 [1] : vector<5x5xf32> to vector<5xf32>
    %129 = vector.shape_cast %128 : vector<5xf32> to vector<5x1xf32>
    %130 = tpu.reciprocal %129 {approx = true} : vector<5x1xf32> -> vector<5x1xf32>
    %131 = vector.broadcast %130 : vector<5x1xf32> to vector<5x5xf32>
    %132 = arith.mulf %127, %131 : vector<5x5xf32>
    %cst_109 = arith.constant dense<0.000000e+00> : vector<5x8xf32>
    %133 = tpu.matmul %132, %121, %cst_109 {dimension_numbers = #tpu.dot_dimension_numbers<[1], [0], [0], [1], [0, 0, 1, 1], [], []>} : vector<5x5xf32>, vector<5x8xf32>, vector<5x8xf32> -> vector<5x8xf32>
    %c0_110 = arith.constant 0 : index
    %c3_111 = arith.constant 3 : index
    %c0_112 = arith.constant 0 : index
    %c0_113 = arith.constant 0 : index
    %134 = vector.load %arg11[%c0_110, %c3_111, %c0_112, %c0_113] : memref<2x4x8x32xf32, #tpu.memory_space<vmem>>, vector<1x1x8x32xf32>
    %135 = vector.shape_cast %134 : vector<1x1x8x32xf32> to vector<8x32xf32>
    %cst_114 = arith.constant dense<0.000000e+00> : vector<5x32xf32>
    %136 = tpu.matmul %133, %135, %cst_114 {dimension_numbers = #tpu.dot_dimension_numbers<[1], [0], [0], [1], [0, 0, 1, 1], [], []>} : vector<5x8xf32>, vector<8x32xf32>, vector<5x32xf32> -> vector<5x32xf32>
    %137 = arith.addf %112, %136 : vector<5x32xf32>
    %138 = arith.addf %10, %137 : vector<5x32xf32>
    %c0_115 = arith.constant 0 : index
    %c0_116 = arith.constant 0 : index
    %c0_117 = arith.constant 0 : index
    %139 = vector.load %arg12[%c0_115, %c0_116, %c0_117] : memref<2x1x32xf32, #tpu.memory_space<vmem>>, vector<1x1x32xf32>
    %140 = vector.shape_cast %139 : vector<1x1x32xf32> to vector<1x32xf32>
    %141 = vector.broadcast %140 : vector<1x32xf32> to vector<5x32xf32>
    %142 = arith.addf %138, %141 : vector<5x32xf32>
    %c0_118 = arith.constant 0 : index
    %c0_119 = arith.constant 0 : index
    %c0_120 = arith.constant 0 : index
    %143 = vector.load %arg13[%c0_118, %c0_119, %c0_120] : memref<2x1x32xf32, #tpu.memory_space<vmem>>, vector<1x1x32xf32>
    %144 = vector.shape_cast %143 : vector<1x1x32xf32> to vector<1x32xf32>
    %c0_121 = arith.constant 0 : index
    %c0_122 = arith.constant 0 : index
    %c0_123 = arith.constant 0 : index
    %145 = vector.load %arg14[%c0_121, %c0_122, %c0_123] : memref<2x1x32xf32, #tpu.memory_space<vmem>>, vector<1x1x32xf32>
    %146 = vector.shape_cast %145 : vector<1x1x32xf32> to vector<1x32xf32>
    %cst_124 = arith.constant dense<0.000000e+00> : vector<5xf32>
    %147 = vector.multi_reduction <add>, %142, %cst_124 [1] : vector<5x32xf32> to vector<5xf32>
    %148 = vector.shape_cast %147 : vector<5xf32> to vector<5x1xf32>
    %cst_125 = arith.constant 3.200000e+01 : f32
    %149 = vector.broadcast %cst_125 : f32 to vector<5x1xf32>
    %150 = arith.divf %148, %149 : vector<5x1xf32>
    %151 = vector.broadcast %150 : vector<5x1xf32> to vector<5x32xf32>
    %152 = arith.subf %142, %151 : vector<5x32xf32>
    %153 = arith.mulf %152, %152 : vector<5x32xf32>
    %cst_126 = arith.constant dense<0.000000e+00> : vector<5xf32>
    %154 = vector.multi_reduction <add>, %153, %cst_126 [1] : vector<5x32xf32> to vector<5xf32>
    %155 = vector.shape_cast %154 : vector<5xf32> to vector<5x1xf32>
    %cst_127 = arith.constant 3.200000e+01 : f32
    %156 = vector.broadcast %cst_127 : f32 to vector<5x1xf32>
    %157 = arith.divf %155, %156 : vector<5x1xf32>
    %158 = vector.broadcast %150 : vector<5x1xf32> to vector<5x32xf32>
    %159 = arith.subf %142, %158 : vector<5x32xf32>
    %cst_128 = arith.constant 9.99999997E-7 : f32
    %160 = vector.broadcast %cst_128 : f32 to vector<5x1xf32>
    %161 = arith.addf %157, %160 : vector<5x1xf32>
    %162 = math.rsqrt %161 : vector<5x1xf32>
    %163 = vector.broadcast %162 : vector<5x1xf32> to vector<5x32xf32>
    %164 = arith.mulf %159, %163 : vector<5x32xf32>
    %165 = vector.broadcast %144 : vector<1x32xf32> to vector<5x32xf32>
    %166 = arith.mulf %164, %165 : vector<5x32xf32>
    %167 = vector.broadcast %146 : vector<1x32xf32> to vector<5x32xf32>
    %168 = arith.addf %166, %167 : vector<5x32xf32>
    %c0_129 = arith.constant 0 : index
    %c0_130 = arith.constant 0 : index
    %c0_131 = arith.constant 0 : index
    %169 = vector.load %arg15[%c0_129, %c0_130, %c0_131] : memref<2x32x64xf32, #tpu.memory_space<vmem>>, vector<1x32x64xf32>
    %170 = vector.shape_cast %169 : vector<1x32x64xf32> to vector<32x64xf32>
    %cst_132 = arith.constant dense<0.000000e+00> : vector<5x64xf32>
    %171 = tpu.matmul %168, %170, %cst_132 {dimension_numbers = #tpu.dot_dimension_numbers<[1], [0], [0], [1], [0, 0, 1, 1], [], []>} : vector<5x32xf32>, vector<32x64xf32>, vector<5x64xf32> -> vector<5x64xf32>
    %c0_133 = arith.constant 0 : index
    %c0_134 = arith.constant 0 : index
    %c0_135 = arith.constant 0 : index
    %172 = vector.load %arg16[%c0_133, %c0_134, %c0_135] : memref<2x1x64xf32, #tpu.memory_space<vmem>>, vector<1x1x64xf32>
    %173 = vector.shape_cast %172 : vector<1x1x64xf32> to vector<1x64xf32>
    %174 = vector.broadcast %173 : vector<1x64xf32> to vector<5x64xf32>
    %175 = arith.addf %171, %174 : vector<5x64xf32>
    %176 = arith.mulf %175, %175 : vector<5x64xf32>
    %177 = arith.mulf %175, %176 : vector<5x64xf32>
    %cst_136 = arith.constant 4.471500e-02 : f32
    %178 = vector.broadcast %cst_136 : f32 to vector<5x64xf32>
    %179 = arith.mulf %178, %177 : vector<5x64xf32>
    %180 = arith.addf %175, %179 : vector<5x64xf32>
    %cst_137 = arith.constant 0.797884583 : f32
    %181 = vector.broadcast %cst_137 : f32 to vector<5x64xf32>
    %182 = arith.mulf %181, %180 : vector<5x64xf32>
    %183 = math.tanh %182 : vector<5x64xf32>
    %cst_138 = arith.constant 1.000000e+00 : f32
    %184 = vector.broadcast %cst_138 : f32 to vector<5x64xf32>
    %185 = arith.addf %184, %183 : vector<5x64xf32>
    %cst_139 = arith.constant 5.000000e-01 : f32
    %186 = vector.broadcast %cst_139 : f32 to vector<5x64xf32>
    %187 = arith.mulf %186, %185 : vector<5x64xf32>
    %188 = arith.mulf %175, %187 : vector<5x64xf32>
    %c0_140 = arith.constant 0 : index
    %c0_141 = arith.constant 0 : index
    %c0_142 = arith.constant 0 : index
    %189 = vector.load %arg17[%c0_140, %c0_141, %c0_142] : memref<2x64x32xf32, #tpu.memory_space<vmem>>, vector<1x64x32xf32>
    %190 = vector.shape_cast %189 : vector<1x64x32xf32> to vector<64x32xf32>
    %cst_143 = arith.constant dense<0.000000e+00> : vector<5x32xf32>
    %191 = tpu.matmul %188, %190, %cst_143 {dimension_numbers = #tpu.dot_dimension_numbers<[1], [0], [0], [1], [0, 0, 1, 1], [], []>} : vector<5x64xf32>, vector<64x32xf32>, vector<5x32xf32> -> vector<5x32xf32>
    %192 = arith.addf %142, %191 : vector<5x32xf32>
    %c0_144 = arith.constant 0 : index
    %c0_145 = arith.constant 0 : index
    %c0_146 = arith.constant 0 : index
    %193 = vector.load %arg18[%c0_144, %c0_145, %c0_146] : memref<2x1x32xf32, #tpu.memory_space<vmem>>, vector<1x1x32xf32>
    %194 = vector.shape_cast %193 : vector<1x1x32xf32> to vector<1x32xf32>
    %195 = vector.broadcast %194 : vector<1x32xf32> to vector<5x32xf32>
    %196 = arith.addf %192, %195 : vector<5x32xf32>
    %c1_147 = arith.constant 1 : index
    %c0_148 = arith.constant 0 : index
    %c0_149 = arith.constant 0 : index
    %197 = vector.load %arg6[%c1_147, %c0_148, %c0_149] : memref<2x1x32xf32, #tpu.memory_space<vmem>>, vector<1x1x32xf32>
    %198 = vector.shape_cast %197 : vector<1x1x32xf32> to vector<1x32xf32>
    %c1_150 = arith.constant 1 : index
    %c0_151 = arith.constant 0 : index
    %c0_152 = arith.constant 0 : index
    %199 = vector.load %arg7[%c1_150, %c0_151, %c0_152] : memref<2x1x32xf32, #tpu.memory_space<vmem>>, vector<1x1x32xf32>
    %200 = vector.shape_cast %199 : vector<1x1x32xf32> to vector<1x32xf32>
    %cst_153 = arith.constant dense<0.000000e+00> : vector<5xf32>
    %201 = vector.multi_reduction <add>, %196, %cst_153 [1] : vector<5x32xf32> to vector<5xf32>
    %202 = vector.shape_cast %201 : vector<5xf32> to vector<5x1xf32>
    %cst_154 = arith.constant 3.200000e+01 : f32
    %203 = vector.broadcast %cst_154 : f32 to vector<5x1xf32>
    %204 = arith.divf %202, %203 : vector<5x1xf32>
    %205 = vector.broadcast %204 : vector<5x1xf32> to vector<5x32xf32>
    %206 = arith.subf %196, %205 : vector<5x32xf32>
    %207 = arith.mulf %206, %206 : vector<5x32xf32>
    %cst_155 = arith.constant dense<0.000000e+00> : vector<5xf32>
    %208 = vector.multi_reduction <add>, %207, %cst_155 [1] : vector<5x32xf32> to vector<5xf32>
    %209 = vector.shape_cast %208 : vector<5xf32> to vector<5x1xf32>
    %cst_156 = arith.constant 3.200000e+01 : f32
    %210 = vector.broadcast %cst_156 : f32 to vector<5x1xf32>
    %211 = arith.divf %209, %210 : vector<5x1xf32>
    %212 = vector.broadcast %204 : vector<5x1xf32> to vector<5x32xf32>
    %213 = arith.subf %196, %212 : vector<5x32xf32>
    %cst_157 = arith.constant 9.99999997E-7 : f32
    %214 = vector.broadcast %cst_157 : f32 to vector<5x1xf32>
    %215 = arith.addf %211, %214 : vector<5x1xf32>
    %216 = math.rsqrt %215 : vector<5x1xf32>
    %217 = vector.broadcast %216 : vector<5x1xf32> to vector<5x32xf32>
    %218 = arith.mulf %213, %217 : vector<5x32xf32>
    %219 = vector.broadcast %198 : vector<1x32xf32> to vector<5x32xf32>
    %220 = arith.mulf %218, %219 : vector<5x32xf32>
    %221 = vector.broadcast %200 : vector<1x32xf32> to vector<5x32xf32>
    %222 = arith.addf %220, %221 : vector<5x32xf32>
    %cst_158 = arith.constant 0.000000e+00 : f32
    %223 = vector.broadcast %cst_158 : f32 to vector<5x32xf32>
    %c1_159 = arith.constant 1 : index
    %c0_160 = arith.constant 0 : index
    %c0_161 = arith.constant 0 : index
    %c0_162 = arith.constant 0 : index
    %224 = vector.load %arg8[%c1_159, %c0_160, %c0_161, %c0_162] : memref<2x4x32x8xf32, #tpu.memory_space<vmem>>, vector<1x1x32x8xf32>
    %225 = vector.shape_cast %224 : vector<1x1x32x8xf32> to vector<32x8xf32>
    %cst_163 = arith.constant dense<0.000000e+00> : vector<5x8xf32>
    %226 = tpu.matmul %222, %225, %cst_163 {dimension_numbers = #tpu.dot_dimension_numbers<[1], [0], [0], [1], [0, 0, 1, 1], [], []>} : vector<5x32xf32>, vector<32x8xf32>, vector<5x8xf32> -> vector<5x8xf32>
    %c1_164 = arith.constant 1 : index
    %c0_165 = arith.constant 0 : index
    %c0_166 = arith.constant 0 : index
    %c0_167 = arith.constant 0 : index
    %227 = vector.load %arg9[%c1_164, %c0_165, %c0_166, %c0_167] : memref<2x4x32x8xf32, #tpu.memory_space<vmem>>, vector<1x1x32x8xf32>
    %228 = vector.shape_cast %227 : vector<1x1x32x8xf32> to vector<32x8xf32>
    %cst_168 = arith.constant dense<0.000000e+00> : vector<5x8xf32>
    %229 = tpu.matmul %222, %228, %cst_168 {dimension_numbers = #tpu.dot_dimension_numbers<[1], [0], [0], [1], [0, 0, 1, 1], [], []>} : vector<5x32xf32>, vector<32x8xf32>, vector<5x8xf32> -> vector<5x8xf32>
    %c1_169 = arith.constant 1 : index
    %c0_170 = arith.constant 0 : index
    %c0_171 = arith.constant 0 : index
    %c0_172 = arith.constant 0 : index
    %230 = vector.load %arg10[%c1_169, %c0_170, %c0_171, %c0_172] : memref<2x4x32x8xf32, #tpu.memory_space<vmem>>, vector<1x1x32x8xf32>
    %231 = vector.shape_cast %230 : vector<1x1x32x8xf32> to vector<32x8xf32>
    %cst_173 = arith.constant dense<0.000000e+00> : vector<5x8xf32>
    %232 = tpu.matmul %222, %231, %cst_173 {dimension_numbers = #tpu.dot_dimension_numbers<[1], [0], [0], [1], [0, 0, 1, 1], [], []>} : vector<5x32xf32>, vector<32x8xf32>, vector<5x8xf32> -> vector<5x8xf32>
    %cst_174 = arith.constant dense<0.000000e+00> : vector<5x5xf32>
    %233 = tpu.matmul %226, %229, %cst_174 {dimension_numbers = #tpu.dot_dimension_numbers<[1], [1], [0], [0], [0, 0, 1, 0], [], []>} : vector<5x8xf32>, vector<5x8xf32>, vector<5x5xf32> -> vector<5x5xf32>
    %cst_175 = arith.constant dense<0xFF800000> : vector<5xf32>
    %234 = vector.multi_reduction <maximumf>, %233, %cst_175 [1] : vector<5x5xf32> to vector<5xf32>
    %235 = vector.shape_cast %234 : vector<5xf32> to vector<5x1xf32>
    %236 = vector.broadcast %235 : vector<5x1xf32> to vector<5x5xf32>
    %237 = arith.subf %233, %236 : vector<5x5xf32>
    %238 = math.exp %237 : vector<5x5xf32>
    %cst_176 = arith.constant dense<0.000000e+00> : vector<5xf32>
    %239 = vector.multi_reduction <add>, %238, %cst_176 [1] : vector<5x5xf32> to vector<5xf32>
    %240 = vector.shape_cast %239 : vector<5xf32> to vector<5x1xf32>
    %241 = tpu.reciprocal %240 {approx = true} : vector<5x1xf32> -> vector<5x1xf32>
    %242 = vector.broadcast %241 : vector<5x1xf32> to vector<5x5xf32>
    %243 = arith.mulf %238, %242 : vector<5x5xf32>
    %cst_177 = arith.constant dense<0.000000e+00> : vector<5x8xf32>
    %244 = tpu.matmul %243, %232, %cst_177 {dimension_numbers = #tpu.dot_dimension_numbers<[1], [0], [0], [1], [0, 0, 1, 1], [], []>} : vector<5x5xf32>, vector<5x8xf32>, vector<5x8xf32> -> vector<5x8xf32>
    %c1_178 = arith.constant 1 : index
    %c0_179 = arith.constant 0 : index
    %c0_180 = arith.constant 0 : index
    %c0_181 = arith.constant 0 : index
    %245 = vector.load %arg11[%c1_178, %c0_179, %c0_180, %c0_181] : memref<2x4x8x32xf32, #tpu.memory_space<vmem>>, vector<1x1x8x32xf32>
    %246 = vector.shape_cast %245 : vector<1x1x8x32xf32> to vector<8x32xf32>
    %cst_182 = arith.constant dense<0.000000e+00> : vector<5x32xf32>
    %247 = tpu.matmul %244, %246, %cst_182 {dimension_numbers = #tpu.dot_dimension_numbers<[1], [0], [0], [1], [0, 0, 1, 1], [], []>} : vector<5x8xf32>, vector<8x32xf32>, vector<5x32xf32> -> vector<5x32xf32>
    %248 = arith.addf %223, %247 : vector<5x32xf32>
    %c1_183 = arith.constant 1 : index
    %c1_184 = arith.constant 1 : index
    %c0_185 = arith.constant 0 : index
    %c0_186 = arith.constant 0 : index
    %249 = vector.load %arg8[%c1_183, %c1_184, %c0_185, %c0_186] : memref<2x4x32x8xf32, #tpu.memory_space<vmem>>, vector<1x1x32x8xf32>
    %250 = vector.shape_cast %249 : vector<1x1x32x8xf32> to vector<32x8xf32>
    %cst_187 = arith.constant dense<0.000000e+00> : vector<5x8xf32>
    %251 = tpu.matmul %222, %250, %cst_187 {dimension_numbers = #tpu.dot_dimension_numbers<[1], [0], [0], [1], [0, 0, 1, 1], [], []>} : vector<5x32xf32>, vector<32x8xf32>, vector<5x8xf32> -> vector<5x8xf32>
    %c1_188 = arith.constant 1 : index
    %c1_189 = arith.constant 1 : index
    %c0_190 = arith.constant 0 : index
    %c0_191 = arith.constant 0 : index
    %252 = vector.load %arg9[%c1_188, %c1_189, %c0_190, %c0_191] : memref<2x4x32x8xf32, #tpu.memory_space<vmem>>, vector<1x1x32x8xf32>
    %253 = vector.shape_cast %252 : vector<1x1x32x8xf32> to vector<32x8xf32>
    %cst_192 = arith.constant dense<0.000000e+00> : vector<5x8xf32>
    %254 = tpu.matmul %222, %253, %cst_192 {dimension_numbers = #tpu.dot_dimension_numbers<[1], [0], [0], [1], [0, 0, 1, 1], [], []>} : vector<5x32xf32>, vector<32x8xf32>, vector<5x8xf32> -> vector<5x8xf32>
    %c1_193 = arith.constant 1 : index
    %c1_194 = arith.constant 1 : index
    %c0_195 = arith.constant 0 : index
    %c0_196 = arith.constant 0 : index
    %255 = vector.load %arg10[%c1_193, %c1_194, %c0_195, %c0_196] : memref<2x4x32x8xf32, #tpu.memory_space<vmem>>, vector<1x1x32x8xf32>
    %256 = vector.shape_cast %255 : vector<1x1x32x8xf32> to vector<32x8xf32>
    %cst_197 = arith.constant dense<0.000000e+00> : vector<5x8xf32>
    %257 = tpu.matmul %222, %256, %cst_197 {dimension_numbers = #tpu.dot_dimension_numbers<[1], [0], [0], [1], [0, 0, 1, 1], [], []>} : vector<5x32xf32>, vector<32x8xf32>, vector<5x8xf32> -> vector<5x8xf32>
    %cst_198 = arith.constant dense<0.000000e+00> : vector<5x5xf32>
    %258 = tpu.matmul %251, %254, %cst_198 {dimension_numbers = #tpu.dot_dimension_numbers<[1], [1], [0], [0], [0, 0, 1, 0], [], []>} : vector<5x8xf32>, vector<5x8xf32>, vector<5x5xf32> -> vector<5x5xf32>
    %cst_199 = arith.constant dense<0xFF800000> : vector<5xf32>
    %259 = vector.multi_reduction <maximumf>, %258, %cst_199 [1] : vector<5x5xf32> to vector<5xf32>
    %260 = vector.shape_cast %259 : vector<5xf32> to vector<5x1xf32>
    %261 = vector.broadcast %260 : vector<5x1xf32> to vector<5x5xf32>
    %262 = arith.subf %258, %261 : vector<5x5xf32>
    %263 = math.exp %262 : vector<5x5xf32>
    %cst_200 = arith.constant dense<0.000000e+00> : vector<5xf32>
    %264 = vector.multi_reduction <add>, %263, %cst_200 [1] : vector<5x5xf32> to vector<5xf32>
    %265 = vector.shape_cast %264 : vector<5xf32> to vector<5x1xf32>
    %266 = tpu.reciprocal %265 {approx = true} : vector<5x1xf32> -> vector<5x1xf32>
    %267 = vector.broadcast %266 : vector<5x1xf32> to vector<5x5xf32>
    %268 = arith.mulf %263, %267 : vector<5x5xf32>
    %cst_201 = arith.constant dense<0.000000e+00> : vector<5x8xf32>
    %269 = tpu.matmul %268, %257, %cst_201 {dimension_numbers = #tpu.dot_dimension_numbers<[1], [0], [0], [1], [0, 0, 1, 1], [], []>} : vector<5x5xf32>, vector<5x8xf32>, vector<5x8xf32> -> vector<5x8xf32>
    %c1_202 = arith.constant 1 : index
    %c1_203 = arith.constant 1 : index
    %c0_204 = arith.constant 0 : index
    %c0_205 = arith.constant 0 : index
    %270 = vector.load %arg11[%c1_202, %c1_203, %c0_204, %c0_205] : memref<2x4x8x32xf32, #tpu.memory_space<vmem>>, vector<1x1x8x32xf32>
    %271 = vector.shape_cast %270 : vector<1x1x8x32xf32> to vector<8x32xf32>
    %cst_206 = arith.constant dense<0.000000e+00> : vector<5x32xf32>
    %272 = tpu.matmul %269, %271, %cst_206 {dimension_numbers = #tpu.dot_dimension_numbers<[1], [0], [0], [1], [0, 0, 1, 1], [], []>} : vector<5x8xf32>, vector<8x32xf32>, vector<5x32xf32> -> vector<5x32xf32>
    %273 = arith.addf %248, %272 : vector<5x32xf32>
    %c1_207 = arith.constant 1 : index
    %c2_208 = arith.constant 2 : index
    %c0_209 = arith.constant 0 : index
    %c0_210 = arith.constant 0 : index
    %274 = vector.load %arg8[%c1_207, %c2_208, %c0_209, %c0_210] : memref<2x4x32x8xf32, #tpu.memory_space<vmem>>, vector<1x1x32x8xf32>
    %275 = vector.shape_cast %274 : vector<1x1x32x8xf32> to vector<32x8xf32>
    %cst_211 = arith.constant dense<0.000000e+00> : vector<5x8xf32>
    %276 = tpu.matmul %222, %275, %cst_211 {dimension_numbers = #tpu.dot_dimension_numbers<[1], [0], [0], [1], [0, 0, 1, 1], [], []>} : vector<5x32xf32>, vector<32x8xf32>, vector<5x8xf32> -> vector<5x8xf32>
    %c1_212 = arith.constant 1 : index
    %c2_213 = arith.constant 2 : index
    %c0_214 = arith.constant 0 : index
    %c0_215 = arith.constant 0 : index
    %277 = vector.load %arg9[%c1_212, %c2_213, %c0_214, %c0_215] : memref<2x4x32x8xf32, #tpu.memory_space<vmem>>, vector<1x1x32x8xf32>
    %278 = vector.shape_cast %277 : vector<1x1x32x8xf32> to vector<32x8xf32>
    %cst_216 = arith.constant dense<0.000000e+00> : vector<5x8xf32>
    %279 = tpu.matmul %222, %278, %cst_216 {dimension_numbers = #tpu.dot_dimension_numbers<[1], [0], [0], [1], [0, 0, 1, 1], [], []>} : vector<5x32xf32>, vector<32x8xf32>, vector<5x8xf32> -> vector<5x8xf32>
    %c1_217 = arith.constant 1 : index
    %c2_218 = arith.constant 2 : index
    %c0_219 = arith.constant 0 : index
    %c0_220 = arith.constant 0 : index
    %280 = vector.load %arg10[%c1_217, %c2_218, %c0_219, %c0_220] : memref<2x4x32x8xf32, #tpu.memory_space<vmem>>, vector<1x1x32x8xf32>
    %281 = vector.shape_cast %280 : vector<1x1x32x8xf32> to vector<32x8xf32>
    %cst_221 = arith.constant dense<0.000000e+00> : vector<5x8xf32>
    %282 = tpu.matmul %222, %281, %cst_221 {dimension_numbers = #tpu.dot_dimension_numbers<[1], [0], [0], [1], [0, 0, 1, 1], [], []>} : vector<5x32xf32>, vector<32x8xf32>, vector<5x8xf32> -> vector<5x8xf32>
    %cst_222 = arith.constant dense<0.000000e+00> : vector<5x5xf32>
    %283 = tpu.matmul %276, %279, %cst_222 {dimension_numbers = #tpu.dot_dimension_numbers<[1], [1], [0], [0], [0, 0, 1, 0], [], []>} : vector<5x8xf32>, vector<5x8xf32>, vector<5x5xf32> -> vector<5x5xf32>
    %cst_223 = arith.constant dense<0xFF800000> : vector<5xf32>
    %284 = vector.multi_reduction <maximumf>, %283, %cst_223 [1] : vector<5x5xf32> to vector<5xf32>
    %285 = vector.shape_cast %284 : vector<5xf32> to vector<5x1xf32>
    %286 = vector.broadcast %285 : vector<5x1xf32> to vector<5x5xf32>
    %287 = arith.subf %283, %286 : vector<5x5xf32>
    %288 = math.exp %287 : vector<5x5xf32>
    %cst_224 = arith.constant dense<0.000000e+00> : vector<5xf32>
    %289 = vector.multi_reduction <add>, %288, %cst_224 [1] : vector<5x5xf32> to vector<5xf32>
    %290 = vector.shape_cast %289 : vector<5xf32> to vector<5x1xf32>
    %291 = tpu.reciprocal %290 {approx = true} : vector<5x1xf32> -> vector<5x1xf32>
    %292 = vector.broadcast %291 : vector<5x1xf32> to vector<5x5xf32>
    %293 = arith.mulf %288, %292 : vector<5x5xf32>
    %cst_225 = arith.constant dense<0.000000e+00> : vector<5x8xf32>
    %294 = tpu.matmul %293, %282, %cst_225 {dimension_numbers = #tpu.dot_dimension_numbers<[1], [0], [0], [1], [0, 0, 1, 1], [], []>} : vector<5x5xf32>, vector<5x8xf32>, vector<5x8xf32> -> vector<5x8xf32>
    %c1_226 = arith.constant 1 : index
    %c2_227 = arith.constant 2 : index
    %c0_228 = arith.constant 0 : index
    %c0_229 = arith.constant 0 : index
    %295 = vector.load %arg11[%c1_226, %c2_227, %c0_228, %c0_229] : memref<2x4x8x32xf32, #tpu.memory_space<vmem>>, vector<1x1x8x32xf32>
    %296 = vector.shape_cast %295 : vector<1x1x8x32xf32> to vector<8x32xf32>
    %cst_230 = arith.constant dense<0.000000e+00> : vector<5x32xf32>
    %297 = tpu.matmul %294, %296, %cst_230 {dimension_numbers = #tpu.dot_dimension_numbers<[1], [0], [0], [1], [0, 0, 1, 1], [], []>} : vector<5x8xf32>, vector<8x32xf32>, vector<5x32xf32> -> vector<5x32xf32>
    %298 = arith.addf %273, %297 : vector<5x32xf32>
    %c1_231 = arith.constant 1 : index
    %c3_232 = arith.constant 3 : index
    %c0_233 = arith.constant 0 : index
    %c0_234 = arith.constant 0 : index
    %299 = vector.load %arg8[%c1_231, %c3_232, %c0_233, %c0_234] : memref<2x4x32x8xf32, #tpu.memory_space<vmem>>, vector<1x1x32x8xf32>
    %300 = vector.shape_cast %299 : vector<1x1x32x8xf32> to vector<32x8xf32>
    %cst_235 = arith.constant dense<0.000000e+00> : vector<5x8xf32>
    %301 = tpu.matmul %222, %300, %cst_235 {dimension_numbers = #tpu.dot_dimension_numbers<[1], [0], [0], [1], [0, 0, 1, 1], [], []>} : vector<5x32xf32>, vector<32x8xf32>, vector<5x8xf32> -> vector<5x8xf32>
    %c1_236 = arith.constant 1 : index
    %c3_237 = arith.constant 3 : index
    %c0_238 = arith.constant 0 : index
    %c0_239 = arith.constant 0 : index
    %302 = vector.load %arg9[%c1_236, %c3_237, %c0_238, %c0_239] : memref<2x4x32x8xf32, #tpu.memory_space<vmem>>, vector<1x1x32x8xf32>
    %303 = vector.shape_cast %302 : vector<1x1x32x8xf32> to vector<32x8xf32>
    %cst_240 = arith.constant dense<0.000000e+00> : vector<5x8xf32>
    %304 = tpu.matmul %222, %303, %cst_240 {dimension_numbers = #tpu.dot_dimension_numbers<[1], [0], [0], [1], [0, 0, 1, 1], [], []>} : vector<5x32xf32>, vector<32x8xf32>, vector<5x8xf32> -> vector<5x8xf32>
    %c1_241 = arith.constant 1 : index
    %c3_242 = arith.constant 3 : index
    %c0_243 = arith.constant 0 : index
    %c0_244 = arith.constant 0 : index
    %305 = vector.load %arg10[%c1_241, %c3_242, %c0_243, %c0_244] : memref<2x4x32x8xf32, #tpu.memory_space<vmem>>, vector<1x1x32x8xf32>
    %306 = vector.shape_cast %305 : vector<1x1x32x8xf32> to vector<32x8xf32>
    %cst_245 = arith.constant dense<0.000000e+00> : vector<5x8xf32>
    %307 = tpu.matmul %222, %306, %cst_245 {dimension_numbers = #tpu.dot_dimension_numbers<[1], [0], [0], [1], [0, 0, 1, 1], [], []>} : vector<5x32xf32>, vector<32x8xf32>, vector<5x8xf32> -> vector<5x8xf32>
    %cst_246 = arith.constant dense<0.000000e+00> : vector<5x5xf32>
    %308 = tpu.matmul %301, %304, %cst_246 {dimension_numbers = #tpu.dot_dimension_numbers<[1], [1], [0], [0], [0, 0, 1, 0], [], []>} : vector<5x8xf32>, vector<5x8xf32>, vector<5x5xf32> -> vector<5x5xf32>
    %cst_247 = arith.constant dense<0xFF800000> : vector<5xf32>
    %309 = vector.multi_reduction <maximumf>, %308, %cst_247 [1] : vector<5x5xf32> to vector<5xf32>
    %310 = vector.shape_cast %309 : vector<5xf32> to vector<5x1xf32>
    %311 = vector.broadcast %310 : vector<5x1xf32> to vector<5x5xf32>
    %312 = arith.subf %308, %311 : vector<5x5xf32>
    %313 = math.exp %312 : vector<5x5xf32>
    %cst_248 = arith.constant dense<0.000000e+00> : vector<5xf32>
    %314 = vector.multi_reduction <add>, %313, %cst_248 [1] : vector<5x5xf32> to vector<5xf32>
    %315 = vector.shape_cast %314 : vector<5xf32> to vector<5x1xf32>
    %316 = tpu.reciprocal %315 {approx = true} : vector<5x1xf32> -> vector<5x1xf32>
    %317 = vector.broadcast %316 : vector<5x1xf32> to vector<5x5xf32>
    %318 = arith.mulf %313, %317 : vector<5x5xf32>
    %cst_249 = arith.constant dense<0.000000e+00> : vector<5x8xf32>
    %319 = tpu.matmul %318, %307, %cst_249 {dimension_numbers = #tpu.dot_dimension_numbers<[1], [0], [0], [1], [0, 0, 1, 1], [], []>} : vector<5x5xf32>, vector<5x8xf32>, vector<5x8xf32> -> vector<5x8xf32>
    %c1_250 = arith.constant 1 : index
    %c3_251 = arith.constant 3 : index
    %c0_252 = arith.constant 0 : index
    %c0_253 = arith.constant 0 : index
    %320 = vector.load %arg11[%c1_250, %c3_251, %c0_252, %c0_253] : memref<2x4x8x32xf32, #tpu.memory_space<vmem>>, vector<1x1x8x32xf32>
    %321 = vector.shape_cast %320 : vector<1x1x8x32xf32> to vector<8x32xf32>
    %cst_254 = arith.constant dense<0.000000e+00> : vector<5x32xf32>
    %322 = tpu.matmul %319, %321, %cst_254 {dimension_numbers = #tpu.dot_dimension_numbers<[1], [0], [0], [1], [0, 0, 1, 1], [], []>} : vector<5x8xf32>, vector<8x32xf32>, vector<5x32xf32> -> vector<5x32xf32>
    %323 = arith.addf %298, %322 : vector<5x32xf32>
    %324 = arith.addf %196, %323 : vector<5x32xf32>
    %c1_255 = arith.constant 1 : index
    %c0_256 = arith.constant 0 : index
    %c0_257 = arith.constant 0 : index
    %325 = vector.load %arg12[%c1_255, %c0_256, %c0_257] : memref<2x1x32xf32, #tpu.memory_space<vmem>>, vector<1x1x32xf32>
    %326 = vector.shape_cast %325 : vector<1x1x32xf32> to vector<1x32xf32>
    %327 = vector.broadcast %326 : vector<1x32xf32> to vector<5x32xf32>
    %328 = arith.addf %324, %327 : vector<5x32xf32>
    %c1_258 = arith.constant 1 : index
    %c0_259 = arith.constant 0 : index
    %c0_260 = arith.constant 0 : index
    %329 = vector.load %arg13[%c1_258, %c0_259, %c0_260] : memref<2x1x32xf32, #tpu.memory_space<vmem>>, vector<1x1x32xf32>
    %330 = vector.shape_cast %329 : vector<1x1x32xf32> to vector<1x32xf32>
    %c1_261 = arith.constant 1 : index
    %c0_262 = arith.constant 0 : index
    %c0_263 = arith.constant 0 : index
    %331 = vector.load %arg14[%c1_261, %c0_262, %c0_263] : memref<2x1x32xf32, #tpu.memory_space<vmem>>, vector<1x1x32xf32>
    %332 = vector.shape_cast %331 : vector<1x1x32xf32> to vector<1x32xf32>
    %cst_264 = arith.constant dense<0.000000e+00> : vector<5xf32>
    %333 = vector.multi_reduction <add>, %328, %cst_264 [1] : vector<5x32xf32> to vector<5xf32>
    %334 = vector.shape_cast %333 : vector<5xf32> to vector<5x1xf32>
    %cst_265 = arith.constant 3.200000e+01 : f32
    %335 = vector.broadcast %cst_265 : f32 to vector<5x1xf32>
    %336 = arith.divf %334, %335 : vector<5x1xf32>
    %337 = vector.broadcast %336 : vector<5x1xf32> to vector<5x32xf32>
    %338 = arith.subf %328, %337 : vector<5x32xf32>
    %339 = arith.mulf %338, %338 : vector<5x32xf32>
    %cst_266 = arith.constant dense<0.000000e+00> : vector<5xf32>
    %340 = vector.multi_reduction <add>, %339, %cst_266 [1] : vector<5x32xf32> to vector<5xf32>
    %341 = vector.shape_cast %340 : vector<5xf32> to vector<5x1xf32>
    %cst_267 = arith.constant 3.200000e+01 : f32
    %342 = vector.broadcast %cst_267 : f32 to vector<5x1xf32>
    %343 = arith.divf %341, %342 : vector<5x1xf32>
    %344 = vector.broadcast %336 : vector<5x1xf32> to vector<5x32xf32>
    %345 = arith.subf %328, %344 : vector<5x32xf32>
    %cst_268 = arith.constant 9.99999997E-7 : f32
    %346 = vector.broadcast %cst_268 : f32 to vector<5x1xf32>
    %347 = arith.addf %343, %346 : vector<5x1xf32>
    %348 = math.rsqrt %347 : vector<5x1xf32>
    %349 = vector.broadcast %348 : vector<5x1xf32> to vector<5x32xf32>
    %350 = arith.mulf %345, %349 : vector<5x32xf32>
    %351 = vector.broadcast %330 : vector<1x32xf32> to vector<5x32xf32>
    %352 = arith.mulf %350, %351 : vector<5x32xf32>
    %353 = vector.broadcast %332 : vector<1x32xf32> to vector<5x32xf32>
    %354 = arith.addf %352, %353 : vector<5x32xf32>
    %c1_269 = arith.constant 1 : index
    %c0_270 = arith.constant 0 : index
    %c0_271 = arith.constant 0 : index
    %355 = vector.load %arg15[%c1_269, %c0_270, %c0_271] : memref<2x32x64xf32, #tpu.memory_space<vmem>>, vector<1x32x64xf32>
    %356 = vector.shape_cast %355 : vector<1x32x64xf32> to vector<32x64xf32>
    %cst_272 = arith.constant dense<0.000000e+00> : vector<5x64xf32>
    %357 = tpu.matmul %354, %356, %cst_272 {dimension_numbers = #tpu.dot_dimension_numbers<[1], [0], [0], [1], [0, 0, 1, 1], [], []>} : vector<5x32xf32>, vector<32x64xf32>, vector<5x64xf32> -> vector<5x64xf32>
    %c1_273 = arith.constant 1 : index
    %c0_274 = arith.constant 0 : index
    %c0_275 = arith.constant 0 : index
    %358 = vector.load %arg16[%c1_273, %c0_274, %c0_275] : memref<2x1x64xf32, #tpu.memory_space<vmem>>, vector<1x1x64xf32>
    %359 = vector.shape_cast %358 : vector<1x1x64xf32> to vector<1x64xf32>
    %360 = vector.broadcast %359 : vector<1x64xf32> to vector<5x64xf32>
    %361 = arith.addf %357, %360 : vector<5x64xf32>
    %362 = arith.mulf %361, %361 : vector<5x64xf32>
    %363 = arith.mulf %361, %362 : vector<5x64xf32>
    %cst_276 = arith.constant 4.471500e-02 : f32
    %364 = vector.broadcast %cst_276 : f32 to vector<5x64xf32>
    %365 = arith.mulf %364, %363 : vector<5x64xf32>
    %366 = arith.addf %361, %365 : vector<5x64xf32>
    %cst_277 = arith.constant 0.797884583 : f32
    %367 = vector.broadcast %cst_277 : f32 to vector<5x64xf32>
    %368 = arith.mulf %367, %366 : vector<5x64xf32>
    %369 = math.tanh %368 : vector<5x64xf32>
    %cst_278 = arith.constant 1.000000e+00 : f32
    %370 = vector.broadcast %cst_278 : f32 to vector<5x64xf32>
    %371 = arith.addf %370, %369 : vector<5x64xf32>
    %cst_279 = arith.constant 5.000000e-01 : f32
    %372 = vector.broadcast %cst_279 : f32 to vector<5x64xf32>
    %373 = arith.mulf %372, %371 : vector<5x64xf32>
    %374 = arith.mulf %361, %373 : vector<5x64xf32>
    %c1_280 = arith.constant 1 : index
    %c0_281 = arith.constant 0 : index
    %c0_282 = arith.constant 0 : index
    %375 = vector.load %arg17[%c1_280, %c0_281, %c0_282] : memref<2x64x32xf32, #tpu.memory_space<vmem>>, vector<1x64x32xf32>
    %376 = vector.shape_cast %375 : vector<1x64x32xf32> to vector<64x32xf32>
    %cst_283 = arith.constant dense<0.000000e+00> : vector<5x32xf32>
    %377 = tpu.matmul %374, %376, %cst_283 {dimension_numbers = #tpu.dot_dimension_numbers<[1], [0], [0], [1], [0, 0, 1, 1], [], []>} : vector<5x64xf32>, vector<64x32xf32>, vector<5x32xf32> -> vector<5x32xf32>
    %378 = arith.addf %328, %377 : vector<5x32xf32>
    %c1_284 = arith.constant 1 : index
    %c0_285 = arith.constant 0 : index
    %c0_286 = arith.constant 0 : index
    %379 = vector.load %arg18[%c1_284, %c0_285, %c0_286] : memref<2x1x32xf32, #tpu.memory_space<vmem>>, vector<1x1x32xf32>
    %380 = vector.shape_cast %379 : vector<1x1x32xf32> to vector<1x32xf32>
    %381 = vector.broadcast %380 : vector<1x32xf32> to vector<5x32xf32>
    %382 = arith.addf %378, %381 : vector<5x32xf32>
    %c0_287 = arith.constant 0 : index
    %c0_288 = arith.constant 0 : index
    %383 = vector.load %arg19[%c0_287, %c0_288] : memref<1x32xf32, #tpu.memory_space<vmem>>, vector<1x32xf32>
    %c0_289 = arith.constant 0 : index
    %c0_290 = arith.constant 0 : index
    %384 = vector.load %arg20[%c0_289, %c0_290] : memref<1x32xf32, #tpu.memory_space<vmem>>, vector<1x32xf32>
    %cst_291 = arith.constant dense<0.000000e+00> : vector<5xf32>
    %385 = vector.multi_reduction <add>, %382, %cst_291 [1] : vector<5x32xf32> to vector<5xf32>
    %386 = vector.shape_cast %385 : vector<5xf32> to vector<5x1xf32>
    %cst_292 = arith.constant 3.200000e+01 : f32
    %387 = vector.broadcast %cst_292 : f32 to vector<5x1xf32>
    %388 = arith.divf %386, %387 : vector<5x1xf32>
    %389 = vector.broadcast %388 : vector<5x1xf32> to vector<5x32xf32>
    %390 = arith.subf %382, %389 : vector<5x32xf32>
    %391 = arith.mulf %390, %390 : vector<5x32xf32>
    %cst_293 = arith.constant dense<0.000000e+00> : vector<5xf32>
    %392 = vector.multi_reduction <add>, %391, %cst_293 [1] : vector<5x32xf32> to vector<5xf32>
    %393 = vector.shape_cast %392 : vector<5xf32> to vector<5x1xf32>
    %cst_294 = arith.constant 3.200000e+01 : f32
    %394 = vector.broadcast %cst_294 : f32 to vector<5x1xf32>
    %395 = arith.divf %393, %394 : vector<5x1xf32>
    %396 = vector.broadcast %388 : vector<5x1xf32> to vector<5x32xf32>
    %397 = arith.subf %382, %396 : vector<5x32xf32>
    %cst_295 = arith.constant 9.99999997E-7 : f32
    %398 = vector.broadcast %cst_295 : f32 to vector<5x1xf32>
    %399 = arith.addf %395, %398 : vector<5x1xf32>
    %400 = math.rsqrt %399 : vector<5x1xf32>
    %401 = vector.broadcast %400 : vector<5x1xf32> to vector<5x32xf32>
    %402 = arith.mulf %397, %401 : vector<5x32xf32>
    %403 = vector.broadcast %383 : vector<1x32xf32> to vector<5x32xf32>
    %404 = arith.mulf %402, %403 : vector<5x32xf32>
    %405 = vector.broadcast %384 : vector<1x32xf32> to vector<5x32xf32>
    %406 = arith.addf %404, %405 : vector<5x32xf32>
    %407 = vector.extract_strided_slice %406 {offsets = [0, 0], sizes = [1, 32], strides = [1, 1]} : vector<5x32xf32> to vector<1x32xf32>
    %408 = arith.index_cast %arg0 : i32 to index
    %c0_296 = arith.constant 0 : index
    %c0_297 = arith.constant 0 : index
    %409 = vector.load %arg26[%408, %c0_296, %c0_297] : memref<6x1x32xf32, #tpu.memory_space<vmem>>, vector<1x1x32xf32>
    %410 = vector.shape_cast %409 : vector<1x1x32xf32> to vector<1x32xf32>
    %411 = vector.shape_cast %407 : vector<1x32xf32> to vector<1x1x32xf32>
    tpu.vector_store %arg26[%408, %c0_296, %c0_297], %411 {strides = array<i32>} : memref<6x1x32xf32, #tpu.memory_space<vmem>>, vector<1x1x32xf32>,
    %c5_i32 = arith.constant 5 : i32
    %412 = arith.cmpi eq, %arg0, %c5_i32 : i32
    %413 = arith.extui %412 : i1 to i32
    %c0_i32 = arith.constant 0 : i32
    %414 = arith.cmpi ne, %413, %c0_i32 : i32
    scf.if %414 {
      %c0_298 = arith.constant 0 : index
      %c0_299 = arith.constant 0 : index
      %c0_300 = arith.constant 0 : index
      %415 = vector.load %arg26[%c0_298, %c0_299, %c0_300] : memref<6x1x32xf32, #tpu.memory_space<vmem>>, vector<1x1x32xf32>
      %416 = vector.shape_cast %415 : vector<1x1x32xf32> to vector<1x32xf32>
      %c2_301 = arith.constant 2 : index
      %c0_302 = arith.constant 0 : index
      %c0_303 = arith.constant 0 : index
      %417 = vector.load %arg26[%c2_301, %c0_302, %c0_303] : memref<6x1x32xf32, #tpu.memory_space<vmem>>, vector<1x1x32xf32>
      %418 = vector.shape_cast %417 : vector<1x1x32xf32> to vector<1x32xf32>
      %c4 = arith.constant 4 : index
      %c0_304 = arith.constant 0 : index
      %c0_305 = arith.constant 0 : index
      %419 = vector.load %arg26[%c4, %c0_304, %c0_305] : memref<6x1x32xf32, #tpu.memory_space<vmem>>, vector<1x1x32xf32>
      %420 = vector.shape_cast %419 : vector<1x1x32xf32> to vector<1x32xf32>
      %421 = tpu.concatenate %416, %418, %420 in 1 : vector<1x32xf32>, vector<1x32xf32>, vector<1x32xf32> -> vector<1x96xf32>
      %c1_306 = arith.constant 1 : index
      %c0_307 = arith.constant 0 : index
      %c0_308 = arith.constant 0 : index
      %422 = vector.load %arg26[%c1_306, %c0_307, %c0_308] : memref<6x1x32xf32, #tpu.memory_space<vmem>>, vector<1x1x32xf32>
      %423 = vector.shape_cast %422 : vector<1x1x32xf32> to vector<1x32xf32>
      %c3_309 = arith.constant 3 : index
      %c0_310 = arith.constant 0 : index
      %c0_311 = arith.constant 0 : index
      %424 = vector.load %arg26[%c3_309, %c0_310, %c0_311] : memref<6x1x32xf32, #tpu.memory_space<vmem>>, vector<1x1x32xf32>
      %425 = vector.shape_cast %424 : vector<1x1x32xf32> to vector<1x32xf32>
      %c5 = arith.constant 5 : index
      %c0_312 = arith.constant 0 : index
      %c0_313 = arith.constant 0 : index
      %426 = vector.load %arg26[%c5, %c0_312, %c0_313] : memref<6x1x32xf32, #tpu.memory_space<vmem>>, vector<1x1x32xf32>
      %427 = vector.shape_cast %426 : vector<1x1x32xf32> to vector<1x32xf32>
      %428 = tpu.concatenate %423, %425, %427 in 1 : vector<1x32xf32>, vector<1x32xf32>, vector<1x32xf32> -> vector<1x96xf32>
      %429 = tpu.concatenate %421, %428 in 0 : vector<1x96xf32>, vector<1x96xf32> -> vector<2x96xf32>
      %cst_314 = arith.constant 0.000000e+00 : f32
      %430 = vector.broadcast %cst_314 : f32 to vector<2x32xf32>
      %431 = tpu.concatenate %429, %430 in 1 : vector<2x96xf32>, vector<2x32xf32> -> vector<2x128xf32>
      %c0_315 = arith.constant 0 : index
      %c0_316 = arith.constant 0 : index
      %432 = vector.load %arg25[%c0_315, %c0_316] : memref<2x128xf32, #tpu.memory_space<vmem>>, vector<2x128xf32>
      tpu.vector_store %arg25[%c0_315, %c0_316], %431 {strides = array<i32>} : memref<2x128xf32, #tpu.memory_space<vmem>>, vector<2x128xf32>,
      %cst_317 = arith.constant dense<0.000000e+00> : vector<96xf32>
      %433 = vector.multi_reduction <add>, %429, %cst_317 [0] : vector<2x96xf32> to vector<96xf32>
      %434 = vector.shape_cast %433 : vector<96xf32> to vector<1x96xf32>
      %cst_318 = arith.constant 2.000000e+00 : f32
      %435 = vector.broadcast %cst_318 : f32 to vector<1x96xf32>
      %436 = arith.divf %434, %435 : vector<1x96xf32>
      %437 = vector.broadcast %436 : vector<1x96xf32> to vector<2x96xf32>
      %438 = arith.subf %429, %437 : vector<2x96xf32>
      %439 = arith.mulf %438, %438 : vector<2x96xf32>
      %cst_319 = arith.constant dense<0.000000e+00> : vector<96xf32>
      %440 = vector.multi_reduction <add>, %439, %cst_319 [0] : vector<2x96xf32> to vector<96xf32>
      %441 = vector.shape_cast %440 : vector<96xf32> to vector<1x96xf32>
      %cst_320 = arith.constant 2.000000e+00 : f32
      %442 = vector.broadcast %cst_320 : f32 to vector<1x96xf32>
      %443 = arith.divf %441, %442 : vector<1x96xf32>
      %444 = vector.broadcast %436 : vector<1x96xf32> to vector<2x96xf32>
      %445 = arith.subf %429, %444 : vector<2x96xf32>
      %cst_321 = arith.constant 9.99999974E-6 : f32
      %446 = vector.broadcast %cst_321 : f32 to vector<1x96xf32>
      %447 = arith.addf %443, %446 : vector<1x96xf32>
      %448 = math.rsqrt %447 : vector<1x96xf32>
      %449 = vector.broadcast %448 : vector<1x96xf32> to vector<2x96xf32>
      %450 = arith.mulf %445, %449 : vector<2x96xf32>
      %c0_322 = arith.constant 0 : index
      %c0_323 = arith.constant 0 : index
      %451 = vector.load %arg21[%c0_322, %c0_323] : memref<1x96xf32, #tpu.memory_space<vmem>>, vector<1x96xf32>
      %452 = vector.broadcast %451 : vector<1x96xf32> to vector<2x96xf32>
      %453 = arith.mulf %450, %452 : vector<2x96xf32>
      %c0_324 = arith.constant 0 : index
      %c0_325 = arith.constant 0 : index
      %454 = vector.load %arg22[%c0_324, %c0_325] : memref<1x96xf32, #tpu.memory_space<vmem>>, vector<1x96xf32>
      %455 = vector.broadcast %454 : vector<1x96xf32> to vector<2x96xf32>
      %456 = arith.addf %453, %455 : vector<2x96xf32>
      %c0_326 = arith.constant 0 : index
      %c0_327 = arith.constant 0 : index
      %457 = vector.load %arg23[%c0_326, %c0_327] : memref<96x256xf32, #tpu.memory_space<vmem>>, vector<96x256xf32>
      %cst_328 = arith.constant dense<0.000000e+00> : vector<2x256xf32>
      %458 = tpu.matmul %456, %457, %cst_328 {dimension_numbers = #tpu.dot_dimension_numbers<[1], [0], [0], [1], [0, 0, 1, 1], [], []>} : vector<2x96xf32>, vector<96x256xf32>, vector<2x256xf32> -> vector<2x256xf32>
      %c0_329 = arith.constant 0 : index
      %c0_330 = arith.constant 0 : index
      %459 = vector.load %arg24[%c0_329, %c0_330] : memref<2x256xf32, #tpu.memory_space<vmem>>, vector<2x256xf32>
      tpu.vector_store %arg24[%c0_329, %c0_330], %458 {strides = array<i32>} : memref<2x256xf32, #tpu.memory_space<vmem>>, vector<2x256xf32>,
    } else {
    }
    return
  }
  func.func @transform_0(%arg0: i32) -> (i32, i32, i32) {
    %c0_i32 = arith.constant 0 : i32
    %c0_i32_0 = arith.constant 0 : i32
    %c0_i32_1 = arith.constant 0 : i32
    return %arg0, %c0_i32, %c0_i32_0 : i32, i32, i32
  }
  func.func @transform_1(%arg0: i32) -> (i32, i32) {
    %c0_i32 = arith.constant 0 : i32
    %c0_i32_0 = arith.constant 0 : i32
    %c0_i32_1 = arith.constant 0 : i32
    return %c0_i32, %c0_i32_0 : i32, i32
  }
  func.func @transform_2(%arg0: i32) -> (i32, i32) {
    %c0_i32 = arith.constant 0 : i32
    %c0_i32_0 = arith.constant 0 : i32
    %c0_i32_1 = arith.constant 0 : i32
    return %c0_i32, %c0_i32_0 : i32, i32
  }
  func.func @transform_3(%arg0: i32) -> (i32, i32) {
    %c0_i32 = arith.constant 0 : i32
    %c0_i32_0 = arith.constant 0 : i32
    %c0_i32_1 = arith.constant 0 : i32
    return %c0_i32, %c0_i32_0 : i32, i32
  }
  func.func @transform_4(%arg0: i32) -> (i32, i32) {
    %c0_i32 = arith.constant 0 : i32
    %c0_i32_0 = arith.constant 0 : i32
    %c0_i32_1 = arith.constant 0 : i32
    return %c0_i32, %c0_i32_0 : i32, i32
  }
  func.func @transform_5(%arg0: i32) -> (i32, i32, i32) {
    %c0_i32 = arith.constant 0 : i32
    %c0_i32_0 = arith.constant 0 : i32
    %c0_i32_1 = arith.constant 0 : i32
    %c0_i32_2 = arith.constant 0 : i32
    return %c0_i32, %c0_i32_0, %c0_i32_1 : i32, i32, i32
  }
  func.func @transform_6(%arg0: i32) -> (i32, i32, i32) {
    %c0_i32 = arith.constant 0 : i32
    %c0_i32_0 = arith.constant 0 : i32
    %c0_i32_1 = arith.constant 0 : i32
    %c0_i32_2 = arith.constant 0 : i32
    return %c0_i32, %c0_i32_0, %c0_i32_1 : i32, i32, i32
  }
  func.func @transform_7(%arg0: i32) -> (i32, i32, i32, i32) {
    %c0_i32 = arith.constant 0 : i32
    %c0_i32_0 = arith.constant 0 : i32
    %c0_i32_1 = arith.constant 0 : i32
    %c0_i32_2 = arith.constant 0 : i32
    %c0_i32_3 = arith.constant 0 : i32
    return %c0_i32, %c0_i32_0, %c0_i32_1, %c0_i32_2 : i32, i32, i32, i32
  }
  func.func @transform_8(%arg0: i32) -> (i32, i32, i32, i32) {
    %c0_i32 = arith.constant 0 : i32
    %c0_i32_0 = arith.constant 0 : i32
    %c0_i32_1 = arith.constant 0 : i32
    %c0_i32_2 = arith.constant 0 : i32
    %c0_i32_3 = arith.constant 0 : i32
    return %c0_i32, %c0_i32_0, %c0_i32_1, %c0_i32_2 : i32, i32, i32, i32
  }
  func.func @transform_9(%arg0: i32) -> (i32, i32, i32, i32) {
    %c0_i32 = arith.constant 0 : i32
    %c0_i32_0 = arith.constant 0 : i32
    %c0_i32_1 = arith.constant 0 : i32
    %c0_i32_2 = arith.constant 0 : i32
    %c0_i32_3 = arith.constant 0 : i32
    return %c0_i32, %c0_i32_0, %c0_i32_1, %c0_i32_2 : i32, i32, i32, i32
  }
  func.func @transform_10(%arg0: i32) -> (i32, i32, i32, i32) {
    %c0_i32 = arith.constant 0 : i32
    %c0_i32_0 = arith.constant 0 : i32
    %c0_i32_1 = arith.constant 0 : i32
    %c0_i32_2 = arith.constant 0 : i32
    %c0_i32_3 = arith.constant 0 : i32
    return %c0_i32, %c0_i32_0, %c0_i32_1, %c0_i32_2 : i32, i32, i32, i32
  }
  func.func @transform_11(%arg0: i32) -> (i32, i32, i32) {
    %c0_i32 = arith.constant 0 : i32
    %c0_i32_0 = arith.constant 0 : i32
    %c0_i32_1 = arith.constant 0 : i32
    %c0_i32_2 = arith.constant 0 : i32
    return %c0_i32, %c0_i32_0, %c0_i32_1 : i32, i32, i32
  }
  func.func @transform_12(%arg0: i32) -> (i32, i32, i32) {
    %c0_i32 = arith.constant 0 : i32
    %c0_i32_0 = arith.constant 0 : i32
    %c0_i32_1 = arith.constant 0 : i32
    %c0_i32_2 = arith.constant 0 : i32
    return %c0_i32, %c0_i32_0, %c0_i32_1 : i32, i32, i32
  }
  func.func @transform_13(%arg0: i32) -> (i32, i32, i32) {
    %c0_i32 = arith.constant 0 : i32
    %c0_i32_0 = arith.constant 0 : i32
    %c0_i32_1 = arith.constant 0 : i32
    %c0_i32_2 = arith.constant 0 : i32
    return %c0_i32, %c0_i32_0, %c0_i32_1 : i32, i32, i32
  }
  func.func @transform_14(%arg0: i32) -> (i32, i32, i32) {
    %c0_i32 = arith.constant 0 : i32
    %c0_i32_0 = arith.constant 0 : i32
    %c0_i32_1 = arith.constant 0 : i32
    %c0_i32_2 = arith.constant 0 : i32
    return %c0_i32, %c0_i32_0, %c0_i32_1 : i32, i32, i32
  }
  func.func @transform_15(%arg0: i32) -> (i32, i32, i32) {
    %c0_i32 = arith.constant 0 : i32
    %c0_i32_0 = arith.constant 0 : i32
    %c0_i32_1 = arith.constant 0 : i32
    %c0_i32_2 = arith.constant 0 : i32
    return %c0_i32, %c0_i32_0, %c0_i32_1 : i32, i32, i32
  }
  func.func @transform_16(%arg0: i32) -> (i32, i32, i32) {
    %c0_i32 = arith.constant 0 : i32
    %c0_i32_0 = arith.constant 0 : i32
    %c0_i32_1 = arith.constant 0 : i32
    %c0_i32_2 = arith.constant 0 : i32
    return %c0_i32, %c0_i32_0, %c0_i32_1 : i32, i32, i32
  }
  func.func @transform_17(%arg0: i32) -> (i32, i32, i32) {
    %c0_i32 = arith.constant 0 : i32
    %c0_i32_0 = arith.constant 0 : i32
    %c0_i32_1 = arith.constant 0 : i32
    %c0_i32_2 = arith.constant 0 : i32
    return %c0_i32, %c0_i32_0, %c0_i32_1 : i32, i32, i32
  }
  func.func @transform_18(%arg0: i32) -> (i32, i32) {
    %c0_i32 = arith.constant 0 : i32
    %c0_i32_0 = arith.constant 0 : i32
    %c0_i32_1 = arith.constant 0 : i32
    return %c0_i32, %c0_i32_0 : i32, i32
  }
  func.func @transform_19(%arg0: i32) -> (i32, i32) {
    %c0_i32 = arith.constant 0 : i32
    %c0_i32_0 = arith.constant 0 : i32
    %c0_i32_1 = arith.constant 0 : i32
    return %c0_i32, %c0_i32_0 : i32, i32
  }
  func.func @transform_20(%arg0: i32) -> (i32, i32) {
    %c0_i32 = arith.constant 0 : i32
    %c0_i32_0 = arith.constant 0 : i32
    %c0_i32_1 = arith.constant 0 : i32
    return %c0_i32, %c0_i32_0 : i32, i32
  }
  func.func @transform_21(%arg0: i32) -> (i32, i32) {
    %c0_i32 = arith.constant 0 : i32
    %c0_i32_0 = arith.constant 0 : i32
    %c0_i32_1 = arith.constant 0 : i32
    return %c0_i32, %c0_i32_0 : i32, i32
  }
  func.func @transform_22(%arg0: i32) -> (i32, i32) {
    %c0_i32 = arith.constant 0 : i32
    %c0_i32_0 = arith.constant 0 : i32
    %c0_i32_1 = arith.constant 0 : i32
    return %c0_i32, %c0_i32_0 : i32, i32
  }
  func.func @transform_23(%arg0: i32) -> (i32, i32) {
    %c0_i32 = arith.constant 0 : i32
    %c0_i32_0 = arith.constant 0 : i32
    %c0_i32_1 = arith.constant 0 : i32
    return %c0_i32, %c0_i32_0 : i32, i32
  }
  func.func @transform_24(%arg0: i32) -> (i32, i32) {
    %c0_i32 = arith.constant 0 : i32
    %c0_i32_0 = arith.constant 0 : i32
    %c0_i32_1 = arith.constant 0 : i32
    return %c0_i32, %c0_i32_0 : i32, i32
  }
}

</mosaic_0001>

<bundles_post_ra>
// kernel: build_transformer_forward.1
= control target key start
LH: loop header
LB: loop body
LE: loop exit
PB: predicated region body
PF: predicated region fallthrough
CT: control target
= control target key end

     0   :  { %s7514_s0 = inlined_call_operand.vmem [shape: f32[6,4,192], index: 0, kind: input, shape index: {}]   ;;  %s7515_s1 = inlined_call_operand.vmem [shape: f32[5,32], index: 1, kind: input, shape index: {}]   ;;  %s7516_s2 = inlined_call_operand.vmem [shape: f32[1,32], index: 2, kind: input, shape index: {}]   ;;  %s7517_s3 = inlined_call_operand.vmem [shape: f32[192,32], index: 3, kind: input, shape index: {}]   ;;  %s7518_s4 = inlined_call_operand.vmem [shape: f32[1,32], index: 4, kind: input, shape index: {}]   ;;  %s7519_s5 = inlined_call_operand.vmem [shape: f32[2,1,32], index: 5, kind: input, shape index: {}]   ;;  %s7520_s6 = inlined_call_operand.vmem [shape: f32[2,1,32], index: 6, kind: input, shape index: {}]   ;;  %s7521_s7 = inlined_call_operand.vmem [shape: f32[2,4,32,8], index: 7, kind: input, shape index: {}]   ;;  %s7522_s8 = inlined_call_operand.vmem [shape: f32[2,4,32,8], index: 8, kind: input, shape index: {}]   ;;  %s7523_s9 = inlined_call_operand.vmem [shape: f32[2,4,32,8], index: 9, kind: input, shape index: {}]   ;;  %s7524_s10 = inlined_call_operand.vmem [shape: f32[2,4,8,32], index: 10, kind: input, shape index: {}]   ;;  %s7525_s11 = inlined_call_operand.vmem [shape: f32[2,1,32], index: 11, kind: input, shape index: {}]   ;;  %s7526_s12 = inlined_call_operand.vmem [shape: f32[2,1,32], index: 12, kind: input, shape index: {}]   ;;  %s7527_s13 = inlined_call_operand.vmem [shape: f32[2,1,32], index: 13, kind: input, shape index: {}]   ;;  %s7528_s14 = inlined_call_operand.vmem [shape: f32[2,32,64], index: 14, kind: input, shape index: {}]   ;;  %s7529_s15 = inlined_call_operand.vmem [shape: f32[2,1,64], index: 15, kind: input, shape index: {}]   ;;  %s7530_s16 = inlined_call_operand.vmem [shape: f32[2,64,32], index: 16, kind: input, shape index: {}]   ;;  %s7531_s17 = inlined_call_operand.vmem [shape: f32[2,1,32], index: 17, kind: input, shape index: {}]   ;;  %s7532_s18 = inlined_call_operand.vmem [shape: f32[1,32], index: 18, kind: input, shape index: {}]   ;;  %s7533_s19 = inlined_call_operand.vmem [shape: f32[1,32], index: 19, kind: input, shape index: {}]   ;;  %s7534_s20 = inlined_call_operand.vmem [shape: f32[1,96], index: 20, kind: input, shape index: {}]   ;;  %s7535_s21 = inlined_call_operand.vmem [shape: f32[1,96], index: 21, kind: input, shape index: {}]   ;;  %s7536_s22 = inlined_call_operand.vmem [shape: f32[96,256], index: 22, kind: input, shape index: {}]   ;;  %s7537_s23 = inlined_call_operand.hbm [shape: f32[2,256], index: 23, kind: output, shape index: {0}]   ;;  %s7538_s24 = inlined_call_operand.vmem [shape: f32[2,128], index: 24, kind: output, shape index: {1}]  }
   0x1   :  { %7546 = sst [smem:[#allocation6_spill]] %s7514_s0 }
   0x2   :  { %7547 = sst [smem:[#allocation7_spill]] %s7515_s1 }
   0x3   :  { %7548 = sst [smem:[#allocation8_spill]] %s7516_s2 }
   0x4   :  { %7549 = sst [smem:[#allocation9_spill]] %s7517_s3 }
   0x5   :  { %7550 = sst [smem:[#allocation10_spill]] %s7518_s4 }
   0x6   :  { %7551 = sst [smem:[#allocation11_spill]] %s7519_s5 }
   0x7   :  { %7552 = sst [smem:[#allocation12_spill]] %s7520_s6 }
   0x8   :  { %7553 = sst [smem:[#allocation13_spill]] %s7521_s7 }
   0x9   :  { %7554 = sst [smem:[#allocation14_spill]] %s7522_s8 }
   0xa   :  { %30 = vsyncpa [#allocation4], 0  ;;  %s6451_s5 = smov 0  }
   0xb LB: > { %s6457_s26 = sadd.s32 4294967295, %s6318_s5   ;;  %p5358_p0 = scmp.ge.s32.totalorder %s6318_s5, 1  ;;  %s6318_s5 = sphi %s6451_s5, %s36_s5  }
   0xc   : > { %p656_p1 = scmp.lt.s32.totalorder %s6318_s5, 7 }
   0xe   : > { %p657_p2 = pnand %p5358_p0, %p656_p1 }
   0xf   : > { %s7555_s6 = sld [smem:[#allocation9_spill]] (!%p657_p2)  ;;  %p717_p3 = scmp.lt.s32.totalorder (!%p657_p2), %s6457_s26, 5 }
  0x10   : > { %660 = sbr.rel (%p657_p2) target bundleno = 10284 (0x282c), region = 112  ;;  %s7556_s27 = sld [smem:[#allocation6_spill]] (!%p657_p2) }
  0x11   : > { %s7557_s25 = sld [smem:[#allocation10_spill]] (!%p657_p2)  ;;  %p5558_p4 = scmp.ne.s32.totalorder (!%p657_p2), %s6457_s26, 5 }
  0x12   : > { %s7558_s1 = sld [smem:[#allocation8_spill]] (!%p657_p2) }
  0x13   : > { %s7559_s2 = sld [smem:[#allocation7_spill]] (!%p657_p2) }
  0x14   : > { %s7560_s7 = sld [smem:[#allocation13_spill]] (!%p657_p2) }
  0x15   : > { %v738_v0 = vld [vmem:[%s7555_s6 + $0x78] sm:$0xff]  ;;  %v6320_v1 = vmov 0.0   ;;  %v737_v2 = vld [vmem:[%s7555_s6 + $0x70] sm:$0xff]  ;;  %s718_s0 = scalar_select %p717_p3, %s6457_s26, 5  ;;  %v736_v3 = vld [vmem:[%s7555_s6 + $0x68] sm:$0xff]  ;;  %vm756_vm0 = vcmask 523264  }
  0x16   : > { %759 = vmatprep.subr.mxu0 %v6320_v1  ;;  %5771 = vmatprep.subr.mxu1 %v6320_v1  ;;  %v735_v4 = vld [vmem:[%s7555_s6 + $0x60] sm:$0xff]  ;;  %v734_v5 = vld [vmem:[%s7555_s6 + $0x58] sm:$0xff]  ;;  %v733_v7 = vld [vmem:[%s7555_s6 + $0x50] sm:$0xff]  ;;  %vm833_vm1 = vcmask 1040384   ;;  %vm839_vm2 = vcmask 258048   ;;  %vm6321_vm3 = vmmov 0  }
  0x17   : > { %760 = vmatpush1.msra.mxu0 %v738_v0  ;;  %s5571_s3 = sshll.u32 %s718_s0, 3  ;;  %v732_v9 = vld [vmem:[%s7555_s6 + $0x48] sm:$0xff]  ;;  %v731_v10 = vld [vmem:[%s7555_s6 + $0x40] sm:$0xff]  ;;  %v730_v11 = vld [vmem:[%s7555_s6 + $0x38] sm:$0xff]  ;;  %5779 = vmatprep.mubr.msk.f32.mxu1 %vm6321_vm3, %v6320_v1  ;;  %s7562_s30 = sld [smem:[#allocation12_spill]]  ;;  %vm872_vm4 = vcmask 261120  }
  0x18   : > { %761 = vmatprep.subr.mxu0 %v6320_v1  ;;  %s721_s28 = scalar_lea.vmem %s7556_s27, %s5571_s3  ;;  %v729_v12 = vld [vmem:[%s7555_s6 + $0x30] sm:$0xff]  ;;  %v728_v13 = vld [vmem:[%s7555_s6 + $0x28] sm:$0xff]  ;;  %v727_v14 = vld [vmem:[%s7555_s6 + $0x20] sm:$0xff]  ;;  %s7563_s8 = sld [smem:[#allocation14_spill]]  ;;  %vm1094_vm5 = vcmask 64512   ;;  %vm1187_vm6 = vcmask 1044480  }
  0x19   : > { %762 = vmatpush1.msra.mxu0 %v737_v2  ;;  %v722_v6 = vld [vmem:[%s721_s28] sm:$0xff]  ;;  %v726_v15 = vld [vmem:[%s7555_s6 + $0x18] sm:$0xff]  ;;  %v725_v16 = vld [vmem:[%s7555_s6 + $0x10] sm:$0xff]  ;;  %vm1171_vm7 = vcmask 36864   ;;  %vm1183_vm8 = vcmask 39936   ;;  %vm5093_vm9 = vcmask 253952  }
  0x1a   : > { %763 = vmatprep.subr.mxu0 %v6320_v1  ;;  %v755_v8 = vcombine.high %v722_v6, %v722_v6  ;;  %v724_v17 = vld [vmem:[%s7555_s6 + $0x8] sm:$0xff]  ;;  %v723_v18 = vld [vmem:[%s7555_s6] sm:$0xff]  ;;  %v746_v19 = vld [vmem:[%s7555_s6 + $0xb8] sm:$0xff]  ;;  %s5572_s27 = scalar_lea.vmem [#allocation2], %s6318_s5  ;;  %s6322_s28 = smov (!%p5558_p4), 32  }
  0x1b   : > { %764 = vmatpush1.msra.mxu0 %v736_v3  ;;  %v745_v20 = vld [vmem:[%s7555_s6 + $0xb0] sm:$0xff]  ;;  %v744_v21 = vld [vmem:[%s7555_s6 + $0xa8] sm:$0xff]  ;;  %v743_v22 = vld [vmem:[%s7555_s6 + $0xa0] sm:$0xff]  ;;  %s6323_s29 = smov (!%p5558_p4), 64  }
  0x1c   : > { %765 = vmatprep.subr.mxu0 %v6320_v1  ;;  %5362 = vmatprep.mubr.msk.f32.mxu0 %vm756_vm0, %v755_v8  ;;  %v742_v23 = vld [vmem:[%s7555_s6 + $0x98] sm:$0xff]  ;;  %v741_v24 = vld [vmem:[%s7555_s6 + $0x90] sm:$0xff]  ;;  %v740_v25 = vld [vmem:[%s7555_s6 + $0x88] sm:$0xff] }
  0x1d   : > { %766 = vmatpush1.msra.mxu0 %v735_v4  ;;  %v739_v26 = vld [vmem:[%s7555_s6 + $0x80] sm:$0xff]  ;;  %v871_v42 = vld [vmem:[%s7560_s7 + $0x18] sm:$0xff]  ;;  %v870_v43 = vld [vmem:[%s7560_s7 + $0x10] sm:$0xff] }
  0x1e   : > { %767 = vmatprep.subr.mxu0 %v6320_v1  ;;  %v5361_v27 = vld [vmem:[%s7557_s25] ss:$0 sm:$0xff]  ;;  %5772 = vmatpush3.msra.mxu1 %v871_v42  ;;  %v869_v44 = vld [vmem:[%s7560_s7 + $0x8] sm:$0xff]  ;;  %v949_v55 = vld [vmem:[%s7563_s8 + $0x18] sm:$0xff] }
  0x1f   : > { %768 = vmatpush1.msra.mxu0 %v734_v5  ;;  %v829_v31 = vld [vmem:[%s7558_s1] sm:$0x1]  ;;  %5773 = vmatprep.subr.mxu1 %v6320_v1  ;;  %v948_v56 = vld [vmem:[%s7563_s8 + $0x10] sm:$0xff]  ;;  %v947_v57 = vld [vmem:[%s7563_s8 + $0x8] sm:$0xff] }
  0x20   : > { %769 = vmatprep.subr.mxu0 %v6320_v1  ;;  %v835_v33 = vld [vmem:[%s7559_s2] sm:$0x1f]  ;;  %5774 = vmatpush3.msra.mxu1 %v870_v43  ;;  %s7561_s2 = sld [smem:[#allocation11_spill]]  ;;  %v1023_v59 = vld [vmem:[%s7523_s9 + $0x18] sm:$0xff]  ;;  %v1022_v60 = vld [vmem:[%s7523_s9 + $0x10] sm:$0xff] }
  0x21   : > { %770 = vmatpush1.msra.mxu0 %v733_v7  ;;  %5775 = vmatprep.subr.mxu1 %v6320_v1  ;;  %v868_v45 = vld [vmem:[%s7560_s7] sm:$0xff]  ;;  %v1021_v61 = vld [vmem:[%s7523_s9 + $0x8] sm:$0xff]  ;;  %v5385_v4 = vld [vmem:[%s7523_s9 + $0x38] sm:$0xff] }
  0x22   : > { %771 = vmatprep.subr.mxu0 %v6320_v1  ;;  %5776 = vmatpush3.msra.mxu1 %v869_v44  ;;  %v5364_v52 = vld [vmem:[%s7562_s30] ss:$0 sm:$0xff]  ;;  %v5384_v5 = vld [vmem:[%s7523_s9 + $0x30] sm:$0xff] }
  0x23   : > { %772 = vmatpush1.msra.mxu0 %v732_v9  ;;  %5777 = vmatprep.subr.mxu1 %v6320_v1  ;;  %v946_v58 = vld [vmem:[%s7563_s8] sm:$0xff] }
  0x24   : > { %773 = vmatprep.subr.mxu0 %v6320_v1  ;;  %5778 = vmatpush3.msra.mxu1 %v868_v45  ;;  %v1020_v62 = vld [vmem:[%s7523_s9] sm:$0xff] }
  0x25   : > { %774 = vmatpush1.msra.mxu0 %v731_v10  ;;  %5782 = vmatprep.subr.mxu1 %v6320_v1  ;;  %v5382_v8 = vld [vmem:[%s7523_s9 + $0x20] sm:$0xff] }
  0x26   : > { %775 = vmatprep.subr.mxu0 %v6320_v1  ;;  %v5363_v50 = vld [vmem:[%s7561_s2] ss:$0 sm:$0xff] }
  0x27   : > { %776 = vmatpush1.msra.mxu0 %v730_v11 }
  0x28   : > { %777 = vmatprep.subr.mxu0 %v6320_v1 }
  0x29   : > { %778 = vmatpush1.msra.mxu0 %v729_v12 }
  0x2a   : > { %779 = vmatprep.subr.mxu0 %v6320_v1 }
  0x2b   : > { %780 = vmatpush1.msra.mxu0 %v728_v13 }
  0x2c   : > { %781 = vmatprep.subr.mxu0 %v6320_v1 }
  0x2d   : > { %782 = vmatpush1.msra.mxu0 %v727_v14 }
  0x2e   : > { %783 = vmatprep.subr.mxu0 %v6320_v1 }
  0x2f   : > { %784 = vmatpush1.msra.mxu0 %v726_v15 }
  0x30   : > { %785 = vmatprep.subr.mxu0 %v6320_v1 }
  0x31   : > { %786 = vmatpush1.msra.mxu0 %v725_v16 }
  0x32   : > { %787 = vmatprep.subr.mxu0 %v6320_v1 }
  0x33   : > { %788 = vmatpush1.msra.mxu0 %v724_v17 }
  0x34   : > { %789 = vmatprep.subr.mxu0 %v6320_v1 }
  0x35   : > { %790 = vmatpush1.msra.mxu0 %v723_v18 }
  0x36   : > { %807 = vmatprep.subr.mxu0 %v6320_v1 }
  0x37   : > { %808 = vmatpush2.msra.mxu0 %v746_v19 }
  0x38   : > { %809 = vmatprep.subr.mxu0 %v6320_v1 }
  0x39   : > { %810 = vmatpush2.msra.mxu0 %v745_v20 }
  0x3a   : > { %811 = vmatprep.subr.mxu0 %v6320_v1 }
  0x3b   : > { %812 = vmatpush2.msra.mxu0 %v744_v21 }
  0x3c   : > { %813 = vmatprep.subr.mxu0 %v6320_v1 }
  0x3d   : > { %814 = vmatpush2.msra.mxu0 %v743_v22 }
  0x3e   : > { %815 = vmatprep.subr.mxu0 %v6320_v1 }
  0x3f   : > { %816 = vmatpush2.msra.mxu0 %v742_v23  ;;  %v5375_v23 = vld [vmem:[%s7560_s7 + $0x38] sm:$0xff] }
  0x40   : > { %817 = vmatprep.subr.mxu0 %v6320_v1 }
  0x41   : > { %818 = vmatpush2.msra.mxu0 %v741_v24  ;;  %v5374_v24 = vld [vmem:[%s7560_s7 + $0x30] sm:$0xff] }
  0x42   : > { %819 = vmatprep.subr.mxu0 %v6320_v1 }
  0x43   : > { %820 = vmatpush2.msra.mxu0 %v740_v25  ;;  %v5373_v25 = vld [vmem:[%s7560_s7 + $0x28] sm:$0xff] }
  0x44   : > { %821 = vmatprep.subr.mxu0 %v6320_v1 }
  0x45   : > { %822 = vmatpush2.msra.mxu0 %v739_v26  ;;  %v5372_v26 = vld [vmem:[%s7560_s7 + $0x20] sm:$0xff] }
  0x46   : > { %824 = vmatmul.mubr.f32.vlgmr.msra.gmra.mxu0 %v722_v6  ;;  %5804 = vmatprep.subr.mxu0 %v6320_v1  ;;  %v5383_v6 = vld [vmem:[%s7523_s9 + $0x28] sm:$0xff] }
  0x47   : > { %5806 = vmatprep.mubr.msk.f32.mxu0 %vm6321_vm3, %v6320_v1 }
 0x106   : > { %v825_v28 = vpop.f32.mrf.mxu0 }
 0x107   : > { %v826_v29 = vadd.f32 %v5361_v27, %v825_v28  ;;  %v5380_v27 = vld [vmem:[%s7563_s8 + $0x38] sm:$0xff]  ;;  %v5379_v28 = vld [vmem:[%s7563_s8 + $0x30] sm:$0xff] }
 0x108   : > { %v827_v30 = vpop.f32.mrf.mxu0 }
 0x109   : > { %v831_v32 = vrot.slane %v826_v29, 7  ;;  %v5378_v29 = vld [vmem:[%s7563_s8 + $0x28] sm:$0xff]  ;;  %v5377_v30 = vld [vmem:[%s7563_s8 + $0x20] sm:$0xff] }
 0x10b   : > { %v834_v34 = vsel %vm833_vm1, %v829_v31, %v831_v32 }
 0x10c   : > { %v6575_v35 = vadd.f32 %v835_v33, %v834_v34 }
 0x10e   : > { %v840_v36 = vsel %vm839_vm2, %v6575_v35, 0.0 }
 0x10f   : > { %841 = vadd.xlane.f32.xlu0 %v840_v36 }
 0x198   : > { %v842_v37 = vpop.xlane.xlu0 %841 }
 0x199   : > { %v844_v38 = vmul.f32 0.03125, %v842_v37 }
 0x19b   : > { %v845_v39 = vsub.f32 %v6575_v35, %v844_v38 }
 0x19d   : > { %v846_v40 = vmul.f32 %v845_v39, %v845_v39 }
 0x19f   : > { %v847_v41 = vsel %vm839_vm2, %v846_v40, 0.0 }
 0x1a0   : > { %848 = vadd.xlane.f32.xlu0 %v847_v41 }
 0x229   : > { %v849_v46 = vpop.xlane.xlu0 %848 }
 0x22a   : > { %v850_v47 = vmul.f32 0.03125, %v849_v46  ;;  %v5391_v46 = vld [vmem:[%s7524_s10 + $0x8] sm:$0xff] }
 0x22c   : > { %v851_v48 = vadd.f32 1e-06, %v850_v47 }
 0x22e   : > { %6236 = vrsqrt.f32 %v851_v48 }
 0x23b   : > { %v6237_v49 = vpop.eup %6236 }
 0x23c   : > { %v853_v51 = vmul.f32 %v6237_v49, %v845_v39 }
 0x23e   : > { %v860_v53 = vmul.f32 %v5363_v50, %v853_v51  ;;  %v1261_v50 = vld [vmem:[%s7524_s10] sm:$0xff]  ;;  %v5402_v51 = vld [vmem:[%s7563_s8 + $0x58] sm:$0xff] }
 0x240   : > { %v6607_v54 = vadd.f32 %v5364_v52, %v860_v53  ;;  %v5401_v52 = vld [vmem:[%s7563_s8 + $0x50] sm:$0xff]  ;;  %v5400_v53 = vld [vmem:[%s7563_s8 + $0x48] sm:$0xff] }
 0x242   : > { %5780 = vmatmul.mubr.msk.f32.vlgmr.msra.gmra.mxu1 %vm872_vm4, %v6607_v54 }
 0x243   : > { %5783 = vmatpush3.msra.mxu1 %v949_v55  ;;  %5790 = vmatprep.mubr.msk.f32.mxu1 %vm6321_vm3, %v6320_v1  ;;  %v5399_v55 = vld [vmem:[%s7563_s8 + $0x40] sm:$0xff] }
 0x244   : > { %5784 = vmatprep.subr.mxu1 %v6320_v1 }
 0x245   : > { %5785 = vmatpush3.msra.mxu1 %v948_v56  ;;  %v5397_v56 = vld [vmem:[%s7560_s7 + $0x58] sm:$0xff] }
 0x246   : > { %5786 = vmatprep.subr.mxu1 %v6320_v1 }
 0x247   : > { %5787 = vmatpush3.msra.mxu1 %v947_v57 }
 0x248   : > { %5788 = vmatprep.subr.mxu1 %v6320_v1 }
 0x249   : > { %5789 = vmatpush3.msra.mxu1 %v946_v58  ;;  %v5396_v58 = vld [vmem:[%s7560_s7 + $0x50] sm:$0xff] }
 0x24a   : > { %5791 = vmatmul.mubr.msk.f32.vlgmr.msra.gmra.mxu1 %vm872_vm4, %v6607_v54  ;;  %5793 = vmatprep.subr.mxu1 %v6320_v1 }
 0x24b   : > { %5794 = vmatpush3.msra.mxu1 %v1023_v59  ;;  %5801 = vmatprep.mubr.msk.f32.mxu1 %vm6321_vm3, %v6320_v1 }
 0x24c   : > { %5795 = vmatprep.subr.mxu1 %v6320_v1 }
 0x24d   : > { %5796 = vmatpush3.msra.mxu1 %v1022_v60  ;;  %v5395_v60 = vld [vmem:[%s7560_s7 + $0x48] sm:$0xff] }
 0x24e   : > { %5797 = vmatprep.subr.mxu1 %v6320_v1 }
 0x24f   : > { %5798 = vmatpush3.msra.mxu1 %v1021_v61 }
 0x250   : > { %5799 = vmatprep.subr.mxu1 %v6320_v1 }
 0x251   : > { %5800 = vmatpush3.msra.mxu1 %v1020_v62  ;;  %v5394_v62 = vld [vmem:[%s7560_s7 + $0x40] sm:$0xff] }
 0x252   : > { %5802 = vmatmul.mubr.msk.f32.vlgmr.msra.gmra.mxu1 %vm872_vm4, %v6607_v54  ;;  %5809 = vmatprep.subr.mxu1 %v6320_v1 }
 0x253   : > { %5811 = vmatprep.mubr.msk.f32.mxu1 %vm6321_vm3, %v6320_v1 }
 0x302   : > { %v942_v63 = vpop.f32.mrf.mxu1 }
 0x304   : > { %v5781_v0 = vpop.f32.mrf.mxu1 }
 0x305   : > { %v5407_v0 = vld [vmem:[%s7523_s9 + $0x58] sm:$0xff] }
 0x30a   : > { %v1016_v2 = vpop.f32.mrf.mxu1 }
 0x30b   : > { %5805 = vmatpush3.xpose.msk.msra.mxu0 %vm1094_vm5, %v1016_v2  ;;  %v5406_v2 = vld [vmem:[%s7523_s9 + $0x50] sm:$0xff] }
 0x30c   : > { %v5792_v3 = vpop.f32.mrf.mxu1  ;;  %5836 = vmatprep.subr.mxu0 %v6320_v1 }
 0x30d   : > { %v5405_v3 = vld [vmem:[%s7523_s9 + $0x48] sm:$0xff] }
 0x30e   : > { %5807 = vmatmul.mubr.msk.f32.vlgmr.msra.gmra.mxu0 %vm1094_vm5, %v942_v63 }
 0x30f   : > { %5837 = vmatpush3.msra.mxu0 %v5385_v4  ;;  %5844 = vmatprep.mubr.msk.f32.mxu0 %vm6321_vm3, %v6320_v1 }
 0x310   : > { %5838 = vmatprep.subr.mxu0 %v6320_v1 }
 0x311   : > { %5839 = vmatpush3.msra.mxu0 %v5384_v5  ;;  %v5404_v5 = vld [vmem:[%s7523_s9 + $0x40] sm:$0xff] }
 0x312   : > { %v1090_v7 = vpop.f32.mrf.mxu1  ;;  %5840 = vmatprep.subr.mxu0 %v6320_v1 }
 0x313   : > { %5810 = vmatpush3.msk.msra.mxu1 %vm1187_vm6, %v1090_v7  ;;  %5841 = vmatpush3.msra.mxu0 %v5383_v6 }
 0x314   : > { %v5803_v9 = vpop.f32.mrf.mxu1  ;;  %5842 = vmatprep.subr.mxu0 %v6320_v1  ;;  %5814 = vmatprep.subr.mxu1 %v6320_v1 }
 0x315   : > { %5843 = vmatpush3.msra.mxu0 %v5382_v8 }
 0x316   : > { %5845 = vmatmul.mubr.msk.f32.vlgmr.msra.gmra.mxu0 %vm872_vm4, %v6607_v54  ;;  %5857 = vmatprep.subr.mxu0 %v6320_v1 }
 0x317   : > { %5859 = vmatprep.mubr.msk.f32.mxu0 %vm6321_vm3, %v6320_v1  ;;  %5858 = vmatpush3.msra.mxu0 %v5391_v46 }
 0x318   : > { %5867 = vmatprep.subr.mxu0 %v6320_v1 }
 0x3ce   : > { %v1167_v10 = vpop.f32.mrf.mxu0 }
 0x3cf   : > { %v1172_v11 = vsel %vm1171_vm7, %v1167_v10, -inf }
 0x3d0   : > { %1173 = vmax.xlane.f32.xlu1 %v1172_v11  ;;  %v5808_v12 = vpop.f32.mrf.mxu0 }
 0x3d6   : > { %v1483_v13 = vpop.f32.mrf.mxu0 }
 0x3d8   : > { %v5846_v14 = vpop.f32.mrf.mxu0 }
 0x459   : > { %v1174_v15 = vpop.xlane.xlu1 %1173 }
 0x45a   : > { %v1175_v16 = vsub.f32 %v1167_v10, %v1174_v15 }
 0x45c   : > { %v1176_v17 = vmul.f32 1.442695, %v1175_v16 }
 0x45e   : > { %6238 = vpow2.f32 %v1176_v17 }
 0x46b   : > { %v6239_v18 = vpop.eup %6238 }
 0x46c   : > { %v1178_v19 = vsel %vm1171_vm7, %v6239_v18, 0.0 }
 0x46d   : > { %1179 = vadd.xlane.f32.xlu1 %v1178_v19 }
 0x4f6   : > { %v1180_v20 = vpop.xlane.xlu1 %1179 }
 0x4f7   : > { %6240 = vrcp.f32 %v1180_v20 }
 0x504   : > { %v6241_v21 = vpop.eup %6240 }
 0x505   : > { %v1182_v22 = vmul.f32 %v6241_v21, %v6239_v18  ;;  %v5413_v21 = vld [vmem:[%s7524_s10 + $0x10] sm:$0xff] }
 0x507   : > { %5812 = vmatmul.mubr.msk.f32.vlgmr.msra.gmra.mxu1 %vm1183_vm8, %v1182_v22 }
 0x508   : > { %5815 = vmatpush3.msra.mxu1 %v5375_v23  ;;  %5822 = vmatprep.mubr.msk.f32.mxu1 %vm6321_vm3, %v6320_v1 }
 0x509   : > { %5816 = vmatprep.subr.mxu1 %v6320_v1 }
 0x50a   : > { %5817 = vmatpush3.msra.mxu1 %v5374_v24 }
 0x50b   : > { %5818 = vmatprep.subr.mxu1 %v6320_v1 }
 0x50c   : > { %5819 = vmatpush3.msra.mxu1 %v5373_v25  ;;  %v5418_v25 = vld [vmem:[%s7560_s7 + $0x78] sm:$0xff] }
 0x50d   : > { %5820 = vmatprep.subr.mxu1 %v6320_v1 }
 0x50e   : > { %5821 = vmatpush3.msra.mxu1 %v5372_v26  ;;  %v5417_v26 = vld [vmem:[%s7560_s7 + $0x70] sm:$0xff] }
 0x50f   : > { %5823 = vmatmul.mubr.msk.f32.vlgmr.msra.gmra.mxu1 %vm872_vm4, %v6607_v54  ;;  %5825 = vmatprep.subr.mxu1 %v6320_v1 }
 0x510   : > { %5826 = vmatpush3.msra.mxu1 %v5380_v27  ;;  %5833 = vmatprep.mubr.msk.f32.mxu1 %vm6321_vm3, %v6320_v1  ;;  %v5416_v27 = vld [vmem:[%s7560_s7 + $0x68] sm:$0xff] }
 0x511   : > { %5827 = vmatprep.subr.mxu1 %v6320_v1 }
 0x512   : > { %5828 = vmatpush3.msra.mxu1 %v5379_v28  ;;  %v5415_v28 = vld [vmem:[%s7560_s7 + $0x60] sm:$0xff] }
 0x513   : > { %5829 = vmatprep.subr.mxu1 %v6320_v1 }
 0x514   : > { %5830 = vmatpush3.msra.mxu1 %v5378_v29  ;;  %v5428_v29 = vld [vmem:[%s7523_s9 + $0x78] sm:$0xff] }
 0x515   : > { %5831 = vmatprep.subr.mxu1 %v6320_v1 }
 0x516   : > { %5832 = vmatpush3.msra.mxu1 %v5377_v30  ;;  %v5427_v30 = vld [vmem:[%s7523_s9 + $0x70] sm:$0xff] }
 0x517   : > { %5834 = vmatmul.mubr.msk.f32.vlgmr.msra.gmra.mxu1 %vm872_vm4, %v6607_v54  ;;  %5847 = vmatprep.subr.mxu1 %v6320_v1 }
 0x518   : > { %5849 = vmatprep.mubr.msk.f32.mxu1 %vm6321_vm3, %v6320_v1 }
 0x5c7   : > { %v1257_v31 = vpop.f32.mrf.mxu1 }
 0x5c9   : > { %v5813_v32 = vpop.f32.mrf.mxu1 }
 0x5ca   : > { %v5425_v32 = vld [vmem:[%s7523_s9 + $0x60] sm:$0xff] }
 0x5cf   : > { %v1333_v33 = vpop.f32.mrf.mxu1 }
 0x5d1   : > { %v5824_v34 = vpop.f32.mrf.mxu1 }
 0x5d7   : > { %v1408_v36 = vpop.f32.mrf.mxu1 }
 0x5d8   : > { %5848 = vmatpush3.xpose.msk.msra.mxu1 %vm1094_vm5, %v1408_v36  ;;  %v5422_v36 = vld [vmem:[%s7563_s8 + $0x70] sm:$0xff] }
 0x5d9   : > { %v5835_v37 = vpop.f32.mrf.mxu1  ;;  %5852 = vmatprep.subr.mxu1 %v6320_v1 }
 0x5db   : > { %5850 = vmatmul.mubr.msk.f32.vlgmr.msra.gmra.mxu1 %vm1094_vm5, %v1333_v33  ;;  %v5423_v33 = vld [vmem:[%s7563_s8 + $0x78] sm:$0xff] }
 0x5dc   : > { %5853 = vmatpush3.msk.msra.mxu1 %vm1187_vm6, %v1483_v13  ;;  %5854 = vmatprep.mubr.msk.f32.mxu1 %vm6321_vm3, %v6320_v1 }
 0x5dd   : > { %5862 = vmatprep.subr.mxu1 %v6320_v1 }
 0x69b   : > { %v1559_v38 = vpop.f32.mrf.mxu1 }
 0x69c   : > { %v1563_v39 = vsel %vm1171_vm7, %v1559_v38, -inf }
 0x69d   : > { %1564 = vmax.xlane.f32.xlu0 %v1563_v39  ;;  %v5851_v40 = vpop.f32.mrf.mxu1  ;;  %v5420_v39 = vld [vmem:[%s7563_s8 + $0x60] sm:$0xff] }
 0x726   : > { %v1565_v41 = vpop.xlane.xlu0 %1564 }
 0x727   : > { %v1566_v42 = vsub.f32 %v1559_v38, %v1565_v41  ;;  %v5421_v38 = vld [vmem:[%s7563_s8 + $0x68] sm:$0xff] }
 0x729   : > { %v1567_v43 = vmul.f32 1.442695, %v1566_v42 }
 0x72b   : > { %6242 = vpow2.f32 %v1567_v43 }
 0x738   : > { %v6243_v44 = vpop.eup %6242 }
 0x739   : > { %v1569_v45 = vsel %vm1171_vm7, %v6243_v44, 0.0 }
 0x73a   : > { %1570 = vadd.xlane.f32.xlu1 %v1569_v45 }
 0x7c3   : > { %v1571_v47 = vpop.xlane.xlu1 %1570 }
 0x7c4   : > { %6244 = vrcp.f32 %v1571_v47 }
 0x7d1   : > { %v6245_v48 = vpop.eup %6244 }
 0x7d2   : > { %v1573_v49 = vmul.f32 %v6245_v48, %v6243_v44 }
 0x7d4   : > { %5855 = vmatmul.mubr.msk.f32.vlgmr.msra.gmra.mxu1 %vm1183_vm8, %v1573_v49 }
 0x7d5   : > { %5863 = vmatpush3.msra.mxu1 %v1261_v50  ;;  %5864 = vmatprep.mubr.msk.f32.mxu1 %vm6321_vm3, %v6320_v1 }
 0x7d6   : > { %5878 = vmatprep.subr.mxu1 %v6320_v1 }
 0x7d8   : > { %5865 = vmatmul.mubr.msk.f32.vlgmr.msra.gmra.mxu1 %vm1094_vm5, %v1257_v31  ;;  %v5426_v31 = vld [vmem:[%s7523_s9 + $0x68] sm:$0xff] }
 0x7d9   : > { %5879 = vmatpush3.msra.mxu1 %v5402_v51  ;;  %5886 = vmatprep.mubr.msk.f32.mxu1 %vm6321_vm3, %v6320_v1 }
 0x7da   : > { %5880 = vmatprep.subr.mxu1 %v6320_v1 }
 0x7db   : > { %5881 = vmatpush3.msra.mxu1 %v5401_v52 }
 0x7dc   : > { %5882 = vmatprep.subr.mxu1 %v6320_v1 }
 0x7dd   : > { %5883 = vmatpush3.msra.mxu1 %v5400_v53 }
 0x7de   : > { %5884 = vmatprep.subr.mxu1 %v6320_v1 }
 0x7df   : > { %5885 = vmatpush3.msra.mxu1 %v5399_v55 }
 0x7e0   : > { %5887 = vmatmul.mubr.msk.f32.vlgmr.msra.gmra.mxu1 %vm872_vm4, %v6607_v54  ;;  %5900 = vmatprep.subr.mxu1 %v6320_v1 }
 0x7e1   : > { %5902 = vmatprep.mubr.msk.f32.mxu1 %vm6321_vm3, %v6320_v1 }
 0x894   : > { %v1646_v57 = vpop.f32.mrf.mxu1 }
 0x895   : > { %5860 = vmatmul.mubr.msk.f32.vlgmr.msra.gmra.mxu0 %vm1094_vm5, %v1646_v57 }
 0x896   : > { %5868 = vmatpush3.msra.mxu0 %v5397_v56  ;;  %v5856_v59 = vpop.f32.mrf.mxu1  ;;  %5875 = vmatprep.mubr.msk.f32.mxu0 %vm6321_vm3, %v6320_v1 }
 0x897   : > { %5869 = vmatprep.subr.mxu0 %v6320_v1 }
 0x898   : > { %5870 = vmatpush3.msra.mxu0 %v5396_v58  ;;  %v6781_v61 = vpop.f32.mrf.mxu1  ;;  %v5434_v58 = vld [vmem:[%s7524_s10 + $0x18] sm:$0xff] }
 0x899   : > { %5871 = vmatprep.subr.mxu0 %v6320_v1 }
 0x89a   : > { %5872 = vmatpush3.msra.mxu0 %v5395_v60  ;;  %v5866_v63 = vpop.f32.mrf.mxu1 }
 0x89b   : > { %5873 = vmatprep.subr.mxu0 %v6320_v1 }
 0x89c   : > { %5874 = vmatpush3.msra.mxu0 %v5394_v62 }
 0x89d   : > { %5876 = vmatmul.mubr.msk.f32.vlgmr.msra.gmra.mxu0 %vm872_vm4, %v6607_v54  ;;  %5889 = vmatprep.subr.mxu0 %v6320_v1 }
 0x89e   : > { %5890 = vmatpush3.msra.mxu0 %v5407_v0  ;;  %5897 = vmatprep.mubr.msk.f32.mxu0 %vm6321_vm3, %v6320_v1 }
 0x89f   : > { %5891 = vmatprep.subr.mxu0 %v6320_v1 }
 0x8a0   : > { %v1944_v4 = vpop.f32.mrf.mxu1  ;;  %5892 = vmatpush3.msra.mxu0 %v5406_v2 }
 0x8a1   : > { %5893 = vmatprep.subr.mxu0 %v6320_v1  ;;  %5901 = vmatpush3.xpose.msk.msra.mxu1 %vm1094_vm5, %v1944_v4 }
 0x8a2   : > { %v5888_v6 = vpop.f32.mrf.mxu1  ;;  %5894 = vmatpush3.msra.mxu0 %v5405_v3  ;;  %5905 = vmatprep.subr.mxu1 %v6320_v1  ;;  %v5436_v3 = vld [vmem:[%s7525_s11] ss:$0 sm:$0xff] }
 0x8a3   : > { %5895 = vmatprep.subr.mxu0 %v6320_v1 }
 0x8a4   : > { %5896 = vmatpush3.msra.mxu0 %v5404_v5 }
 0x8a5   : > { %5898 = vmatmul.mubr.msk.f32.vlgmr.msra.gmra.mxu0 %vm872_vm4, %v6607_v54  ;;  %5910 = vmatprep.subr.mxu0 %v6320_v1 }
 0x8a6   : > { %5912 = vmatprep.mubr.msk.f32.mxu0 %vm6321_vm3, %v6320_v1  ;;  %5911 = vmatpush3.msra.mxu0 %v5413_v21 }
 0x8a7   : > { %5926 = vmatprep.subr.mxu0 %v6320_v1 }
 0x955   : > { %v6815_v7 = vpop.f32.mrf.mxu0 }
 0x956   : > { %v1795_v44 = vadd.f32 %v6781_v61, %v6815_v7 }
 0x957   : > { %v5861_v8 = vpop.f32.mrf.mxu0 }
 0x95d   : > { %v1869_v9 = vpop.f32.mrf.mxu0 }
 0x95e   : > { %5903 = vmatmul.mubr.msk.f32.vlgmr.msra.gmra.mxu1 %vm1094_vm5, %v1869_v9 }
 0x95f   : > { %v5877_v10 = vpop.f32.mrf.mxu0  ;;  %5907 = vmatprep.mubr.msk.f32.mxu1 %vm6321_vm3, %v6320_v1 }
 0x965   : > { %v2019_v11 = vpop.f32.mrf.mxu0 }
 0x966   : > { %5906 = vmatpush3.msk.msra.mxu1 %vm1187_vm6, %v2019_v11 }
 0x967   : > { %v5899_v12 = vpop.f32.mrf.mxu0  ;;  %5915 = vmatprep.subr.mxu1 %v6320_v1 }
 0xa1e   : > { %v2095_v13 = vpop.f32.mrf.mxu1 }
 0xa1f   : > { %v2099_v14 = vsel %vm1171_vm7, %v2095_v13, -inf }
 0xa20   : > { %2100 = vmax.xlane.f32.xlu0 %v2099_v14  ;;  %v5904_v15 = vpop.f32.mrf.mxu1  ;;  %v2765_v14 = vld [vmem:[%s7528_s14 + $0x8] sm:$0xff] }
 0xa21   : > { %v2764_v15 = vld [vmem:[%s7528_s14] sm:$0xff] }
 0xaa9   : > { %v2101_v16 = vpop.xlane.xlu0 %2100 }
 0xaaa   : > { %v2102_v17 = vsub.f32 %v2095_v13, %v2101_v16  ;;  %v2767_v13 = vld [vmem:[%s7528_s14 + $0x18] sm:$0xff] }
 0xaac   : > { %v2103_v18 = vmul.f32 1.442695, %v2102_v17 }
 0xaae   : > { %6246 = vpow2.f32 %v2103_v18 }
 0xabb   : > { %v6247_v19 = vpop.eup %6246 }
 0xabc   : > { %v2105_v20 = vsel %vm1171_vm7, %v6247_v19, 0.0 }
 0xabd   : > { %2106 = vadd.xlane.f32.xlu1 %v2105_v20  ;;  %v5437_v20 = vld [vmem:[%s7526_s12] ss:$0 sm:$0xff] }
 0xb46   : > { %v2107_v22 = vpop.xlane.xlu1 %2106 }
 0xb47   : > { %6248 = vrcp.f32 %v2107_v22  ;;  %v5438_v22 = vld [vmem:[%s7527_s13] ss:$0 sm:$0xff] }
 0xb54   : > { %v6249_v23 = vpop.eup %6248 }
 0xb55   : > { %v2109_v24 = vmul.f32 %v6249_v23, %v6247_v19 }
 0xb57   : > { %5908 = vmatmul.mubr.msk.f32.vlgmr.msra.gmra.mxu1 %vm1183_vm8, %v2109_v24 }
 0xb58   : > { %5916 = vmatpush3.msra.mxu1 %v5418_v25  ;;  %5923 = vmatprep.mubr.msk.f32.mxu1 %vm6321_vm3, %v6320_v1  ;;  %v2864_v25 = vld [vmem:[%s7530_s16 + $0x38] sm:$0xff] }
 0xb59   : > { %5917 = vmatprep.subr.mxu1 %v6320_v1 }
 0xb5a   : > { %5918 = vmatpush3.msra.mxu1 %v5417_v26  ;;  %v2863_v26 = vld [vmem:[%s7530_s16 + $0x30] sm:$0xff] }
 0xb5b   : > { %5919 = vmatprep.subr.mxu1 %v6320_v1 }
 0xb5c   : > { %5920 = vmatpush3.msra.mxu1 %v5416_v27  ;;  %v2862_v27 = vld [vmem:[%s7530_s16 + $0x28] sm:$0xff] }
 0xb5d   : > { %5921 = vmatprep.subr.mxu1 %v6320_v1 }
 0xb5e   : > { %5922 = vmatpush3.msra.mxu1 %v5415_v28  ;;  %v2861_v28 = vld [vmem:[%s7530_s16 + $0x20] sm:$0xff] }
 0xb5f   : > { %5924 = vmatmul.mubr.msk.f32.vlgmr.msra.gmra.mxu1 %vm872_vm4, %v6607_v54  ;;  %5937 = vmatprep.subr.mxu1 %v6320_v1 }
 0xb60   : > { %5938 = vmatpush3.msra.mxu1 %v5428_v29  ;;  %5945 = vmatprep.mubr.msk.f32.mxu1 %vm6321_vm3, %v6320_v1  ;;  %v2860_v29 = vld [vmem:[%s7530_s16 + $0x18] sm:$0xff] }
 0xb61   : > { %5939 = vmatprep.subr.mxu1 %v6320_v1 }
 0xb62   : > { %5940 = vmatpush3.msra.mxu1 %v5427_v30  ;;  %v2859_v30 = vld [vmem:[%s7530_s16 + $0x10] sm:$0xff] }
 0xb63   : > { %5941 = vmatprep.subr.mxu1 %v6320_v1 }
 0xb64   : > { %5942 = vmatpush3.msra.mxu1 %v5426_v31  ;;  %v2858_v31 = vld [vmem:[%s7530_s16 + $0x8] sm:$0xff] }
 0xb65   : > { %5943 = vmatprep.subr.mxu1 %v6320_v1 }
 0xb66   : > { %5944 = vmatpush3.msra.mxu1 %v5425_v32  ;;  %v2857_v32 = vld [vmem:[%s7530_s16] sm:$0xff] }
 0xb67   : > { %5946 = vmatmul.mubr.msk.f32.vlgmr.msra.gmra.mxu1 %vm872_vm4, %v6607_v54  ;;  %5958 = vmatprep.subr.mxu1 %v6320_v1 }
 0xb68   : > { %5960 = vmatprep.mubr.msk.f32.mxu1 %vm6321_vm3, %v6320_v1  ;;  %5959 = vmatpush3.msra.mxu1 %v5434_v58  ;;  %v5450_v58 = vld [vmem:[%s7560_s7 + $0x98] sm:$0xff] }
 0xb69   : > { %5974 = vmatprep.subr.mxu1 %v6320_v1 }
 0xc17   : > { %v2182_v34 = vpop.f32.mrf.mxu1 }
 0xc18   : > { %5913 = vmatmul.mubr.msk.f32.vlgmr.msra.gmra.mxu0 %vm1094_vm5, %v2182_v34 }
 0xc19   : > { %5927 = vmatpush3.msra.mxu0 %v5423_v33  ;;  %v5909_v37 = vpop.f32.mrf.mxu1  ;;  %5934 = vmatprep.mubr.msk.f32.mxu0 %vm6321_vm3, %v6320_v1  ;;  %v5439_v33 = vld [vmem:[%s7529_s15] ss:$0 sm:$0xff] }
 0xc1a   : > { %5928 = vmatprep.subr.mxu0 %v6320_v1 }
 0xc1b   : > { %5929 = vmatpush3.msra.mxu0 %v5422_v36 }
 0xc1c   : > { %5930 = vmatprep.subr.mxu0 %v6320_v1 }
 0xc1d   : > { %5931 = vmatpush3.msra.mxu0 %v5421_v38 }
 0xc1e   : > { %5932 = vmatprep.subr.mxu0 %v6320_v1 }
 0xc1f   : > { %v2333_v40 = vpop.f32.mrf.mxu1  ;;  %5933 = vmatpush3.msra.mxu0 %v5420_v39 }
 0xc20   : > { %5935 = vmatmul.mubr.msk.f32.vlgmr.msra.gmra.mxu0 %vm872_vm4, %v6607_v54  ;;  %5948 = vmatprep.subr.mxu0 %v6320_v1 }
 0xc21   : > { %v5925_v41 = vpop.f32.mrf.mxu1  ;;  %5950 = vmatprep.mubr.msk.f32.mxu0 %vm6321_vm3, %v6320_v1 }
 0xc27   : > { %v2483_v42 = vpop.f32.mrf.mxu1 }
 0xc29   : > { %v5947_v43 = vpop.f32.mrf.mxu1 }
 0xcd8   : > { %v2257_v45 = vpop.f32.mrf.mxu0 }
 0xcd9   : > { %v2261_v46 = vadd.f32 %v2257_v45, %v1795_v44 }
 0xcda   : > { %v5914_v47 = vpop.f32.mrf.mxu0 }
 0xce0   : > { %v2408_v48 = vpop.f32.mrf.mxu0 }
 0xce1   : > { %5949 = vmatpush3.xpose.msk.msra.mxu0 %vm1094_vm5, %v2408_v48  ;;  %v5442_v48 = vld [vmem:[%s7531_s17] ss:$0 sm:$0xff] }
 0xce2   : > { %v5936_v49 = vpop.f32.mrf.mxu0  ;;  %5953 = vmatprep.subr.mxu0 %v6320_v1 }
 0xce4   : > { %5951 = vmatmul.mubr.msk.f32.vlgmr.msra.gmra.mxu0 %vm1094_vm5, %v2333_v40 }
 0xce5   : > { %5954 = vmatpush3.msk.msra.mxu0 %vm1187_vm6, %v2483_v42  ;;  %5955 = vmatprep.mubr.msk.f32.mxu0 %vm6321_vm3, %v6320_v1 }
 0xce6   : > { %5963 = vmatprep.subr.mxu0 %v6320_v1 }
 0xda4   : > { %v2559_v54 = vpop.f32.mrf.mxu0 }
 0xda5   : > { %v2563_v50 = vsel %vm1171_vm7, %v2559_v54, -inf }
 0xda6   : > { %2564 = vmax.xlane.f32.xlu0 %v2563_v50  ;;  %v5952_v51 = vpop.f32.mrf.mxu0 }
 0xe2f   : > { %v2565_v52 = vpop.xlane.xlu0 %2564 }
 0xe30   : > { %v2566_v53 = vsub.f32 %v2559_v54, %v2565_v52 }
 0xe32   : > { %v2567_v55 = vmul.f32 1.442695, %v2566_v53 }
 0xe34   : > { %6250 = vpow2.f32 %v2567_v55 }
 0xe41   : > { %v6251_v56 = vpop.eup %6250 }
 0xe42   : > { %v2569_v57 = vsel %vm1171_vm7, %v6251_v56, 0.0 }
 0xe43   : > { %2570 = vadd.xlane.f32.xlu1 %v2569_v57 }
 0xecc   : > { %v2571_v59 = vpop.xlane.xlu1 %2570 }
 0xecd   : > { %6252 = vrcp.f32 %v2571_v59  ;;  %v5460_v59 = vld [vmem:[%s7523_s9 + $0x98] sm:$0xff] }
 0xeda   : > { %v6253_v60 = vpop.eup %6252 }
 0xedb   : > { %v2573_v61 = vmul.f32 %v6253_v60, %v6251_v56  ;;  %v5449_v60 = vld [vmem:[%s7560_s7 + $0x90] sm:$0xff] }
 0xedd   : > { %5956 = vmatmul.mubr.msk.f32.vlgmr.msra.gmra.mxu0 %vm1183_vm8, %v2573_v61  ;;  %v5459_v61 = vld [vmem:[%s7523_s9 + $0x90] sm:$0xff] }
 0xede   : > { %5971 = vmatprep.mubr.msk.f32.mxu0 %vm6321_vm3, %v6320_v1  ;;  %5964 = vmatpush3.msra.mxu0 %v2767_v13  ;;  %v5454_v13 = vld [vmem:[%s7563_s8 + $0x90] sm:$0xff] }
 0xedf   : > { %5965 = vmatprep.subr.mxu0 %v6320_v1 }
 0xf9d   : > { %v2646_v62 = vpop.f32.mrf.mxu0 }
 0xf9e   : > { %5961 = vmatmul.mubr.msk.f32.vlgmr.msra.gmra.mxu1 %vm1094_vm5, %v2646_v62  ;;  %v5448_v62 = vld [vmem:[%s7560_s7 + $0x88] sm:$0xff] }
 0xf9f   : > { %v5957_v63 = vpop.f32.mrf.mxu0  ;;  %5990 = vmatprep.mubr.msk.f32.mxu1 %vm6321_vm3, %v6320_v1  ;;  %5975 = vmatpush3.msra.mxu1 %v2864_v25  ;;  %v5480_v25 = vld [vmem:[%s7523_s9 + $0xb8] sm:$0xff] }
 0xfa0   : > { %5976 = vmatprep.subr.mxu1 %v6320_v1  ;;  %v5458_v63 = vld [vmem:[%s7523_s9 + $0x88] sm:$0xff] }
 0xfa1   : > { %5977 = vmatpush3.msra.mxu1 %v2863_v26  ;;  %v5479_v26 = vld [vmem:[%s7523_s9 + $0xb0] sm:$0xff] }
 0xfa2   : > { %5978 = vmatprep.subr.mxu1 %v6320_v1 }
 0xfa3   : > { %5979 = vmatpush3.msra.mxu1 %v2862_v27  ;;  %v5478_v27 = vld [vmem:[%s7523_s9 + $0xa8] sm:$0xff] }
 0xfa4   : > { %5980 = vmatprep.subr.mxu1 %v6320_v1 }
 0xfa5   : > { %5981 = vmatpush3.msra.mxu1 %v2861_v28  ;;  %v5477_v28 = vld [vmem:[%s7523_s9 + $0xa0] sm:$0xff] }
 0xfa6   : > { %5982 = vmatprep.subr.mxu1 %v6320_v1 }
 0xfa7   : > { %5983 = vmatpush3.msra.mxu1 %v2860_v29 }
 0xfa8   : > { %5984 = vmatprep.subr.mxu1 %v6320_v1 }
 0xfa9   : > { %5985 = vmatpush3.msra.mxu1 %v2859_v30 }
 0xfaa   : > { %5986 = vmatprep.subr.mxu1 %v6320_v1 }
 0xfab   : > { %5987 = vmatpush3.msra.mxu1 %v2858_v31 }
 0xfac   : > { %5988 = vmatprep.subr.mxu1 %v6320_v1 }
 0xfad   : > { %5989 = vmatpush3.msra.mxu1 %v2857_v32 }
 0xfae   : > { %6015 = vmatprep.subr.mxu1 %v6320_v1 }
0x105e   : > { %v2721_v0 = vpop.f32.mrf.mxu1 }
0x105f   : > { %v2725_v2 = vadd.f32 %v2721_v0, %v2261_v46  ;;  %v5447_v0 = vld [vmem:[%s7560_s7 + $0x80] sm:$0xff] }
0x1060   : > { %v5962_v4 = vpop.f32.mrf.mxu1 }
0x1061   : > { %v2726_v5 = vadd.f32 %v2725_v2, %v6575_v35  ;;  %v2766_v35 = vld [vmem:[%s7528_s14 + $0x10] sm:$0xff]  ;;  %v5457_v2 = vld [vmem:[%s7523_s9 + $0x80] sm:$0xff] }
0x1062   : > { %5966 = vmatpush3.msra.mxu0 %v2766_v35  ;;  %v5453_v35 = vld [vmem:[%s7563_s8 + $0x88] sm:$0xff] }
0x1063   : > { %v6919_v6 = vadd.f32 %v5436_v3, %v2726_v5  ;;  %5967 = vmatprep.subr.mxu0 %v6320_v1 }
0x1064   : > { %5968 = vmatpush3.msra.mxu0 %v2765_v14  ;;  %v5452_v14 = vld [vmem:[%s7563_s8 + $0x80] sm:$0xff] }
0x1065   : > { %v2737_v7 = vsel %vm839_vm2, %v6919_v6, 0.0  ;;  %5969 = vmatprep.subr.mxu0 %v6320_v1 }
0x1066   : > { %2738 = vadd.xlane.f32.xlu0 %v2737_v7  ;;  %5970 = vmatpush3.msra.mxu0 %v2764_v15  ;;  %v5445_v7 = vld [vmem:[%s7561_s2 + $0x1] ss:$0 sm:$0xff] }
0x1067   : > { %5993 = vmatprep.subr.mxu0 %v6320_v1 }
0x10ef   : > { %v2739_v8 = vpop.xlane.xlu0 %2738 }
0x10f0   : > { %v2740_v9 = vmul.f32 0.03125, %v2739_v8 }
0x10f2   : > { %v2741_v10 = vsub.f32 %v6919_v6, %v2740_v9  ;;  %v5446_v9 = vld [vmem:[%s7562_s30 + $0x1] ss:$0 sm:$0xff] }
0x10f4   : > { %v2742_v11 = vmul.f32 %v2741_v10, %v2741_v10 }
0x10f6   : > { %v2743_v12 = vsel %vm839_vm2, %v2742_v11, 0.0 }
0x10f7   : > { %2744 = vadd.xlane.f32.xlu1 %v2743_v12  ;;  %v5455_v12 = vld [vmem:[%s7563_s8 + $0x98] sm:$0xff] }
0x1180   : > { %v2745_v16 = vpop.xlane.xlu1 %2744 }
0x1181   : > { %v2746_v17 = vmul.f32 0.03125, %v2745_v16 }
0x1183   : > { %v2747_v18 = vadd.f32 1e-06, %v2746_v17 }
0x1185   : > { %6254 = vrsqrt.f32 %v2747_v18 }
0x1192   : > { %v6255_v19 = vpop.eup %6254 }
0x1193   : > { %v2749_v21 = vmul.f32 %v6255_v19, %v2741_v10 }
0x1195   : > { %v2756_v23 = vmul.f32 %v5437_v20, %v2749_v21  ;;  %v5470_v21 = vld [vmem:[%s7560_s7 + $0xb8] sm:$0xff] }
0x1197   : > { %v2763_v24 = vadd.f32 %v5438_v22, %v2756_v23  ;;  %v5469_v22 = vld [vmem:[%s7560_s7 + $0xb0] sm:$0xff]  ;;  %v5468_v23 = vld [vmem:[%s7560_s7 + $0xa8] sm:$0xff] }
0x1199   : > { %5972 = vmatmul.mubr.msk.f32.vlgmr.msra.gmra.mxu0 %vm872_vm4, %v2763_v24  ;;  %v5467_v24 = vld [vmem:[%s7560_s7 + $0xa0] sm:$0xff] }
0x119a   : > { %6001 = vmatprep.mubr.msk.f32.mxu0 %vm6321_vm3, %v6320_v1  ;;  %5994 = vmatpush3.msra.mxu0 %v5450_v58 }
0x119b   : > { %5995 = vmatprep.subr.mxu0 %v6320_v1 }
0x119c   : > { %5996 = vmatpush3.msra.mxu0 %v5449_v60 }
0x119d   : > { %5997 = vmatprep.subr.mxu0 %v6320_v1 }
0x119e   : > { %5998 = vmatpush3.msra.mxu0 %v5448_v62  ;;  %v5486_v62 = vld [vmem:[%s7524_s10 + $0x28] sm:$0xff] }
0x119f   : > { %5999 = vmatprep.subr.mxu0 %v6320_v1 }
0x11a0   : > { %6000 = vmatpush3.msra.mxu0 %v5447_v0 }
0x11a1   : > { %6004 = vmatprep.subr.mxu0 %v6320_v1 }
0x1259   : > { %v2844_v34 = vpop.f32.mrf.mxu0 }
0x125a   : > { %v2845_v36 = vadd.f32 %v5439_v33, %v2844_v34 }
0x125b   : > { %v5973_v37 = vpop.f32.mrf.mxu0 }
0x125c   : > { %v2848_v38 = vmul.f32 %v2845_v36, %v2845_v36 }
0x125e   : > { %v2849_v39 = vmul.f32 %v2848_v38, %v2845_v36 }
0x1260   : > { %v2850_v40 = vmul.f32 0.044715, %v2849_v39 }
0x1262   : > { %v2851_v41 = vadd.f32 %v2850_v40, %v2845_v36 }
0x1264   : > { %v2852_v42 = vmul.f32 0.7978846, %v2851_v41 }
0x1266   : > { %6256 = vtanh.f32 %v2852_v42 }
0x1273   : > { %v6257_v43 = vpop.eup %6256 }
0x1274   : > { %v2854_v44 = vadd.f32 1.0, %v6257_v43 }
0x1276   : > { %v2855_v45 = vmul.f32 0.5, %v2854_v44 }
0x1278   : > { %v2856_v46 = vmul.f32 %v2855_v45, %v2845_v36  ;;  %v5475_v45 = vld [vmem:[%s7563_s8 + $0xb8] sm:$0xff] }
0x127a   : > { %5991 = vmatmul.mubr.msk.f32.vlgmr.msra.gmra.mxu1 %vm756_vm0, %v2856_v46  ;;  %v5474_v46 = vld [vmem:[%s7563_s8 + $0xb0] sm:$0xff] }
0x127b   : > { %6023 = vmatprep.mubr.msk.f32.mxu1 %vm6321_vm3, %v6320_v1  ;;  %6016 = vmatpush3.msra.mxu1 %v5460_v59 }
0x127c   : > { %6017 = vmatprep.subr.mxu1 %v6320_v1 }
0x127d   : > { %6018 = vmatpush3.msra.mxu1 %v5459_v61 }
0x127e   : > { %6019 = vmatprep.subr.mxu1 %v6320_v1 }
0x127f   : > { %6020 = vmatpush3.msra.mxu1 %v5458_v63 }
0x1280   : > { %6021 = vmatprep.subr.mxu1 %v6320_v1 }
0x1281   : > { %6022 = vmatpush3.msra.mxu1 %v5457_v2 }
0x1282   : > { %6031 = vmatprep.subr.mxu1 %v6320_v1 }
0x133a   : > { %v2934_v47 = vpop.f32.mrf.mxu1 }
0x133b   : > { %v2938_v49 = vadd.f32 %v2934_v47, %v6919_v6  ;;  %v5473_v47 = vld [vmem:[%s7563_s8 + $0xa8] sm:$0xff] }
0x133c   : > { %v5992_v54 = vpop.f32.mrf.mxu1 }
0x133d   : > { %v6992_v50 = vadd.f32 %v5442_v48, %v2938_v49  ;;  %v5472_v48 = vld [vmem:[%s7563_s8 + $0xa0] sm:$0xff] }
0x133f   : > { %v2951_v51 = vsel %vm839_vm2, %v6992_v50, 0.0 }
0x1340   : > { %2952 = vadd.xlane.f32.xlu0 %v2951_v51 }
0x13c9   : > { %v2953_v52 = vpop.xlane.xlu0 %2952 }
0x13ca   : > { %v2954_v53 = vmul.f32 0.03125, %v2953_v52 }
0x13cc   : > { %v2955_v55 = vsub.f32 %v6992_v50, %v2954_v53 }
0x13ce   : > { %v2956_v56 = vmul.f32 %v2955_v55, %v2955_v55 }
0x13d0   : > { %v2957_v57 = vsel %vm839_vm2, %v2956_v56, 0.0 }
0x13d1   : > { %2958 = vadd.xlane.f32.xlu1 %v2957_v57 }
0x145a   : > { %v2959_v3 = vpop.xlane.xlu1 %2958 }
0x145b   : > { %v2960_v4 = vmul.f32 0.03125, %v2959_v3  ;;  %v5466_v3 = vld [vmem:[%s7524_s10 + $0x20] sm:$0xff] }
0x145d   : > { %v2961_v5 = vadd.f32 1e-06, %v2960_v4  ;;  %v5497_v4 = vld [vmem:[%s7563_s8 + $0xd8] sm:$0xff] }
0x145f   : > { %6258 = vrsqrt.f32 %v2961_v5  ;;  %v5496_v5 = vld [vmem:[%s7563_s8 + $0xd0] sm:$0xff] }
0x146c   : > { %v6259_v6 = vpop.eup %6258 }
0x146d   : > { %v2963_v8 = vmul.f32 %v6259_v6, %v2955_v55  ;;  %v5495_v6 = vld [vmem:[%s7563_s8 + $0xc8] sm:$0xff] }
0x146f   : > { %v2970_v10 = vmul.f32 %v5445_v7, %v2963_v8  ;;  %v5494_v7 = vld [vmem:[%s7563_s8 + $0xc0] sm:$0xff]  ;;  %v5492_v8 = vld [vmem:[%s7560_s7 + $0xd8] sm:$0xff] }
0x1471   : > { %v7036_v11 = vadd.f32 %v5446_v9, %v2970_v10  ;;  %v5491_v10 = vld [vmem:[%s7560_s7 + $0xd0] sm:$0xff] }
0x1473   : > { %6002 = vmatmul.mubr.msk.f32.vlgmr.msra.gmra.mxu0 %vm872_vm4, %v7036_v11  ;;  %6024 = vmatmul.mubr.msk.f32.vlgmr.msra.gmra.mxu1 %vm872_vm4, %v7036_v11 }
0x1474   : > { %6005 = vmatpush3.msra.mxu0 %v5455_v12  ;;  %6012 = vmatprep.mubr.msk.f32.mxu0 %vm6321_vm3, %v6320_v1 }
0x1475   : > { %6006 = vmatprep.subr.mxu0 %v6320_v1  ;;  %6033 = vmatprep.mubr.msk.f32.mxu1 %vm6321_vm3, %v6320_v1 }
0x1476   : > { %6007 = vmatpush3.msra.mxu0 %v5454_v13  ;;  %v5490_v13 = vld [vmem:[%s7560_s7 + $0xc8] sm:$0xff] }
0x1477   : > { %6008 = vmatprep.subr.mxu0 %v6320_v1 }
0x1478   : > { %6009 = vmatpush3.msra.mxu0 %v5453_v35 }
0x1479   : > { %6010 = vmatprep.subr.mxu0 %v6320_v1 }
0x147a   : > { %6011 = vmatpush3.msra.mxu0 %v5452_v14  ;;  %v5489_v14 = vld [vmem:[%s7560_s7 + $0xc0] sm:$0xff] }
0x147b   : > { %6013 = vmatmul.mubr.msk.f32.vlgmr.msra.gmra.mxu0 %vm872_vm4, %v7036_v11  ;;  %6026 = vmatprep.subr.mxu0 %v6320_v1 }
0x147c   : > { %6028 = vmatprep.mubr.msk.f32.mxu0 %vm6321_vm3, %v6320_v1 }
0x1533   : > { %v3052_v15 = vpop.f32.mrf.mxu0  ;;  %v3202_v16 = vpop.f32.mrf.mxu1 }
0x1534   : > { %6032 = vmatpush3.msk.msra.mxu1 %vm1187_vm6, %v3202_v16  ;;  %v5502_v16 = vld [vmem:[%s7523_s9 + $0xd8] sm:$0xff] }
0x1535   : > { %v6003_v17 = vpop.f32.mrf.mxu0  ;;  %v6025_v18 = vpop.f32.mrf.mxu1  ;;  %6047 = vmatprep.subr.mxu1 %v6320_v1 }
0x1536   : > { %v5501_v17 = vld [vmem:[%s7523_s9 + $0xd0] sm:$0xff]  ;;  %v5500_v18 = vld [vmem:[%s7523_s9 + $0xc8] sm:$0xff] }
0x153b   : > { %v3127_v19 = vpop.f32.mrf.mxu0 }
0x153c   : > { %6027 = vmatpush3.xpose.msk.msra.mxu0 %vm1094_vm5, %v3127_v19 }
0x153d   : > { %v6014_v20 = vpop.f32.mrf.mxu0  ;;  %6036 = vmatprep.subr.mxu0 %v6320_v1 }
0x153e   : > { %v5499_v20 = vld [vmem:[%s7523_s9 + $0xc0] sm:$0xff] }
0x153f   : > { %6029 = vmatmul.mubr.msk.f32.vlgmr.msra.gmra.mxu0 %vm1094_vm5, %v3052_v15 }
0x1540   : > { %6037 = vmatpush3.msra.mxu0 %v5470_v21  ;;  %6044 = vmatprep.mubr.msk.f32.mxu0 %vm6321_vm3, %v6320_v1 }
0x1541   : > { %6038 = vmatprep.subr.mxu0 %v6320_v1 }
0x1542   : > { %6039 = vmatpush3.msra.mxu0 %v5469_v22 }
0x1543   : > { %6040 = vmatprep.subr.mxu0 %v6320_v1 }
0x1544   : > { %6041 = vmatpush3.msra.mxu0 %v5468_v23 }
0x1545   : > { %6042 = vmatprep.subr.mxu0 %v6320_v1 }
0x1546   : > { %6043 = vmatpush3.msra.mxu0 %v5467_v24 }
0x1547   : > { %6045 = vmatmul.mubr.msk.f32.vlgmr.msra.gmra.mxu0 %vm872_vm4, %v7036_v11  ;;  %6058 = vmatprep.subr.mxu0 %v6320_v1 }
0x1548   : > { %6059 = vmatpush3.msra.mxu0 %v5480_v25  ;;  %6066 = vmatprep.mubr.msk.f32.mxu0 %vm6321_vm3, %v6320_v1 }
0x1549   : > { %6060 = vmatprep.subr.mxu0 %v6320_v1 }
0x154a   : > { %6061 = vmatpush3.msra.mxu0 %v5479_v26 }
0x154b   : > { %6062 = vmatprep.subr.mxu0 %v6320_v1 }
0x154c   : > { %6063 = vmatpush3.msra.mxu0 %v5478_v27 }
0x154d   : > { %6064 = vmatprep.subr.mxu0 %v6320_v1 }
0x154e   : > { %6065 = vmatpush3.msra.mxu0 %v5477_v28 }
0x154f   : > { %6067 = vmatmul.mubr.msk.f32.vlgmr.msra.gmra.mxu0 %vm872_vm4, %v7036_v11  ;;  %6079 = vmatprep.subr.mxu0 %v6320_v1 }
0x1550   : > { %6081 = vmatprep.mubr.msk.f32.mxu0 %vm6321_vm3, %v6320_v1  ;;  %6080 = vmatpush3.msra.mxu0 %v5486_v62 }
0x1551   : > { %6089 = vmatprep.subr.mxu0 %v6320_v1 }
0x15ff   : > { %v3278_v29 = vpop.f32.mrf.mxu0 }
0x1600   : > { %v3282_v30 = vsel %vm1171_vm7, %v3278_v29, -inf }
0x1601   : > { %3283 = vmax.xlane.f32.xlu0 %v3282_v30  ;;  %v6030_v31 = vpop.f32.mrf.mxu0 }
0x1607   : > { %v3442_v32 = vpop.f32.mrf.mxu0 }
0x1609   : > { %v6046_v33 = vpop.f32.mrf.mxu0 }
0x160f   : > { %v3592_v34 = vpop.f32.mrf.mxu0 }
0x1611   : > { %v6068_v36 = vpop.f32.mrf.mxu0 }
0x168a   : > { %v3284_v37 = vpop.xlane.xlu0 %3283 }
0x168b   : > { %v3285_v38 = vsub.f32 %v3278_v29, %v3284_v37  ;;  %v5508_v37 = vld [vmem:[%s7524_s10 + $0x30] sm:$0xff] }
0x168d   : > { %v3286_v39 = vmul.f32 1.442695, %v3285_v38 }
0x168f   : > { %6260 = vpow2.f32 %v3286_v39 }
0x169c   : > { %v6261_v40 = vpop.eup %6260 }
0x169d   : > { %v3288_v41 = vsel %vm1171_vm7, %v6261_v40, 0.0 }
0x169e   : > { %3289 = vadd.xlane.f32.xlu1 %v3288_v41  ;;  %v5513_v41 = vld [vmem:[%s7560_s7 + $0xf8] sm:$0xff] }
0x1727   : > { %v3290_v42 = vpop.xlane.xlu1 %3289 }
0x1728   : > { %6262 = vrcp.f32 %v3290_v42  ;;  %v5512_v42 = vld [vmem:[%s7560_s7 + $0xf0] sm:$0xff] }
0x1735   : > { %v6263_v43 = vpop.eup %6262 }
0x1736   : > { %v3292_v44 = vmul.f32 %v6263_v43, %v6261_v40  ;;  %v5511_v43 = vld [vmem:[%s7560_s7 + $0xe8] sm:$0xff] }
0x1738   : > { %6034 = vmatmul.mubr.msk.f32.vlgmr.msra.gmra.mxu1 %vm1183_vm8, %v3292_v44  ;;  %v5510_v44 = vld [vmem:[%s7560_s7 + $0xe0] sm:$0xff] }
0x1739   : > { %6048 = vmatpush3.msra.mxu1 %v5475_v45  ;;  %6055 = vmatprep.mubr.msk.f32.mxu1 %vm6321_vm3, %v6320_v1  ;;  %v5523_v45 = vld [vmem:[%s7523_s9 + $0xf8] sm:$0xff] }
0x173a   : > { %6049 = vmatprep.subr.mxu1 %v6320_v1 }
0x173b   : > { %6050 = vmatpush3.msra.mxu1 %v5474_v46  ;;  %v5522_v46 = vld [vmem:[%s7523_s9 + $0xf0] sm:$0xff] }
0x173c   : > { %6051 = vmatprep.subr.mxu1 %v6320_v1 }
0x173d   : > { %6052 = vmatpush3.msra.mxu1 %v5473_v47  ;;  %v5521_v47 = vld [vmem:[%s7523_s9 + $0xe8] sm:$0xff] }
0x173e   : > { %6053 = vmatprep.subr.mxu1 %v6320_v1 }
0x173f   : > { %6054 = vmatpush3.msra.mxu1 %v5472_v48  ;;  %v5520_v48 = vld [vmem:[%s7523_s9 + $0xe0] sm:$0xff] }
0x1740   : > { %6056 = vmatmul.mubr.msk.f32.vlgmr.msra.gmra.mxu1 %vm872_vm4, %v7036_v11  ;;  %6069 = vmatprep.subr.mxu1 %v6320_v1 }
0x1741   : > { %6071 = vmatprep.mubr.msk.f32.mxu1 %vm6321_vm3, %v6320_v1 }
0x17f8   : > { %v3365_v49 = vpop.f32.mrf.mxu1 }
0x17fa   : > { %v6035_v54 = vpop.f32.mrf.mxu1 }
0x1800   : > { %v3517_v51 = vpop.f32.mrf.mxu1 }
0x1801   : > { %6070 = vmatpush3.xpose.msk.msra.mxu1 %vm1094_vm5, %v3517_v51  ;;  %v5517_v51 = vld [vmem:[%s7563_s8 + $0xf0] sm:$0xff] }
0x1802   : > { %v6057_v52 = vpop.f32.mrf.mxu1  ;;  %6074 = vmatprep.subr.mxu1 %v6320_v1 }
0x1804   : > { %6072 = vmatmul.mubr.msk.f32.vlgmr.msra.gmra.mxu1 %vm1094_vm5, %v3442_v32 }
0x1805   : > { %6075 = vmatpush3.msk.msra.mxu1 %vm1187_vm6, %v3592_v34  ;;  %6076 = vmatprep.mubr.msk.f32.mxu1 %vm6321_vm3, %v6320_v1 }
0x1806   : > { %6084 = vmatprep.subr.mxu1 %v6320_v1 }
0x18c4   : > { %v3668_v53 = vpop.f32.mrf.mxu1 }
0x18c5   : > { %v3672_v55 = vsel %vm1171_vm7, %v3668_v53, -inf }
0x18c6   : > { %3673 = vmax.xlane.f32.xlu0 %v3672_v55  ;;  %v6073_v56 = vpop.f32.mrf.mxu1  ;;  %v5515_v55 = vld [vmem:[%s7563_s8 + $0xe0] sm:$0xff] }
0x194f   : > { %v3674_v57 = vpop.xlane.xlu0 %3673 }
0x1950   : > { %v3675_v58 = vsub.f32 %v3668_v53, %v3674_v57  ;;  %v5516_v53 = vld [vmem:[%s7563_s8 + $0xe8] sm:$0xff] }
0x1952   : > { %v3676_v59 = vmul.f32 1.442695, %v3675_v58 }
0x1954   : > { %6264 = vpow2.f32 %v3676_v59 }
0x1961   : > { %v6265_v60 = vpop.eup %6264 }
0x1962   : > { %v3678_v61 = vsel %vm1171_vm7, %v6265_v60, 0.0 }
0x1963   : > { %3679 = vadd.xlane.f32.xlu1 %v3678_v61 }
0x19ec   : > { %v3680_v63 = vpop.xlane.xlu1 %3679 }
0x19ed   : > { %6266 = vrcp.f32 %v3680_v63 }
0x19fa   : > { %v6267_v0 = vpop.eup %6266 }
0x19fb   : > { %v3682_v2 = vmul.f32 %v6267_v0, %v6265_v60 }
0x19fd   : > { %6077 = vmatmul.mubr.msk.f32.vlgmr.msra.gmra.mxu1 %vm1183_vm8, %v3682_v2 }
0x19fe   : > { %6085 = vmatpush3.msra.mxu1 %v5466_v3  ;;  %6086 = vmatprep.mubr.msk.f32.mxu1 %vm6321_vm3, %v6320_v1 }
0x19ff   : > { %6100 = vmatprep.subr.mxu1 %v6320_v1 }
0x1a01   : > { %6087 = vmatmul.mubr.msk.f32.vlgmr.msra.gmra.mxu1 %vm1094_vm5, %v3365_v49  ;;  %v5518_v49 = vld [vmem:[%s7563_s8 + $0xf8] sm:$0xff] }
0x1a02   : > { %6101 = vmatpush3.msra.mxu1 %v5497_v4  ;;  %6108 = vmatprep.mubr.msk.f32.mxu1 %vm6321_vm3, %v6320_v1 }
0x1a03   : > { %6102 = vmatprep.subr.mxu1 %v6320_v1 }
0x1a04   : > { %6103 = vmatpush3.msra.mxu1 %v5496_v5 }
0x1a05   : > { %6104 = vmatprep.subr.mxu1 %v6320_v1 }
0x1a06   : > { %6105 = vmatpush3.msra.mxu1 %v5495_v6 }
0x1a07   : > { %6106 = vmatprep.subr.mxu1 %v6320_v1 }
0x1a08   : > { %6107 = vmatpush3.msra.mxu1 %v5494_v7 }
0x1a09   : > { %6109 = vmatmul.mubr.msk.f32.vlgmr.msra.gmra.mxu1 %vm872_vm4, %v7036_v11  ;;  %6122 = vmatprep.subr.mxu1 %v6320_v1 }
0x1a0a   : > { %6124 = vmatprep.mubr.msk.f32.mxu1 %vm6321_vm3, %v6320_v1 }
0x1abd   : > { %v3755_v9 = vpop.f32.mrf.mxu1 }
0x1abe   : > { %6082 = vmatmul.mubr.msk.f32.vlgmr.msra.gmra.mxu0 %vm1094_vm5, %v3755_v9 }
0x1abf   : > { %6090 = vmatpush3.msra.mxu0 %v5492_v8  ;;  %v6078_v12 = vpop.f32.mrf.mxu1  ;;  %6097 = vmatprep.mubr.msk.f32.mxu0 %vm6321_vm3, %v6320_v1 }
0x1ac0   : > { %6091 = vmatprep.subr.mxu0 %v6320_v1 }
0x1ac1   : > { %6092 = vmatpush3.msra.mxu0 %v5491_v10  ;;  %v7194_v35 = vpop.f32.mrf.mxu1  ;;  %v5529_v10 = vld [vmem:[%s7524_s10 + $0x38] sm:$0xff] }
0x1ac2   : > { %6093 = vmatprep.subr.mxu0 %v6320_v1 }
0x1ac3   : > { %6094 = vmatpush3.msra.mxu0 %v5490_v13  ;;  %v6088_v15 = vpop.f32.mrf.mxu1 }
0x1ac4   : > { %6095 = vmatprep.subr.mxu0 %v6320_v1 }
0x1ac5   : > { %6096 = vmatpush3.msra.mxu0 %v5489_v14 }
0x1ac6   : > { %6098 = vmatmul.mubr.msk.f32.vlgmr.msra.gmra.mxu0 %vm872_vm4, %v7036_v11  ;;  %6111 = vmatprep.subr.mxu0 %v6320_v1 }
0x1ac7   : > { %6112 = vmatpush3.msra.mxu0 %v5502_v16  ;;  %6119 = vmatprep.mubr.msk.f32.mxu0 %vm6321_vm3, %v6320_v1 }
0x1ac8   : > { %6113 = vmatprep.subr.mxu0 %v6320_v1 }
0x1ac9   : > { %v4053_v19 = vpop.f32.mrf.mxu1  ;;  %6114 = vmatpush3.msra.mxu0 %v5501_v17 }
0x1aca   : > { %6115 = vmatprep.subr.mxu0 %v6320_v1  ;;  %6123 = vmatpush3.xpose.msk.msra.mxu1 %vm1094_vm5, %v4053_v19 }
0x1acb   : > { %v6110_v21 = vpop.f32.mrf.mxu1  ;;  %6116 = vmatpush3.msra.mxu0 %v5500_v18  ;;  %6127 = vmatprep.subr.mxu1 %v6320_v1  ;;  %v5532_v18 = vld [vmem:[%s7525_s11 + $0x1] ss:$0 sm:$0xff] }
0x1acc   : > { %6117 = vmatprep.subr.mxu0 %v6320_v1 }
0x1acd   : > { %6118 = vmatpush3.msra.mxu0 %v5499_v20 }
0x1ace   : > { %6120 = vmatmul.mubr.msk.f32.vlgmr.msra.gmra.mxu0 %vm872_vm4, %v7036_v11  ;;  %6132 = vmatprep.subr.mxu0 %v6320_v1 }
0x1acf   : > { %6134 = vmatprep.mubr.msk.f32.mxu0 %vm6321_vm3, %v6320_v1  ;;  %6133 = vmatpush3.msra.mxu0 %v5508_v37 }
0x1ad0   : > { %6148 = vmatprep.subr.mxu0 %v6320_v1 }
0x1b7e   : > { %v7228_v22 = vpop.f32.mrf.mxu0 }
0x1b7f   : > { %v3904_v60 = vadd.f32 %v7194_v35, %v7228_v22 }
0x1b80   : > { %v6083_v23 = vpop.f32.mrf.mxu0 }
0x1b86   : > { %v3978_v24 = vpop.f32.mrf.mxu0 }
0x1b87   : > { %6125 = vmatmul.mubr.msk.f32.vlgmr.msra.gmra.mxu1 %vm1094_vm5, %v3978_v24 }
0x1b88   : > { %v6099_v25 = vpop.f32.mrf.mxu0  ;;  %6129 = vmatprep.mubr.msk.f32.mxu1 %vm6321_vm3, %v6320_v1 }
0x1b8e   : > { %v4128_v26 = vpop.f32.mrf.mxu0 }
0x1b8f   : > { %6128 = vmatpush3.msk.msra.mxu1 %vm1187_vm6, %v4128_v26 }
0x1b90   : > { %v6121_v27 = vpop.f32.mrf.mxu0  ;;  %6137 = vmatprep.subr.mxu1 %v6320_v1 }
0x1c47   : > { %v4204_v28 = vpop.f32.mrf.mxu1 }
0x1c48   : > { %v4208_v29 = vsel %vm1171_vm7, %v4204_v28, -inf }
0x1c49   : > { %4209 = vmax.xlane.f32.xlu0 %v4208_v29  ;;  %v6126_v30 = vpop.f32.mrf.mxu1  ;;  %v5538_v29 = vld [vmem:[%s7528_s14 + $0x28] sm:$0xff] }
0x1c4a   : > { %v5537_v30 = vld [vmem:[%s7528_s14 + $0x20] sm:$0xff] }
0x1cd2   : > { %v4210_v31 = vpop.xlane.xlu0 %4209 }
0x1cd3   : > { %v4211_v32 = vsub.f32 %v4204_v28, %v4210_v31  ;;  %v5540_v28 = vld [vmem:[%s7528_s14 + $0x38] sm:$0xff] }
0x1cd5   : > { %v4212_v33 = vmul.f32 1.442695, %v4211_v32 }
0x1cd7   : > { %6268 = vpow2.f32 %v4212_v33 }
0x1ce4   : > { %v6269_v34 = vpop.eup %6268 }
0x1ce5   : > { %v4214_v36 = vsel %vm1171_vm7, %v6269_v34, 0.0 }
0x1ce6   : > { %4215 = vadd.xlane.f32.xlu1 %v4214_v36  ;;  %v5535_v36 = vld [vmem:[%s7526_s12 + $0x1] ss:$0 sm:$0xff] }
0x1d6f   : > { %v4216_v38 = vpop.xlane.xlu1 %4215 }
0x1d70   : > { %6270 = vrcp.f32 %v4216_v38  ;;  %v5536_v38 = vld [vmem:[%s7527_s13 + $0x1] ss:$0 sm:$0xff] }
0x1d7d   : > { %v6271_v39 = vpop.eup %6270 }
0x1d7e   : > { %v4218_v40 = vmul.f32 %v6271_v39, %v6269_v34 }
0x1d80   : > { %6130 = vmatmul.mubr.msk.f32.vlgmr.msra.gmra.mxu1 %vm1183_vm8, %v4218_v40 }
0x1d81   : > { %6138 = vmatpush3.msra.mxu1 %v5513_v41  ;;  %6145 = vmatprep.mubr.msk.f32.mxu1 %vm6321_vm3, %v6320_v1  ;;  %v5551_v41 = vld [vmem:[%s7530_s16 + $0x78] sm:$0xff] }
0x1d82   : > { %6139 = vmatprep.subr.mxu1 %v6320_v1 }
0x1d83   : > { %6140 = vmatpush3.msra.mxu1 %v5512_v42  ;;  %v5550_v42 = vld [vmem:[%s7530_s16 + $0x70] sm:$0xff] }
0x1d84   : > { %6141 = vmatprep.subr.mxu1 %v6320_v1 }
0x1d85   : > { %6142 = vmatpush3.msra.mxu1 %v5511_v43  ;;  %v5549_v43 = vld [vmem:[%s7530_s16 + $0x68] sm:$0xff] }
0x1d86   : > { %6143 = vmatprep.subr.mxu1 %v6320_v1 }
0x1d87   : > { %6144 = vmatpush3.msra.mxu1 %v5510_v44  ;;  %v5548_v44 = vld [vmem:[%s7530_s16 + $0x60] sm:$0xff] }
0x1d88   : > { %6146 = vmatmul.mubr.msk.f32.vlgmr.msra.gmra.mxu1 %vm872_vm4, %v7036_v11  ;;  %6159 = vmatprep.subr.mxu1 %v6320_v1 }
0x1d89   : > { %6160 = vmatpush3.msra.mxu1 %v5523_v45  ;;  %6167 = vmatprep.mubr.msk.f32.mxu1 %vm6321_vm3, %v6320_v1  ;;  %v5547_v45 = vld [vmem:[%s7530_s16 + $0x58] sm:$0xff] }
0x1d8a   : > { %6161 = vmatprep.subr.mxu1 %v6320_v1 }
0x1d8b   : > { %6162 = vmatpush3.msra.mxu1 %v5522_v46  ;;  %v5546_v46 = vld [vmem:[%s7530_s16 + $0x50] sm:$0xff] }
0x1d8c   : > { %6163 = vmatprep.subr.mxu1 %v6320_v1 }
0x1d8d   : > { %6164 = vmatpush3.msra.mxu1 %v5521_v47  ;;  %v5545_v47 = vld [vmem:[%s7530_s16 + $0x48] sm:$0xff] }
0x1d8e   : > { %6165 = vmatprep.subr.mxu1 %v6320_v1 }
0x1d8f   : > { %6166 = vmatpush3.msra.mxu1 %v5520_v48  ;;  %v5544_v48 = vld [vmem:[%s7530_s16 + $0x40] sm:$0xff] }
0x1d90   : > { %6168 = vmatmul.mubr.msk.f32.vlgmr.msra.gmra.mxu1 %vm872_vm4, %v7036_v11  ;;  %6180 = vmatprep.subr.mxu1 %v6320_v1 }
0x1d91   : > { %6182 = vmatprep.mubr.msk.f32.mxu1 %vm6321_vm3, %v6320_v1  ;;  %6181 = vmatpush3.msra.mxu1 %v5529_v10 }
0x1d92   : > { %6196 = vmatprep.subr.mxu1 %v6320_v1 }
0x1e40   : > { %v4291_v54 = vpop.f32.mrf.mxu1 }
0x1e41   : > { %6135 = vmatmul.mubr.msk.f32.vlgmr.msra.gmra.mxu0 %vm1094_vm5, %v4291_v54 }
0x1e42   : > { %6149 = vmatpush3.msra.mxu0 %v5518_v49  ;;  %v6131_v52 = vpop.f32.mrf.mxu1  ;;  %6156 = vmatprep.mubr.msk.f32.mxu0 %vm6321_vm3, %v6320_v1  ;;  %v5542_v49 = vld [vmem:[%s7529_s15 + $0x1] ss:$0 sm:$0xff] }
0x1e43   : > { %6150 = vmatprep.subr.mxu0 %v6320_v1 }
0x1e44   : > { %6151 = vmatpush3.msra.mxu0 %v5517_v51 }
0x1e45   : > { %6152 = vmatprep.subr.mxu0 %v6320_v1 }
0x1e46   : > { %6153 = vmatpush3.msra.mxu0 %v5516_v53 }
0x1e47   : > { %6154 = vmatprep.subr.mxu0 %v6320_v1 }
0x1e48   : > { %v4442_v56 = vpop.f32.mrf.mxu1  ;;  %6155 = vmatpush3.msra.mxu0 %v5515_v55 }
0x1e49   : > { %6157 = vmatmul.mubr.msk.f32.vlgmr.msra.gmra.mxu0 %vm872_vm4, %v7036_v11  ;;  %6170 = vmatprep.subr.mxu0 %v6320_v1 }
0x1e4a   : > { %v6147_v57 = vpop.f32.mrf.mxu1  ;;  %6172 = vmatprep.mubr.msk.f32.mxu0 %vm6321_vm3, %v6320_v1 }
0x1e50   : > { %v4592_v58 = vpop.f32.mrf.mxu1 }
0x1e52   : > { %v6169_v59 = vpop.f32.mrf.mxu1 }
0x1f01   : > { %v4366_v61 = vpop.f32.mrf.mxu0 }
0x1f02   : > { %v4370_v62 = vadd.f32 %v4366_v61, %v3904_v60 }
0x1f03   : > { %v6136_v63 = vpop.f32.mrf.mxu0 }
0x1f04   : > { %v5554_v63 = vld [vmem:[%s7531_s17 + $0x1] ss:$0 sm:$0xff] }
0x1f09   : > { %v4517_v0 = vpop.f32.mrf.mxu0 }
0x1f0a   : > { %6171 = vmatpush3.xpose.msk.msra.mxu0 %vm1094_vm5, %v4517_v0 }
0x1f0b   : > { %v6158_v2 = vpop.f32.mrf.mxu0  ;;  %6175 = vmatprep.subr.mxu0 %v6320_v1 }
0x1f0d   : > { %6173 = vmatmul.mubr.msk.f32.vlgmr.msra.gmra.mxu0 %vm1094_vm5, %v4442_v56 }
0x1f0e   : > { %6176 = vmatpush3.msk.msra.mxu0 %vm1187_vm6, %v4592_v58  ;;  %6177 = vmatprep.mubr.msk.f32.mxu0 %vm6321_vm3, %v6320_v1 }
0x1f0f   : > { %6185 = vmatprep.subr.mxu0 %v6320_v1 }
0x1fcd   : > { %v4668_v11 = vpop.f32.mrf.mxu0 }
0x1fce   : > { %v4672_v3 = vsel %vm1171_vm7, %v4668_v11, -inf }
0x1fcf   : > { %4673 = vmax.xlane.f32.xlu0 %v4672_v3  ;;  %v6174_v4 = vpop.f32.mrf.mxu0 }
0x2058   : > { %v4674_v5 = vpop.xlane.xlu0 %4673 }
0x2059   : > { %v4675_v6 = vsub.f32 %v4668_v11, %v4674_v5 }
0x205b   : > { %v4676_v7 = vmul.f32 1.442695, %v4675_v6 }
0x205d   : > { %6272 = vpow2.f32 %v4676_v7 }
0x206a   : > { %v6273_v8 = vpop.eup %6272 }
0x206b   : > { %v4678_v9 = vsel %vm1171_vm7, %v6273_v8, 0.0 }
0x206c   : > { %4679 = vadd.xlane.f32.xlu1 %v4678_v9 }
0x20f5   : > { %v4680_v12 = vpop.xlane.xlu1 %4679 }
0x20f6   : > { %6274 = vrcp.f32 %v4680_v12 }
0x2103   : > { %v6275_v13 = vpop.eup %6274 }
0x2104   : > { %v4682_v35 = vmul.f32 %v6275_v13, %v6273_v8 }
0x2106   : > { %6178 = vmatmul.mubr.msk.f32.vlgmr.msra.gmra.mxu0 %vm1183_vm8, %v4682_v35  ;;  %v5555_v35 = vld [vmem:[%s7532_s18] ss:$0 sm:$0xff] }
0x2107   : > { %6193 = vmatprep.mubr.msk.f32.mxu0 %vm6321_vm3, %v6320_v1  ;;  %6186 = vmatpush3.msra.mxu0 %v5540_v28 }
0x2108   : > { %6187 = vmatprep.subr.mxu0 %v6320_v1 }
0x21c6   : > { %v4755_v14 = vpop.f32.mrf.mxu0 }
0x21c7   : > { %6183 = vmatmul.mubr.msk.f32.vlgmr.msra.gmra.mxu1 %vm1094_vm5, %v4755_v14 }
0x21c8   : > { %v6179_v15 = vpop.f32.mrf.mxu0  ;;  %6212 = vmatprep.mubr.msk.f32.mxu1 %vm6321_vm3, %v6320_v1  ;;  %6197 = vmatpush3.msra.mxu1 %v5551_v41 }
0x21c9   : > { %6198 = vmatprep.subr.mxu1 %v6320_v1  ;;  %v5556_v15 = vld [vmem:[%s7533_s19] ss:$0 sm:$0xff] }
0x21ca   : > { %6199 = vmatpush3.msra.mxu1 %v5550_v42 }
0x21cb   : > { %6200 = vmatprep.subr.mxu1 %v6320_v1 }
0x21cc   : > { %6201 = vmatpush3.msra.mxu1 %v5549_v43 }
0x21cd   : > { %6202 = vmatprep.subr.mxu1 %v6320_v1 }
0x21ce   : > { %6203 = vmatpush3.msra.mxu1 %v5548_v44 }
0x21cf   : > { %6204 = vmatprep.subr.mxu1 %v6320_v1 }
0x21d0   : > { %6205 = vmatpush3.msra.mxu1 %v5547_v45 }
0x21d1   : > { %6206 = vmatprep.subr.mxu1 %v6320_v1 }
0x21d2   : > { %6207 = vmatpush3.msra.mxu1 %v5546_v46 }
0x21d3   : > { %6208 = vmatprep.subr.mxu1 %v6320_v1 }
0x21d4   : > { %6209 = vmatpush3.msra.mxu1 %v5545_v47 }
0x21d5   : > { %6210 = vmatprep.subr.mxu1 %v6320_v1 }
0x21d6   : > { %6211 = vmatpush3.msra.mxu1 %v5544_v48 }
0x2287   : > { %v4830_v16 = vpop.f32.mrf.mxu1 }
0x2288   : > { %v4834_v17 = vadd.f32 %v4830_v16, %v4370_v62 }
0x2289   : > { %v6184_v19 = vpop.f32.mrf.mxu1 }
0x228a   : > { %v4835_v20 = vadd.f32 %v4834_v17, %v6992_v50  ;;  %v5539_v50 = vld [vmem:[%s7528_s14 + $0x30] sm:$0xff] }
0x228b   : > { %6188 = vmatpush3.msra.mxu0 %v5539_v50 }
0x228c   : > { %v7332_v21 = vadd.f32 %v5532_v18, %v4835_v20  ;;  %6189 = vmatprep.subr.mxu0 %v6320_v1 }
0x228d   : > { %6190 = vmatpush3.msra.mxu0 %v5538_v29 }
0x228e   : > { %v4849_v22 = vsel %vm839_vm2, %v7332_v21, 0.0  ;;  %6191 = vmatprep.subr.mxu0 %v6320_v1 }
0x228f   : > { %4850 = vadd.xlane.f32.xlu0 %v4849_v22  ;;  %6192 = vmatpush3.msra.mxu0 %v5537_v30 }
0x2318   : > { %v4851_v23 = vpop.xlane.xlu0 %4850 }
0x2319   : > { %v4852_v24 = vmul.f32 0.03125, %v4851_v23 }
0x231b   : > { %v4853_v25 = vsub.f32 %v7332_v21, %v4852_v24 }
0x231d   : > { %v4854_v26 = vmul.f32 %v4853_v25, %v4853_v25 }
0x231f   : > { %v4855_v27 = vsel %vm839_vm2, %v4854_v26, 0.0 }
0x2320   : > { %4856 = vadd.xlane.f32.xlu1 %v4855_v27 }
0x23a9   : > { %v4857_v31 = vpop.xlane.xlu1 %4856 }
0x23aa   : > { %v4858_v32 = vmul.f32 0.03125, %v4857_v31 }
0x23ac   : > { %v4859_v33 = vadd.f32 1e-06, %v4858_v32 }
0x23ae   : > { %6276 = vrsqrt.f32 %v4859_v33 }
0x23bb   : > { %v6277_v34 = vpop.eup %6276 }
0x23bc   : > { %v4861_v37 = vmul.f32 %v6277_v34, %v4853_v25 }
0x23be   : > { %v4868_v39 = vmul.f32 %v5535_v36, %v4861_v37 }
0x23c0   : > { %v4875_v40 = vadd.f32 %v5536_v38, %v4868_v39 }
0x23c2   : > { %6194 = vmatmul.mubr.msk.f32.vlgmr.msra.gmra.mxu0 %vm872_vm4, %v4875_v40 }
0x2482   : > { %v4958_v54 = vpop.f32.mrf.mxu0 }
0x2483   : > { %v4959_v51 = vadd.f32 %v5542_v49, %v4958_v54 }
0x2484   : > { %v6195_v52 = vpop.f32.mrf.mxu0 }
0x2485   : > { %v4962_v53 = vmul.f32 %v4959_v51, %v4959_v51 }
0x2487   : > { %v4963_v55 = vmul.f32 %v4962_v53, %v4959_v51 }
0x2489   : > { %v4964_v56 = vmul.f32 0.044715, %v4963_v55 }
0x248b   : > { %v4965_v57 = vadd.f32 %v4964_v56, %v4959_v51 }
0x248d   : > { %v4966_v58 = vmul.f32 0.7978846, %v4965_v57 }
0x248f   : > { %6278 = vtanh.f32 %v4966_v58 }
0x249c   : > { %v6279_v59 = vpop.eup %6278 }
0x249d   : > { %v4968_v1 = vadd.f32 1.0, %v6279_v59 }
0x249f   : > { %v4969_v60 = vmul.f32 0.5, %v4968_v1 }
0x24a1   : > { %v4970_v61 = vmul.f32 %v4969_v60, %v4959_v51 }
0x24a3   : > { %6213 = vmatmul.mubr.msk.f32.vlgmr.msra.gmra.mxu1 %vm756_vm0, %v4970_v61 }
0x2563   : > { %v5049_v62 = vpop.f32.mrf.mxu1 }
0x2564   : > { %v5053_v0 = vadd.f32 %v5049_v62, %v7332_v21 }
0x2565   : > { %v6214_v2 = vpop.f32.mrf.mxu1 }
0x2566   : > { %v5062_v11 = vadd.f32 %v5554_v63, %v5053_v0 }
0x2568   : > { %v5065_v3 = vsel %vm839_vm2, %v5062_v11, 0.0 }
0x2569   : > { %5066 = vadd.xlane.f32.xlu0 %v5065_v3 }
0x25f2   : > { %v5067_v4 = vpop.xlane.xlu0 %5066 }
0x25f3   : > { %v5068_v5 = vmul.f32 0.03125, %v5067_v4 }
0x25f5   : > { %v5069_v6 = vsub.f32 %v5062_v11, %v5068_v5 }
0x25f7   : > { %v5070_v7 = vmul.f32 %v5069_v6, %v5069_v6 }
0x25f9   : > { %v5071_v8 = vsel %vm839_vm2, %v5070_v7, 0.0 }
0x25fa   : > { %5072 = vadd.xlane.f32.xlu1 %v5071_v8 }
0x2683   : > { %v5073_v9 = vpop.xlane.xlu1 %5072 }
0x2684   : > { %v5074_v10 = vmul.f32 0.03125, %v5073_v9 }
0x2686   : > { %v5075_v12 = vadd.f32 1e-06, %v5074_v10 }
0x2688   : > { %6280 = vrsqrt.f32 %v5075_v12 }
0x2695   : > { %v6281_v13 = vpop.eup %6280 }
0x2696   : > { %v5077_v14 = vmul.f32 %v6281_v13, %v5069_v6 }
0x2698   : > { %v5084_v16 = vmul.f32 %v5555_v35, %v5077_v14  ;;  %5098 = sbr.rel (%p5558_p4) target bundleno = 10269 (0x281d), region = 116 }
0x269a   : > { %v5091_v17 = vadd.f32 %v5556_v15, %v5084_v16 }
0x269c   : > { %5574 = vst.msk [vmem:[%s5572_s27 - $0x1] sm:$0x1] %vm5093_vm9, %v5091_v17 }
0x269d   : > { %v5215_v22 = vld [vmem:[%s7536_s22 + $0xb8] sm:$0xff]  ;;  %v5214_v23 = vld [vmem:[%s7536_s22 + $0xb0] sm:$0xff]  ;;  %v5213_v24 = vld [vmem:[%s7536_s22 + $0xa8] sm:$0xff]  ;;  %v6324_v46 = vmov 0.0   ;;  %vm5153_vm10 = vcmask 779264   ;;  %vm5150_vm11 = vcmask 785408  }
0x269e   : > { %5227 = vmatprep.subr.mxu0 %v5215_v22  ;;  %v5212_v25 = vld [vmem:[%s7536_s22 + $0xa0] sm:$0xff]  ;;  %v5211_v26 = vld [vmem:[%s7536_s22 + $0x98] sm:$0xff]  ;;  %v5210_v27 = vld [vmem:[%s7536_s22 + $0x90] sm:$0xff]  ;;  %5283 = vmatprep.mubr.f32.mxu0 %v6324_v46 }
0x269f   : > { %5228 = vmatpush1.msra.mxu0 %v5214_v23  ;;  %v5209_v28 = vld [vmem:[%s7536_s22 + $0x88] sm:$0xff]  ;;  %v5208_v50 = vld [vmem:[%s7536_s22 + $0x80] sm:$0xff]  ;;  %v5207_v29 = vld [vmem:[%s7536_s22 + $0x78] sm:$0xff] }
0x26a0   : > { %5229 = vmatprep.subr.mxu0 %v5213_v24  ;;  %v5206_v30 = vld [vmem:[%s7536_s22 + $0x70] sm:$0xff]  ;;  %v5205_v31 = vld [vmem:[%s7536_s22 + $0x68] sm:$0xff]  ;;  %v5204_v32 = vld [vmem:[%s7536_s22 + $0x60] sm:$0xff] }
0x26a1   : > { %5230 = vmatpush1.msra.mxu0 %v5212_v25  ;;  %v5203_v33 = vld [vmem:[%s7536_s22 + $0x58] sm:$0xff]  ;;  %v5202_v34 = vld [vmem:[%s7536_s22 + $0x50] sm:$0xff]  ;;  %v5201_v36 = vld [vmem:[%s7536_s22 + $0x48] sm:$0xff] }
0x26a2   : > { %5231 = vmatprep.subr.mxu0 %v5211_v26  ;;  %v5200_v37 = vld [vmem:[%s7536_s22 + $0x40] sm:$0xff]  ;;  %v5199_v38 = vld [vmem:[%s7536_s22 + $0x38] sm:$0xff]  ;;  %v5198_v39 = vld [vmem:[%s7536_s22 + $0x30] sm:$0xff] }
0x26a3   : > { %v5561_v18 = vld [vmem:[#allocation2 + $0x3] ss:$0 sm:$0xff]  ;;  %v5559_v19 = vld [vmem:[#allocation2 + $0x2] ss:$0 sm:$0xff]  ;;  %v5562_v20 = vld [vmem:[#allocation2 + $0x5] ss:$0 sm:$0xff]  ;;  %5232 = vmatpush1.msra.mxu0 %v5210_v27 }
0x26a4   : > { %5133 = vrot.lane.b32.xlu0 %v5561_v18, %s6322_s28  ;;  %5109 = vrot.lane.b32.xlu1 %v5559_v19, %s6322_s28  ;;  %v5560_v21 = vld [vmem:[#allocation2 + $0x4] ss:$0 sm:$0xff]  ;;  %v5197_v40 = vld [vmem:[%s7536_s22 + $0x28] sm:$0xff]  ;;  %v5195_v42 = vld [vmem:[%s7536_s22 + $0x18] sm:$0xff] }
0x26a5   : > { %5233 = vmatprep.subr.mxu0 %v5209_v28  ;;  %v5196_v41 = vld [vmem:[%s7536_s22 + $0x20] sm:$0xff]  ;;  %v5194_v43 = vld [vmem:[%s7536_s22 + $0x10] sm:$0xff]  ;;  %v5193_v44 = vld [vmem:[%s7536_s22 + $0x8] sm:$0xff] }
0x26a6   : > { %5234 = vmatpush1.msra.mxu0 %v5208_v50  ;;  %v5192_v45 = vld [vmem:[%s7536_s22] sm:$0xff] }
0x26a7   : > { %5235 = vmatprep.subr.mxu0 %v5207_v29  ;;  %v5123_v49 = vld [vmem:[#allocation2 + $0x1] sm:$0x1]  ;;  %v5099_v54 = vld [vmem:[#allocation2] sm:$0x1] }
0x26a8   : > { %5141 = vrot.lane.b32.xlu0 %v5562_v20, %s6323_s29  ;;  %5117 = vrot.lane.b32.xlu1 %v5560_v21, %s6323_s29  ;;  %v5563_v16 = vld [vmem:[%s7534_s20] ss:$0 sm:$0xff] }
0x26a9   : > { %5236 = vmatpush1.msra.mxu0 %v5206_v30  ;;  %v5564_v18 = vld [vmem:[%s7535_s21] ss:$0 sm:$0xff] }
0x26aa   : > { %5237 = vmatprep.subr.mxu0 %v5205_v31 }
0x26ab   : > { %5238 = vmatpush1.msra.mxu0 %v5204_v32 }
0x26ac   : > { %5239 = vmatprep.subr.mxu0 %v5203_v33 }
0x26ad   : > { %5240 = vmatpush1.msra.mxu0 %v5202_v34 }
0x26ae   : > { %5241 = vmatprep.subr.mxu0 %v5201_v36 }
0x26af   : > { %5242 = vmatpush1.msra.mxu0 %v5200_v37 }
0x26b0   : > { %5243 = vmatprep.subr.mxu0 %v5199_v38 }
0x26b1   : > { %5244 = vmatpush1.msra.mxu0 %v5198_v39 }
0x26b2   : > { %5245 = vmatprep.subr.mxu0 %v5197_v40 }
0x26b3   : > { %5246 = vmatpush1.msra.mxu0 %v5196_v41 }
0x26b4   : > { %5247 = vmatprep.subr.mxu0 %v5195_v42 }
0x26b5   : > { %5248 = vmatpush1.msra.mxu0 %v5194_v43 }
0x26b6   : > { %5249 = vmatprep.subr.mxu0 %v5193_v44 }
0x26b7   : > { %5250 = vmatpush1.msra.mxu0 %v5192_v45 }
0x2716   : > { %v5134_v47 = vpop.permute.xlu0 %5133  ;;  %v5110_v48 = vpop.permute.xlu1 %5109 }
0x2717   : > { %v5144_v51 = vsel %vm872_vm4, %v5123_v49, %v5134_v47  ;;  %v5120_v52 = vsel %vm872_vm4, %v5099_v54, %v5110_v48 }
0x271a   : > { %v5142_v53 = vpop.permute.xlu0 %5141  ;;  %v5118_v55 = vpop.permute.xlu1 %5117 }
0x271b   : > { %v5145_v56 = vsel %vm756_vm0, %v5144_v51, %v5142_v53  ;;  %v5121_v58 = vsel %vm756_vm0, %v5120_v52, %v5118_v55 }
0x271c   : > { %v5147_v57 = vrot.slane %v5145_v56, 7 }
0x271e   : > { %v5149_v59 = vsel %vm833_vm1, %v5121_v58, %v5147_v57 }
0x271f   : > { %v5154_v1 = vsel %vm5153_vm10, %v5149_v59, 0.0  ;;  %v5151_v60 = vsel %vm5150_vm11, %v5149_v59, 0.0 }
0x2720   : > { %v5155_v61 = vrot.slane %v5154_v1, 4  ;;  %5152 = vst [vmem:[%s7538_s24] sm:$0x3] %v5151_v60 }
0x2722   : > { %v5156_v62 = vadd.f32 %v5155_v61, %v5154_v1 }
0x2724   : > { %v5157_v63 = vrot.slane %v5156_v62, 2 }
0x2726   : > { %v5158_v0 = vadd.f32 %v5157_v63, %v5156_v62 }
0x2728   : > { %v5159_v2 = vrot.slane %v5158_v0, 1 }
0x272a   : > { %v5160_v11 = vadd.f32 %v5159_v2, %v5158_v0 }
0x272c   : > { %v5162_v3 = vmul.f32 0.5, %v5160_v11 }
0x272e   : > { %v5163_v4 = vsub.f32 %v5149_v59, %v5162_v3 }
0x2730   : > { %v5164_v5 = vmul.f32 %v5163_v4, %v5163_v4 }
0x2732   : > { %v5165_v6 = vsel %vm5153_vm10, %v5164_v5, 0.0 }
0x2733   : > { %v5166_v7 = vrot.slane %v5165_v6, 4 }
0x2735   : > { %v5167_v8 = vadd.f32 %v5166_v7, %v5165_v6 }
0x2737   : > { %v5168_v9 = vrot.slane %v5167_v8, 2 }
0x2739   : > { %v5169_v10 = vadd.f32 %v5168_v9, %v5167_v8 }
0x273b   : > { %v5170_v12 = vrot.slane %v5169_v10, 1 }
0x273d   : > { %v5171_v13 = vadd.f32 %v5170_v12, %v5169_v10 }
0x273f   : > { %v5172_v35 = vmul.f32 0.5, %v5171_v13 }
0x2741   : > { %v5173_v14 = vadd.f32 1e-05, %v5172_v35 }
0x2743   : > { %6282 = vrsqrt.f32 %v5173_v14 }
0x2750   : > { %v6283_v15 = vpop.eup %6282 }
0x2751   : > { %v5175_v17 = vmul.f32 %v6283_v15, %v5163_v4 }
0x2753   : > { %v5183_v19 = vmul.f32 %v5563_v16, %v5175_v17 }
0x2755   : > { %v5191_v20 = vadd.f32 %v5564_v18, %v5183_v19 }
0x2757   : > { %5565 = vmatmul.mubr.msk.f32.vlgmr.msra.gmra.mxu0 %vm5150_vm11, %v5191_v20 }
0x2817   : > { %v5285_v21 = vpop.f32.mrf.mxu0 }
0x2819   : > { %v5287_v22 = vpop.f32.mrf.mxu0 }
0x281a   : > { %v5292_v23 = vcombine.low %v5285_v21, %v5287_v22 }
0x281c   : > { %5566 = vst.sshfl [vmem:[#allocation3] sm:$0x33 pattern:$0x76325410] %v5292_v23 }
0x281d PF: > { %p6219_p5 = scmp.eq.s32.totalorder %s6457_s26, 5  ;;  %s6325_s1 = smov [#allocation3]  }
0x281e   : > { %s5309_s27 = sshll.u32 %s6325_s1, 4  ;;  %s5310_s27 = int_to_ptr.vmem [resolvable:$true] %s5309_s27 }
0x281f   : > { %s6284_s2 = scalar_lea.vmem %s5310_s27, 64  ;;  %p6291_p9 = scmp.lt.s32.totalorder %s5310_s27, %s5310_s27 }
0x2820   : > { %p6285_p6 = scmp.ne.s32.totalorder %s5310_s27, %s6284_s2  ;;  %p6292_p10 = scmp.lt.s32.totalorder %s6284_s2, %s6284_s2 }
0x2822   : > { %p6286_p7 = pnand %p6285_p6, %p6219_p5  ;;  %p6293_p11 = por %p6292_p10, %p6291_p9 }
0x2824   : > { %p6287_p8 = pneg %p6286_p7 }
0x2826   : > { %p6294_p12 = pnand %p6293_p11, %p6287_p8 }
0x2828   : > { %6297 = shalt.err (!%p6294_p12)
}
0x2829   : > { %6216 = dma.vmem_to_hbm [thread:$0]  (%p6219_p5), %s5310_s27, 64, %s7537_s23, [#allocation4]  }
0x282a   : > { %6313 = dma.done.wait (%p6219_p5), [#allocation4], 64  }
0x282b   : > { %6315 = vsyncadd (%p6219_p5), [#allocation4], 4294967232 }
0x282c PF: > { %s36_s5 = sadd.s32 1, %s6318_s5  }
0x282d   : > { %p33_p13 = scmp.ge.s32.totalorder %s36_s5, 8  }
0x282f   :  { %35 = sbr.rel (!%p33_p13) target bundleno = 11 (0xb), region = 194 }
0x2834   :  { %5328 = vsyncpa [#allocation4], 1 }
0x2835   :  { %5330 = vsyncpa [#allocation4 + $0x1], 1 }

</bundles_post_ra>
